<compile_context>
chip_gen: v5e
topology: v5e:2x2
jax: 0.10.0
libtpu: 0.0.40
codegen_flags: <defaults>
</compile_context>

<pallas_src>
import math
import numpy as np
import jax
import jax.numpy as jnp
from jax.experimental import pallas as pl

HIDDEN = 32
NUM_ENTITIES = 20
NUM_RELATIONS = 8
NUM_CALIBRATES = 2
NUM_HEADS = 1
GAMMA = 12.0
EPSILON = 2.0


# ----------------------------- in-kernel helpers -----------------------------

def _gru(inp, hid, wi, wh, bi, bh):
    """nn.GRUCell(input=inp, hidden=hid) with per-gate [H,H] matmuls (no lane concat).
    wi/wh: [3, H, H] stacked (r, z, n); bi/bh: [3, 1, H]."""
    r = jax.nn.sigmoid(jnp.dot(inp, wi[0], preferred_element_type=jnp.float32) + bi[0]
                       + jnp.dot(hid, wh[0], preferred_element_type=jnp.float32) + bh[0])
    z = jax.nn.sigmoid(jnp.dot(inp, wi[1], preferred_element_type=jnp.float32) + bi[1]
                       + jnp.dot(hid, wh[1], preferred_element_type=jnp.float32) + bh[1])
    n = jnp.tanh(jnp.dot(inp, wi[2], preferred_element_type=jnp.float32) + bi[2]
                 + r * (jnp.dot(hid, wh[2], preferred_element_type=jnp.float32) + bh[2]))
    return (1.0 - z) * n + z * hid


def _segment_softmax(score, valid, A):
    """torch_geometric.utils.softmax over target-node segments.
    score:[E,C], valid:[E,1], A:[E,E] with A[i,j]=1 iff edges i,j are valid and share dst.
    Exact per-segment max (via A) + single-matmul segment sum."""
    neg = jnp.float32(-1e30)
    masked = jnp.where(valid > 0.5, score, neg)                              # [E, C]
    # per-edge segment max: max_j { masked[j, c] : A[i, j] == 1 }
    bcast = jnp.where(A[:, :, None] > 0.5, masked[None, :, :], neg)          # [E, E, C]
    seg_max = jnp.max(bcast, axis=1)                                         # [E, C]
    exp_s = valid * jnp.exp(masked - seg_max)                                # padded -> 0
    denom = jnp.dot(A, exp_s, preferred_element_type=jnp.float32) + 1e-16    # [E, C]
    return exp_s / denom


# ----------------------------- the fused kernel -----------------------------

def _make_bidag_kernel(num_pred_layers, num_calibrates, hidden):
    H = hidden
    L = num_pred_layers
    C = num_calibrates
    inv_sqrt_h = 1.0 / math.sqrt(H)

    def kernel(x_init_ref,
               p_src_ref, p_scat_ref, p_a_ref, p_valid_ref, p_rel_ref,
               p_wi_ref, p_wh_ref, p_bi_ref, p_bh_ref, p_wa_ref, p_ba_ref,
               c_src_ref, c_dst_ref, c_scat_ref, c_a_ref, c_valid_ref, c_rel_ref,
               c_aw_ref, c_ab_ref, c_wi_ref, c_wh_ref, c_bi_ref, c_bh_ref,
               out_ref):
        x = x_init_ref[...]                                   # [N, H]

        # shared GRUPredict weights
        p_wi = p_wi_ref[...]; p_wh = p_wh_ref[...]
        p_bi = p_bi_ref[...]; p_bh = p_bh_ref[...]
        wa = p_wa_ref[...];  ba = p_ba_ref[...]

        # ---------- GRUPredict over the DAG layers (fully unrolled, L static) ----------
        for l in range(L):
            src_oh = p_src_ref[l]                             # [E1, N] gather one-hot
            scat   = p_scat_ref[l]                            # [N, E1] scatter one-hot
            A      = p_a_ref[l]                               # [E1, E1]
            valid  = p_valid_ref[l]                           # [E1, 1]
            rel    = p_rel_ref[l]                             # [E1, H]
            x_j = jnp.dot(src_oh, x, preferred_element_type=jnp.float32)
            msg = _gru(x_j, rel, p_wi, p_wh, p_bi, p_bh)      # GRUCell(x_j, edge_attr)
            score = jnp.dot(msg, wa, preferred_element_type=jnp.float32) + ba
            a = _segment_softmax(score, valid, A)             # [E1, H]
            x = x + jnp.dot(scat, msg * a, preferred_element_type=jnp.float32)

        out_ref[0] = x

        # ---------- GRUCalibrate layers (AttnConv + GRUCell, residual) ----------
        # bi-directional graph tables are shared by every calibrate layer.
        c_src = c_src_ref[...]; c_dst = c_dst_ref[...]; c_scat = c_scat_ref[...]
        c_A = c_a_ref[...]; c_valid = c_valid_ref[...]; c_rel = c_rel_ref[...]
        for c in range(C):
            aw = c_aw_ref[c]                                  # [6,H,H]: q,k_rel,k_xj,v_rel,v_xj,w
            ab = c_ab_ref[c]                                  # [4,1,H]: bq,bk,bv,bw
            wi = c_wi_ref[c]; wh = c_wh_ref[c]
            bi = c_bi_ref[c]; bh = c_bh_ref[c]
            x_i = jnp.dot(c_dst, x, preferred_element_type=jnp.float32)   # x_0_i
            x_j = jnp.dot(c_src, x, preferred_element_type=jnp.float32)   # x_1_j
            q = jnp.dot(x_i, aw[0], preferred_element_type=jnp.float32) + ab[0]
            k = (jnp.dot(c_rel, aw[1], preferred_element_type=jnp.float32)
                 + jnp.dot(x_j, aw[2], preferred_element_type=jnp.float32) + ab[1])
            v = (jnp.dot(c_rel, aw[3], preferred_element_type=jnp.float32)
                 + jnp.dot(x_j, aw[4], preferred_element_type=jnp.float32) + ab[2])
            alpha = jnp.sum(q * k, axis=-1, keepdims=True) * inv_sqrt_h    # [E2, 1]
            alpha = jnp.where(alpha >= 0.0, alpha, 0.2 * alpha)            # leaky_relu(0.2)
            a = _segment_softmax(alpha, c_valid, c_A)                      # [E2, 1]
            aggr = jnp.dot(c_scat, a * v, preferred_element_type=jnp.float32)
            attn_msg = jnp.dot(aggr, aw[5], preferred_element_type=jnp.float32) + ab[3]
            x = _gru(x, attn_msg, wi, wh, bi, bh) + x                      # residual
            out_ref[1 + c] = x

    return kernel


# ----------------------------- host-side init & weight packing -----------------------------

def _uniform(key, shape, a, b):
    return jax.random.uniform(key, shape, jnp.float32, a, b)


def _glorot(key, shape):
    limit = math.sqrt(6.0 / (shape[0] + shape[1]))
    return jax.random.uniform(key, shape, jnp.float32, -limit, limit)


def init_params(key):
    keys = iter(jax.random.split(key, 64))
    emb_range = (GAMMA + EPSILON) / HIDDEN
    s = 1.0 / math.sqrt(HIDDEN)
    H = HIDDEN
    zb = jnp.zeros((1, H), jnp.float32)
    p = {
        "entity_emb": _uniform(next(keys), (NUM_ENTITIES, H), -emb_range, emb_range),
        "relation_emb": _uniform(next(keys), (NUM_RELATIONS, H), -emb_range, emb_range),
        "pred": {
            "wih_t": _uniform(next(keys), (H, 3 * H), -s, s),
            "whh_t": _uniform(next(keys), (H, 3 * H), -s, s),
            "bih": _uniform(next(keys), (1, 3 * H), -s, s),
            "bhh": _uniform(next(keys), (1, 3 * H), -s, s),
            "wa_t": _glorot(next(keys), (H, H)),
            "ba": zb,
        },
        "calib": [],
    }
    for _ in range(NUM_CALIBRATES):
        p["calib"].append({
            "wq_t": _glorot(next(keys), (H, H)), "bq": zb,
            "wk_t": _glorot(next(keys), (2 * H, H)), "bk": zb,
            "wv_t": _glorot(next(keys), (2 * H, H)), "bv": zb,
            "ww_t": _glorot(next(keys), (H, H)), "bw": zb,
            "wih_t": _uniform(next(keys), (H, 3 * H), -s, s),
            "whh_t": _uniform(next(keys), (H, 3 * H), -s, s),
            "bih": _uniform(next(keys), (1, 3 * H), -s, s),
            "bhh": _uniform(next(keys), (1, 3 * H), -s, s),
        })
    return p


def _split_gru(wih_t, whh_t, bih, bhh, H):
    """Split nn.GRUCell weights into per-gate [H,H] blocks (columns r|z|n of the
    transposed weight) so the kernel does 6 lane-0-aligned matmuls instead of concats."""
    wi = jnp.stack([wih_t[:, :H], wih_t[:, H:2 * H], wih_t[:, 2 * H:]])   # [3,H,H]
    wh = jnp.stack([whh_t[:, :H], whh_t[:, H:2 * H], whh_t[:, 2 * H:]])
    bi = jnp.stack([bih[:, :H], bih[:, H:2 * H], bih[:, 2 * H:]])          # [3,1,H]
    bh = jnp.stack([bhh[:, :H], bhh[:, H:2 * H], bhh[:, 2 * H:]])
    return wi, wh, bi, bh


def _pack_kernel_weights(params):
    H = HIDDEN
    pr = params["pred"]
    p_wi, p_wh, p_bi, p_bh = _split_gru(pr["wih_t"], pr["whh_t"], pr["bih"], pr["bhh"], H)
    aw, ab, gwi, gwh, gbi, gbh = [], [], [], [], [], []
    for c in params["calib"]:
        # K/V act on cat(edge_attr, x_j): split their [2H,H] weights by rows.
        aw.append(jnp.stack([c["wq_t"], c["wk_t"][:H], c["wk_t"][H:],
                             c["wv_t"][:H], c["wv_t"][H:], c["ww_t"]]))     # [6,H,H]
        ab.append(jnp.stack([c["bq"], c["bk"], c["bv"], c["bw"]]))          # [4,1,H]
        wi, wh, bi, bh = _split_gru(c["wih_t"], c["whh_t"], c["bih"], c["bhh"], H)
        gwi.append(wi); gwh.append(wh); gbi.append(bi); gbh.append(bh)
    return dict(
        pred_wi=p_wi, pred_wh=p_wh, pred_bi=p_bi, pred_bh=p_bh,
        pred_wa=pr["wa_t"], pred_ba=pr["ba"],
        calib_aw=jnp.stack(aw), calib_ab=jnp.stack(ab),
        calib_wi=jnp.stack(gwi), calib_wh=jnp.stack(gwh),
        calib_bi=jnp.stack(gbi), calib_bh=jnp.stack(gbh))


# ----------------------------- forward (single pallas_call, no grid) -----------------------------

def _get_inv_relation(r):
    return np.asarray(r) ^ 1


def _ceil8(n):
    return max(8, -(-int(n) // 8) * 8)


def bidag_forward(params, graph):
    H = HIDDEN
    N = int(graph["num_nodes"])
    edge_index = np.asarray(graph["edge_index"])
    edge_type = np.asarray(graph["edge_type"])
    layer_to_edge_idxes = graph["layer_to_edge_idxes"]
    L = max(layer_to_edge_idxes.keys()) + 1
    C = len(params["calib"])
    rel_emb = np.asarray(params["relation_emb"])

    # ---- per-DAG-layer tables (host precomputed one-hots / same-segment matrices) ----
    E1 = _ceil8(max(len(v) for v in layer_to_edge_idxes.values()))
    p_src_oh = np.zeros((L, E1, N), np.float32)
    p_scat = np.zeros((L, N, E1), np.float32)
    p_A = np.zeros((L, E1, E1), np.float32)
    p_valid = np.zeros((L, E1, 1), np.float32)
    p_rel = np.zeros((L, E1, H), np.float32)
    for l in range(L):
        e = list(layer_to_edge_idxes[l]); k = len(e)
        s = edge_index[0, e].astype(np.int64)
        d = edge_index[1, e].astype(np.int64)
        p_src_oh[l, np.arange(k), s] = 1.0
        p_scat[l, d, np.arange(k)] = 1.0
        p_A[l, :k, :k] = (d[:, None] == d[None, :]).astype(np.float32)
        p_valid[l, :k, 0] = 1.0
        p_rel[l, :k] = rel_emb[edge_type[e]]

    # ---- bi-directional tables for the calibrate layers (shared across all C steps) ----
    src, dst = edge_index[0], edge_index[1]
    bi_src = np.concatenate([src, dst]).astype(np.int64)
    bi_dst = np.concatenate([dst, src]).astype(np.int64)
    bi_rty = np.concatenate([edge_type, _get_inv_relation(edge_type)]).astype(np.int64)
    Eb = len(bi_src); E2 = _ceil8(Eb)
    c_src_oh = np.zeros((E2, N), np.float32); c_src_oh[np.arange(Eb), bi_src] = 1.0
    c_dst_oh = np.zeros((E2, N), np.float32); c_dst_oh[np.arange(Eb), bi_dst] = 1.0
    c_scat = np.zeros((N, E2), np.float32); c_scat[bi_dst, np.arange(Eb)] = 1.0
    c_A = np.zeros((E2, E2), np.float32)
    c_A[:Eb, :Eb] = (bi_dst[:, None] == bi_dst[None, :]).astype(np.float32)
    c_valid = np.zeros((E2, 1), np.float32); c_valid[:Eb, 0] = 1.0
    c_rel = np.zeros((E2, H), np.float32); c_rel[:Eb] = rel_emb[bi_rty]

    # ---- x[0] init: anchor nodes get their entity embedding ----
    x_init = jnp.zeros((N, H), jnp.float32).at[
        jnp.asarray(graph["anchor_node_idxes"])].set(
        params["entity_emb"][jnp.asarray(graph["anchor_node_entities"])])

    w = _pack_kernel_weights(params)
    kernel = _make_bidag_kernel(L, C, H)

    # Single kernel launch, no grid: everything (<200 KiB) is VMEM-resident and all
    # layers are unrolled in-kernel, so there is no per-step pipeline overhead.
    out = pl.pallas_call(
        kernel,
        out_shape=jax.ShapeDtypeStruct((1 + C, N, H), jnp.float32),
    )(
        x_init,
        jnp.asarray(p_src_oh), jnp.asarray(p_scat), jnp.asarray(p_A),
        jnp.asarray(p_valid), jnp.asarray(p_rel),
        w["pred_wi"], w["pred_wh"], w["pred_bi"], w["pred_bh"],
        w["pred_wa"], w["pred_ba"],
        jnp.asarray(c_src_oh), jnp.asarray(c_dst_oh), jnp.asarray(c_scat),
        jnp.asarray(c_A), jnp.asarray(c_valid), jnp.asarray(c_rel),
        w["calib_aw"], w["calib_ab"],
        w["calib_wi"], w["calib_wh"], w["calib_bi"], w["calib_bh"],
    )
    return [out[i] for i in range(1 + C)]


# ----------------------------- pure-JAX reference (for checking) -----------------------------

def _gru_ref(x, h, wih_t, whh_t, bih, bhh):
    H = x.shape[1]
    gi = x @ wih_t + bih
    gh = h @ whh_t + bhh
    r = jax.nn.sigmoid(gi[:, :H] + gh[:, :H])
    z = jax.nn.sigmoid(gi[:, H:2 * H] + gh[:, H:2 * H])
    n = jnp.tanh(gi[:, 2 * H:] + r * gh[:, 2 * H:])
    return (1.0 - z) * n + z * h


def _seg_softmax_ref(score, dst, num_nodes):
    seg_max = jax.ops.segment_max(score, dst, num_segments=num_nodes)
    e = jnp.exp(score - seg_max[dst])
    seg_sum = jax.ops.segment_sum(e, dst, num_segments=num_nodes)
    return e / (seg_sum[dst] + 1e-16)


def bidag_forward_ref(params, graph):
    H = HIDDEN
    N = int(graph["num_nodes"])
    edge_index = np.asarray(graph["edge_index"])
    edge_type = np.asarray(graph["edge_type"])
    pr = params["pred"]
    x = jnp.zeros((N, H), jnp.float32).at[jnp.asarray(graph["anchor_node_idxes"])].set(
        params["entity_emb"][jnp.asarray(graph["anchor_node_entities"])])
    for l in range(max(graph["layer_to_edge_idxes"].keys()) + 1):
        e_idx = list(graph["layer_to_edge_idxes"][l])
        s = jnp.asarray(edge_index[0, e_idx]); d = jnp.asarray(edge_index[1, e_idx])
        rel = params["relation_emb"][jnp.asarray(edge_type[e_idx])]
        msg = _gru_ref(x[s], rel, pr["wih_t"], pr["whh_t"], pr["bih"], pr["bhh"])
        a = _seg_softmax_ref(msg @ pr["wa_t"] + pr["ba"], d, N)
        x = x + jax.ops.segment_sum(msg * a, d, num_segments=N)
    outs = [x]
    s = jnp.asarray(np.concatenate([edge_index[0], edge_index[1]]))
    d = jnp.asarray(np.concatenate([edge_index[1], edge_index[0]]))
    rel = params["relation_emb"][jnp.asarray(
        np.concatenate([edge_type, _get_inv_relation(edge_type)]))]
    for c in params["calib"]:
        x_i, x_j = x[d], x[s]
        kv_in = jnp.concatenate([rel, x_j], axis=1)
        q = x_i @ c["wq_t"] + c["bq"]
        k = kv_in @ c["wk_t"] + c["bk"]
        v = kv_in @ c["wv_t"] + c["bv"]
        alpha = jnp.sum(q * k, axis=-1, keepdims=True) / math.sqrt(H)
        alpha = jnp.where(alpha >= 0, alpha, 0.2 * alpha)
        a = _seg_softmax_ref(alpha, d, N)
        aggr = jax.ops.segment_sum(a * v, d, num_segments=N)
        x = _gru_ref(x, aggr @ c["ww_t"] + c["bw"],
                     c["wih_t"], c["whh_t"], c["bih"], c["bhh"]) + x
        outs.append(x)
    return outs


# ----------------------------- main -----------------------------

if __name__ == "__main__":
    # small synthetic query DAG: 8 nodes, 3 anchors, 8 edges in 3 layers
    graph = {
        "num_nodes": 8,
        "anchor_node_idxes": np.array([0, 1, 2], dtype=np.int64),
        "anchor_node_entities": np.array([3, 7, 11], dtype=np.int64),
        "edge_index": np.array([[0, 1, 2, 3, 4, 3, 5, 6],
                                [3, 3, 4, 5, 5, 6, 7, 7]], dtype=np.int64),
        "edge_type": np.array([1, 2, 3, 4, 0, 5, 6, 7], dtype=np.int64),
        "layer_to_edge_idxes": {0: [0, 1, 2], 1: [3, 4, 5], 2: [6, 7]},
    }

    params = init_params(jax.random.PRNGKey(0))
    outs = bidag_forward(params, graph)          # list of length 1 + NUM_CALIBRATES
    for o in outs:
        jax.block_until_ready(o)

    assert len(outs) == 1 + NUM_CALIBRATES
    assert all(o.shape == (graph["num_nodes"], HIDDEN) for o in outs)
    assert all(bool(jnp.all(jnp.isfinite(o))) for o in outs)

    # cross-check against a plain-JAX reference of the PyTorch forward
    refs = bidag_forward_ref(params, graph)
    for o, r in zip(outs, refs):
        np.testing.assert_allclose(np.asarray(o), np.asarray(r), rtol=1e-2, atol=1e-2)

    print("KERNEL_OK")
</pallas_src>

<mosaic_0001>
module attributes {stable_mosaic.version = 11 : i64} {
  func.func @kernel(%arg0: memref<8x32xf32, #tpu.memory_space<vmem>>, %arg1: memref<3x8x8xf32, #tpu.memory_space<vmem>>, %arg2: memref<3x8x8xf32, #tpu.memory_space<vmem>>, %arg3: memref<3x8x8xf32, #tpu.memory_space<vmem>>, %arg4: memref<3x8x1xf32, #tpu.memory_space<vmem>>, %arg5: memref<3x8x32xf32, #tpu.memory_space<vmem>>, %arg6: memref<3x32x32xf32, #tpu.memory_space<vmem>>, %arg7: memref<3x32x32xf32, #tpu.memory_space<vmem>>, %arg8: memref<3x1x32xf32, #tpu.memory_space<vmem>>, %arg9: memref<3x1x32xf32, #tpu.memory_space<vmem>>, %arg10: memref<32x32xf32, #tpu.memory_space<vmem>>, %arg11: memref<1x32xf32, #tpu.memory_space<vmem>>, %arg12: memref<16x8xf32, #tpu.memory_space<vmem>>, %arg13: memref<16x8xf32, #tpu.memory_space<vmem>>, %arg14: memref<8x16xf32, #tpu.memory_space<vmem>>, %arg15: memref<16x16xf32, #tpu.memory_space<vmem>>, %arg16: memref<16x1xf32, #tpu.memory_space<vmem>>, %arg17: memref<16x32xf32, #tpu.memory_space<vmem>>, %arg18: memref<2x6x32x32xf32, #tpu.memory_space<vmem>>, %arg19: memref<2x4x1x32xf32, #tpu.memory_space<vmem>>, %arg20: memref<2x3x32x32xf32, #tpu.memory_space<vmem>>, %arg21: memref<2x3x32x32xf32, #tpu.memory_space<vmem>>, %arg22: memref<2x3x1x32xf32, #tpu.memory_space<vmem>>, %arg23: memref<2x3x1x32xf32, #tpu.memory_space<vmem>>, %arg24: memref<3x8x32xf32, #tpu.memory_space<vmem>>) attributes {dimension_semantics = [], scalar_prefetch = 0 : i64, scratch_operands = 0 : i64, tpu.core_type = #tpu.core_type<tc>} {
    %c0 = arith.constant 0 : index
    %c0_0 = arith.constant 0 : index
    %0 = vector.load %arg0[%c0, %c0_0] : memref<8x32xf32, #tpu.memory_space<vmem>>, vector<8x32xf32>
    %c0_1 = arith.constant 0 : index
    %c0_2 = arith.constant 0 : index
    %c0_3 = arith.constant 0 : index
    %1 = vector.load %arg6[%c0_1, %c0_2, %c0_3] : memref<3x32x32xf32, #tpu.memory_space<vmem>>, vector<3x32x32xf32>
    %c0_4 = arith.constant 0 : index
    %c0_5 = arith.constant 0 : index
    %c0_6 = arith.constant 0 : index
    %2 = vector.load %arg7[%c0_4, %c0_5, %c0_6] : memref<3x32x32xf32, #tpu.memory_space<vmem>>, vector<3x32x32xf32>
    %c0_7 = arith.constant 0 : index
    %c0_8 = arith.constant 0 : index
    %c0_9 = arith.constant 0 : index
    %3 = vector.load %arg8[%c0_7, %c0_8, %c0_9] : memref<3x1x32xf32, #tpu.memory_space<vmem>>, vector<3x1x32xf32>
    %c0_10 = arith.constant 0 : index
    %c0_11 = arith.constant 0 : index
    %c0_12 = arith.constant 0 : index
    %4 = vector.load %arg9[%c0_10, %c0_11, %c0_12] : memref<3x1x32xf32, #tpu.memory_space<vmem>>, vector<3x1x32xf32>
    %c0_13 = arith.constant 0 : index
    %c0_14 = arith.constant 0 : index
    %5 = vector.load %arg10[%c0_13, %c0_14] : memref<32x32xf32, #tpu.memory_space<vmem>>, vector<32x32xf32>
    %c0_15 = arith.constant 0 : index
    %c0_16 = arith.constant 0 : index
    %6 = vector.load %arg11[%c0_15, %c0_16] : memref<1x32xf32, #tpu.memory_space<vmem>>, vector<1x32xf32>
    %c0_17 = arith.constant 0 : index
    %c0_18 = arith.constant 0 : index
    %c0_19 = arith.constant 0 : index
    %7 = vector.load %arg1[%c0_17, %c0_18, %c0_19] : memref<3x8x8xf32, #tpu.memory_space<vmem>>, vector<1x8x8xf32>
    %8 = vector.shape_cast %7 : vector<1x8x8xf32> to vector<8x8xf32>
    %c0_20 = arith.constant 0 : index
    %c0_21 = arith.constant 0 : index
    %c0_22 = arith.constant 0 : index
    %9 = vector.load %arg2[%c0_20, %c0_21, %c0_22] : memref<3x8x8xf32, #tpu.memory_space<vmem>>, vector<1x8x8xf32>
    %10 = vector.shape_cast %9 : vector<1x8x8xf32> to vector<8x8xf32>
    %c0_23 = arith.constant 0 : index
    %c0_24 = arith.constant 0 : index
    %c0_25 = arith.constant 0 : index
    %11 = vector.load %arg3[%c0_23, %c0_24, %c0_25] : memref<3x8x8xf32, #tpu.memory_space<vmem>>, vector<1x8x8xf32>
    %12 = vector.shape_cast %11 : vector<1x8x8xf32> to vector<8x8xf32>
    %c0_26 = arith.constant 0 : index
    %c0_27 = arith.constant 0 : index
    %c0_28 = arith.constant 0 : index
    %13 = vector.load %arg4[%c0_26, %c0_27, %c0_28] : memref<3x8x1xf32, #tpu.memory_space<vmem>>, vector<1x8x1xf32>
    %14 = vector.shape_cast %13 : vector<1x8x1xf32> to vector<8x1xf32>
    %c0_29 = arith.constant 0 : index
    %c0_30 = arith.constant 0 : index
    %c0_31 = arith.constant 0 : index
    %15 = vector.load %arg5[%c0_29, %c0_30, %c0_31] : memref<3x8x32xf32, #tpu.memory_space<vmem>>, vector<1x8x32xf32>
    %16 = vector.shape_cast %15 : vector<1x8x32xf32> to vector<8x32xf32>
    %cst = arith.constant dense<0.000000e+00> : vector<8x32xf32>
    %17 = tpu.matmul %8, %0, %cst {dimension_numbers = #tpu.dot_dimension_numbers<[1], [0], [0], [1], [0, 0, 1, 1], [], []>} : vector<8x8xf32>, vector<8x32xf32>, vector<8x32xf32> -> vector<8x32xf32>
    %18 = vector.extract_strided_slice %1 {offsets = [0, 0, 0], sizes = [1, 32, 32], strides = [1, 1, 1]} : vector<3x32x32xf32> to vector<1x32x32xf32>
    %19 = vector.shape_cast %18 : vector<1x32x32xf32> to vector<32x32xf32>
    %cst_32 = arith.constant dense<0.000000e+00> : vector<8x32xf32>
    %20 = tpu.matmul %17, %19, %cst_32 {dimension_numbers = #tpu.dot_dimension_numbers<[1], [0], [0], [1], [0, 0, 1, 1], [], []>} : vector<8x32xf32>, vector<32x32xf32>, vector<8x32xf32> -> vector<8x32xf32>
    %21 = vector.extract_strided_slice %3 {offsets = [0, 0, 0], sizes = [1, 1, 32], strides = [1, 1, 1]} : vector<3x1x32xf32> to vector<1x1x32xf32>
    %22 = vector.shape_cast %21 : vector<1x1x32xf32> to vector<1x32xf32>
    %23 = vector.broadcast %22 : vector<1x32xf32> to vector<8x32xf32>
    %24 = arith.addf %20, %23 : vector<8x32xf32>
    %25 = vector.extract_strided_slice %2 {offsets = [0, 0, 0], sizes = [1, 32, 32], strides = [1, 1, 1]} : vector<3x32x32xf32> to vector<1x32x32xf32>
    %26 = vector.shape_cast %25 : vector<1x32x32xf32> to vector<32x32xf32>
    %cst_33 = arith.constant dense<0.000000e+00> : vector<8x32xf32>
    %27 = tpu.matmul %16, %26, %cst_33 {dimension_numbers = #tpu.dot_dimension_numbers<[1], [0], [0], [1], [0, 0, 1, 1], [], []>} : vector<8x32xf32>, vector<32x32xf32>, vector<8x32xf32> -> vector<8x32xf32>
    %28 = arith.addf %24, %27 : vector<8x32xf32>
    %29 = vector.extract_strided_slice %4 {offsets = [0, 0, 0], sizes = [1, 1, 32], strides = [1, 1, 1]} : vector<3x1x32xf32> to vector<1x1x32xf32>
    %30 = vector.shape_cast %29 : vector<1x1x32xf32> to vector<1x32xf32>
    %31 = vector.broadcast %30 : vector<1x32xf32> to vector<8x32xf32>
    %32 = arith.addf %28, %31 : vector<8x32xf32>
    %33 = arith.negf %32 : vector<8x32xf32>
    %34 = math.exp %33 : vector<8x32xf32>
    %cst_34 = arith.constant 1.000000e+00 : f32
    %35 = vector.broadcast %cst_34 : f32 to vector<8x32xf32>
    %36 = arith.addf %35, %34 : vector<8x32xf32>
    %37 = arith.divf %35, %36 : vector<8x32xf32>
    %38 = vector.extract_strided_slice %1 {offsets = [1, 0, 0], sizes = [1, 32, 32], strides = [1, 1, 1]} : vector<3x32x32xf32> to vector<1x32x32xf32>
    %39 = vector.shape_cast %38 : vector<1x32x32xf32> to vector<32x32xf32>
    %cst_35 = arith.constant dense<0.000000e+00> : vector<8x32xf32>
    %40 = tpu.matmul %17, %39, %cst_35 {dimension_numbers = #tpu.dot_dimension_numbers<[1], [0], [0], [1], [0, 0, 1, 1], [], []>} : vector<8x32xf32>, vector<32x32xf32>, vector<8x32xf32> -> vector<8x32xf32>
    %41 = vector.extract_strided_slice %3 {offsets = [1, 0, 0], sizes = [1, 1, 32], strides = [1, 1, 1]} : vector<3x1x32xf32> to vector<1x1x32xf32>
    %42 = vector.shape_cast %41 : vector<1x1x32xf32> to vector<1x32xf32>
    %43 = vector.broadcast %42 : vector<1x32xf32> to vector<8x32xf32>
    %44 = arith.addf %40, %43 : vector<8x32xf32>
    %45 = vector.extract_strided_slice %2 {offsets = [1, 0, 0], sizes = [1, 32, 32], strides = [1, 1, 1]} : vector<3x32x32xf32> to vector<1x32x32xf32>
    %46 = vector.shape_cast %45 : vector<1x32x32xf32> to vector<32x32xf32>
    %cst_36 = arith.constant dense<0.000000e+00> : vector<8x32xf32>
    %47 = tpu.matmul %16, %46, %cst_36 {dimension_numbers = #tpu.dot_dimension_numbers<[1], [0], [0], [1], [0, 0, 1, 1], [], []>} : vector<8x32xf32>, vector<32x32xf32>, vector<8x32xf32> -> vector<8x32xf32>
    %48 = arith.addf %44, %47 : vector<8x32xf32>
    %49 = vector.extract_strided_slice %4 {offsets = [1, 0, 0], sizes = [1, 1, 32], strides = [1, 1, 1]} : vector<3x1x32xf32> to vector<1x1x32xf32>
    %50 = vector.shape_cast %49 : vector<1x1x32xf32> to vector<1x32xf32>
    %51 = vector.broadcast %50 : vector<1x32xf32> to vector<8x32xf32>
    %52 = arith.addf %48, %51 : vector<8x32xf32>
    %53 = arith.negf %52 : vector<8x32xf32>
    %54 = math.exp %53 : vector<8x32xf32>
    %cst_37 = arith.constant 1.000000e+00 : f32
    %55 = vector.broadcast %cst_37 : f32 to vector<8x32xf32>
    %56 = arith.addf %55, %54 : vector<8x32xf32>
    %57 = arith.divf %55, %56 : vector<8x32xf32>
    %58 = vector.extract_strided_slice %1 {offsets = [2, 0, 0], sizes = [1, 32, 32], strides = [1, 1, 1]} : vector<3x32x32xf32> to vector<1x32x32xf32>
    %59 = vector.shape_cast %58 : vector<1x32x32xf32> to vector<32x32xf32>
    %cst_38 = arith.constant dense<0.000000e+00> : vector<8x32xf32>
    %60 = tpu.matmul %17, %59, %cst_38 {dimension_numbers = #tpu.dot_dimension_numbers<[1], [0], [0], [1], [0, 0, 1, 1], [], []>} : vector<8x32xf32>, vector<32x32xf32>, vector<8x32xf32> -> vector<8x32xf32>
    %61 = vector.extract_strided_slice %3 {offsets = [2, 0, 0], sizes = [1, 1, 32], strides = [1, 1, 1]} : vector<3x1x32xf32> to vector<1x1x32xf32>
    %62 = vector.shape_cast %61 : vector<1x1x32xf32> to vector<1x32xf32>
    %63 = vector.broadcast %62 : vector<1x32xf32> to vector<8x32xf32>
    %64 = arith.addf %60, %63 : vector<8x32xf32>
    %65 = vector.extract_strided_slice %2 {offsets = [2, 0, 0], sizes = [1, 32, 32], strides = [1, 1, 1]} : vector<3x32x32xf32> to vector<1x32x32xf32>
    %66 = vector.shape_cast %65 : vector<1x32x32xf32> to vector<32x32xf32>
    %cst_39 = arith.constant dense<0.000000e+00> : vector<8x32xf32>
    %67 = tpu.matmul %16, %66, %cst_39 {dimension_numbers = #tpu.dot_dimension_numbers<[1], [0], [0], [1], [0, 0, 1, 1], [], []>} : vector<8x32xf32>, vector<32x32xf32>, vector<8x32xf32> -> vector<8x32xf32>
    %68 = vector.extract_strided_slice %4 {offsets = [2, 0, 0], sizes = [1, 1, 32], strides = [1, 1, 1]} : vector<3x1x32xf32> to vector<1x1x32xf32>
    %69 = vector.shape_cast %68 : vector<1x1x32xf32> to vector<1x32xf32>
    %70 = vector.broadcast %69 : vector<1x32xf32> to vector<8x32xf32>
    %71 = arith.addf %67, %70 : vector<8x32xf32>
    %72 = arith.mulf %37, %71 : vector<8x32xf32>
    %73 = arith.addf %64, %72 : vector<8x32xf32>
    %74 = math.tanh %73 : vector<8x32xf32>
    %cst_40 = arith.constant 1.000000e+00 : f32
    %75 = vector.broadcast %cst_40 : f32 to vector<8x32xf32>
    %76 = arith.subf %75, %57 : vector<8x32xf32>
    %77 = arith.mulf %76, %74 : vector<8x32xf32>
    %78 = arith.mulf %57, %16 : vector<8x32xf32>
    %79 = arith.addf %77, %78 : vector<8x32xf32>
    %cst_41 = arith.constant dense<0.000000e+00> : vector<8x32xf32>
    %80 = tpu.matmul %79, %5, %cst_41 {dimension_numbers = #tpu.dot_dimension_numbers<[1], [0], [0], [1], [0, 0, 1, 1], [], []>} : vector<8x32xf32>, vector<32x32xf32>, vector<8x32xf32> -> vector<8x32xf32>
    %81 = vector.broadcast %6 : vector<1x32xf32> to vector<8x32xf32>
    %82 = arith.addf %80, %81 : vector<8x32xf32>
    %cst_42 = arith.constant 5.000000e-01 : f32
    %83 = vector.broadcast %cst_42 : f32 to vector<8x1xf32>
    %84 = arith.cmpf ogt, %14, %83 : vector<8x1xf32>
    %cst_43 = arith.constant -1.000000e+30 : f32
    %85 = vector.shape_cast %84 : vector<8x1xi1> to vector<8x1xi1>
    %86 = vector.broadcast %85 : vector<8x1xi1> to vector<8x32xi1>
    %87 = vector.broadcast %cst_43 : f32 to vector<8x32xf32>
    %88 = arith.select %86, %82, %87 : vector<8x32xi1>, vector<8x32xf32>
    %89 = vector.shape_cast %12 : vector<8x8xf32> to vector<8x8x1xf32>
    %cst_44 = arith.constant 5.000000e-01 : f32
    %90 = vector.broadcast %cst_44 : f32 to vector<8x8x1xf32>
    %91 = arith.cmpf ogt, %89, %90 : vector<8x8x1xf32>
    %92 = vector.shape_cast %88 : vector<8x32xf32> to vector<1x8x32xf32>
    %cst_45 = arith.constant -1.000000e+30 : f32
    %93 = vector.shape_cast %91 : vector<8x8x1xi1> to vector<8x8x1xi1>
    %94 = vector.broadcast %93 : vector<8x8x1xi1> to vector<8x8x32xi1>
    %95 = vector.shape_cast %92 : vector<1x8x32xf32> to vector<1x8x32xf32>
    %96 = vector.broadcast %95 : vector<1x8x32xf32> to vector<8x8x32xf32>
    %97 = vector.broadcast %cst_45 : f32 to vector<8x8x32xf32>
    %98 = arith.select %94, %96, %97 : vector<8x8x32xi1>, vector<8x8x32xf32>
    %cst_46 = arith.constant dense<0xFF800000> : vector<8x32xf32>
    %99 = vector.multi_reduction <maximumf>, %98, %cst_46 [1] : vector<8x8x32xf32> to vector<8x32xf32>
    %100 = arith.subf %88, %99 : vector<8x32xf32>
    %101 = math.exp %100 : vector<8x32xf32>
    %102 = vector.broadcast %14 : vector<8x1xf32> to vector<8x32xf32>
    %103 = arith.mulf %102, %101 : vector<8x32xf32>
    %cst_47 = arith.constant dense<0.000000e+00> : vector<8x32xf32>
    %104 = tpu.matmul %12, %103, %cst_47 {dimension_numbers = #tpu.dot_dimension_numbers<[1], [0], [0], [1], [0, 0, 1, 1], [], []>} : vector<8x8xf32>, vector<8x32xf32>, vector<8x32xf32> -> vector<8x32xf32>
    %cst_48 = arith.constant 1.000000e-16 : f32
    %105 = vector.broadcast %cst_48 : f32 to vector<8x32xf32>
    %106 = arith.addf %104, %105 : vector<8x32xf32>
    %107 = arith.divf %103, %106 : vector<8x32xf32>
    %108 = arith.mulf %79, %107 : vector<8x32xf32>
    %cst_49 = arith.constant dense<0.000000e+00> : vector<8x32xf32>
    %109 = tpu.matmul %10, %108, %cst_49 {dimension_numbers = #tpu.dot_dimension_numbers<[1], [0], [0], [1], [0, 0, 1, 1], [], []>} : vector<8x8xf32>, vector<8x32xf32>, vector<8x32xf32> -> vector<8x32xf32>
    %110 = arith.addf %0, %109 : vector<8x32xf32>
    %c1 = arith.constant 1 : index
    %c0_50 = arith.constant 0 : index
    %c0_51 = arith.constant 0 : index
    %111 = vector.load %arg1[%c1, %c0_50, %c0_51] : memref<3x8x8xf32, #tpu.memory_space<vmem>>, vector<1x8x8xf32>
    %112 = vector.shape_cast %111 : vector<1x8x8xf32> to vector<8x8xf32>
    %c1_52 = arith.constant 1 : index
    %c0_53 = arith.constant 0 : index
    %c0_54 = arith.constant 0 : index
    %113 = vector.load %arg2[%c1_52, %c0_53, %c0_54] : memref<3x8x8xf32, #tpu.memory_space<vmem>>, vector<1x8x8xf32>
    %114 = vector.shape_cast %113 : vector<1x8x8xf32> to vector<8x8xf32>
    %c1_55 = arith.constant 1 : index
    %c0_56 = arith.constant 0 : index
    %c0_57 = arith.constant 0 : index
    %115 = vector.load %arg3[%c1_55, %c0_56, %c0_57] : memref<3x8x8xf32, #tpu.memory_space<vmem>>, vector<1x8x8xf32>
    %116 = vector.shape_cast %115 : vector<1x8x8xf32> to vector<8x8xf32>
    %c1_58 = arith.constant 1 : index
    %c0_59 = arith.constant 0 : index
    %c0_60 = arith.constant 0 : index
    %117 = vector.load %arg4[%c1_58, %c0_59, %c0_60] : memref<3x8x1xf32, #tpu.memory_space<vmem>>, vector<1x8x1xf32>
    %118 = vector.shape_cast %117 : vector<1x8x1xf32> to vector<8x1xf32>
    %c1_61 = arith.constant 1 : index
    %c0_62 = arith.constant 0 : index
    %c0_63 = arith.constant 0 : index
    %119 = vector.load %arg5[%c1_61, %c0_62, %c0_63] : memref<3x8x32xf32, #tpu.memory_space<vmem>>, vector<1x8x32xf32>
    %120 = vector.shape_cast %119 : vector<1x8x32xf32> to vector<8x32xf32>
    %cst_64 = arith.constant dense<0.000000e+00> : vector<8x32xf32>
    %121 = tpu.matmul %112, %110, %cst_64 {dimension_numbers = #tpu.dot_dimension_numbers<[1], [0], [0], [1], [0, 0, 1, 1], [], []>} : vector<8x8xf32>, vector<8x32xf32>, vector<8x32xf32> -> vector<8x32xf32>
    %122 = vector.extract_strided_slice %1 {offsets = [0, 0, 0], sizes = [1, 32, 32], strides = [1, 1, 1]} : vector<3x32x32xf32> to vector<1x32x32xf32>
    %123 = vector.shape_cast %122 : vector<1x32x32xf32> to vector<32x32xf32>
    %cst_65 = arith.constant dense<0.000000e+00> : vector<8x32xf32>
    %124 = tpu.matmul %121, %123, %cst_65 {dimension_numbers = #tpu.dot_dimension_numbers<[1], [0], [0], [1], [0, 0, 1, 1], [], []>} : vector<8x32xf32>, vector<32x32xf32>, vector<8x32xf32> -> vector<8x32xf32>
    %125 = vector.extract_strided_slice %3 {offsets = [0, 0, 0], sizes = [1, 1, 32], strides = [1, 1, 1]} : vector<3x1x32xf32> to vector<1x1x32xf32>
    %126 = vector.shape_cast %125 : vector<1x1x32xf32> to vector<1x32xf32>
    %127 = vector.broadcast %126 : vector<1x32xf32> to vector<8x32xf32>
    %128 = arith.addf %124, %127 : vector<8x32xf32>
    %129 = vector.extract_strided_slice %2 {offsets = [0, 0, 0], sizes = [1, 32, 32], strides = [1, 1, 1]} : vector<3x32x32xf32> to vector<1x32x32xf32>
    %130 = vector.shape_cast %129 : vector<1x32x32xf32> to vector<32x32xf32>
    %cst_66 = arith.constant dense<0.000000e+00> : vector<8x32xf32>
    %131 = tpu.matmul %120, %130, %cst_66 {dimension_numbers = #tpu.dot_dimension_numbers<[1], [0], [0], [1], [0, 0, 1, 1], [], []>} : vector<8x32xf32>, vector<32x32xf32>, vector<8x32xf32> -> vector<8x32xf32>
    %132 = arith.addf %128, %131 : vector<8x32xf32>
    %133 = vector.extract_strided_slice %4 {offsets = [0, 0, 0], sizes = [1, 1, 32], strides = [1, 1, 1]} : vector<3x1x32xf32> to vector<1x1x32xf32>
    %134 = vector.shape_cast %133 : vector<1x1x32xf32> to vector<1x32xf32>
    %135 = vector.broadcast %134 : vector<1x32xf32> to vector<8x32xf32>
    %136 = arith.addf %132, %135 : vector<8x32xf32>
    %137 = arith.negf %136 : vector<8x32xf32>
    %138 = math.exp %137 : vector<8x32xf32>
    %cst_67 = arith.constant 1.000000e+00 : f32
    %139 = vector.broadcast %cst_67 : f32 to vector<8x32xf32>
    %140 = arith.addf %139, %138 : vector<8x32xf32>
    %141 = arith.divf %139, %140 : vector<8x32xf32>
    %142 = vector.extract_strided_slice %1 {offsets = [1, 0, 0], sizes = [1, 32, 32], strides = [1, 1, 1]} : vector<3x32x32xf32> to vector<1x32x32xf32>
    %143 = vector.shape_cast %142 : vector<1x32x32xf32> to vector<32x32xf32>
    %cst_68 = arith.constant dense<0.000000e+00> : vector<8x32xf32>
    %144 = tpu.matmul %121, %143, %cst_68 {dimension_numbers = #tpu.dot_dimension_numbers<[1], [0], [0], [1], [0, 0, 1, 1], [], []>} : vector<8x32xf32>, vector<32x32xf32>, vector<8x32xf32> -> vector<8x32xf32>
    %145 = vector.extract_strided_slice %3 {offsets = [1, 0, 0], sizes = [1, 1, 32], strides = [1, 1, 1]} : vector<3x1x32xf32> to vector<1x1x32xf32>
    %146 = vector.shape_cast %145 : vector<1x1x32xf32> to vector<1x32xf32>
    %147 = vector.broadcast %146 : vector<1x32xf32> to vector<8x32xf32>
    %148 = arith.addf %144, %147 : vector<8x32xf32>
    %149 = vector.extract_strided_slice %2 {offsets = [1, 0, 0], sizes = [1, 32, 32], strides = [1, 1, 1]} : vector<3x32x32xf32> to vector<1x32x32xf32>
    %150 = vector.shape_cast %149 : vector<1x32x32xf32> to vector<32x32xf32>
    %cst_69 = arith.constant dense<0.000000e+00> : vector<8x32xf32>
    %151 = tpu.matmul %120, %150, %cst_69 {dimension_numbers = #tpu.dot_dimension_numbers<[1], [0], [0], [1], [0, 0, 1, 1], [], []>} : vector<8x32xf32>, vector<32x32xf32>, vector<8x32xf32> -> vector<8x32xf32>
    %152 = arith.addf %148, %151 : vector<8x32xf32>
    %153 = vector.extract_strided_slice %4 {offsets = [1, 0, 0], sizes = [1, 1, 32], strides = [1, 1, 1]} : vector<3x1x32xf32> to vector<1x1x32xf32>
    %154 = vector.shape_cast %153 : vector<1x1x32xf32> to vector<1x32xf32>
    %155 = vector.broadcast %154 : vector<1x32xf32> to vector<8x32xf32>
    %156 = arith.addf %152, %155 : vector<8x32xf32>
    %157 = arith.negf %156 : vector<8x32xf32>
    %158 = math.exp %157 : vector<8x32xf32>
    %cst_70 = arith.constant 1.000000e+00 : f32
    %159 = vector.broadcast %cst_70 : f32 to vector<8x32xf32>
    %160 = arith.addf %159, %158 : vector<8x32xf32>
    %161 = arith.divf %159, %160 : vector<8x32xf32>
    %162 = vector.extract_strided_slice %1 {offsets = [2, 0, 0], sizes = [1, 32, 32], strides = [1, 1, 1]} : vector<3x32x32xf32> to vector<1x32x32xf32>
    %163 = vector.shape_cast %162 : vector<1x32x32xf32> to vector<32x32xf32>
    %cst_71 = arith.constant dense<0.000000e+00> : vector<8x32xf32>
    %164 = tpu.matmul %121, %163, %cst_71 {dimension_numbers = #tpu.dot_dimension_numbers<[1], [0], [0], [1], [0, 0, 1, 1], [], []>} : vector<8x32xf32>, vector<32x32xf32>, vector<8x32xf32> -> vector<8x32xf32>
    %165 = vector.extract_strided_slice %3 {offsets = [2, 0, 0], sizes = [1, 1, 32], strides = [1, 1, 1]} : vector<3x1x32xf32> to vector<1x1x32xf32>
    %166 = vector.shape_cast %165 : vector<1x1x32xf32> to vector<1x32xf32>
    %167 = vector.broadcast %166 : vector<1x32xf32> to vector<8x32xf32>
    %168 = arith.addf %164, %167 : vector<8x32xf32>
    %169 = vector.extract_strided_slice %2 {offsets = [2, 0, 0], sizes = [1, 32, 32], strides = [1, 1, 1]} : vector<3x32x32xf32> to vector<1x32x32xf32>
    %170 = vector.shape_cast %169 : vector<1x32x32xf32> to vector<32x32xf32>
    %cst_72 = arith.constant dense<0.000000e+00> : vector<8x32xf32>
    %171 = tpu.matmul %120, %170, %cst_72 {dimension_numbers = #tpu.dot_dimension_numbers<[1], [0], [0], [1], [0, 0, 1, 1], [], []>} : vector<8x32xf32>, vector<32x32xf32>, vector<8x32xf32> -> vector<8x32xf32>
    %172 = vector.extract_strided_slice %4 {offsets = [2, 0, 0], sizes = [1, 1, 32], strides = [1, 1, 1]} : vector<3x1x32xf32> to vector<1x1x32xf32>
    %173 = vector.shape_cast %172 : vector<1x1x32xf32> to vector<1x32xf32>
    %174 = vector.broadcast %173 : vector<1x32xf32> to vector<8x32xf32>
    %175 = arith.addf %171, %174 : vector<8x32xf32>
    %176 = arith.mulf %141, %175 : vector<8x32xf32>
    %177 = arith.addf %168, %176 : vector<8x32xf32>
    %178 = math.tanh %177 : vector<8x32xf32>
    %cst_73 = arith.constant 1.000000e+00 : f32
    %179 = vector.broadcast %cst_73 : f32 to vector<8x32xf32>
    %180 = arith.subf %179, %161 : vector<8x32xf32>
    %181 = arith.mulf %180, %178 : vector<8x32xf32>
    %182 = arith.mulf %161, %120 : vector<8x32xf32>
    %183 = arith.addf %181, %182 : vector<8x32xf32>
    %cst_74 = arith.constant dense<0.000000e+00> : vector<8x32xf32>
    %184 = tpu.matmul %183, %5, %cst_74 {dimension_numbers = #tpu.dot_dimension_numbers<[1], [0], [0], [1], [0, 0, 1, 1], [], []>} : vector<8x32xf32>, vector<32x32xf32>, vector<8x32xf32> -> vector<8x32xf32>
    %185 = vector.broadcast %6 : vector<1x32xf32> to vector<8x32xf32>
    %186 = arith.addf %184, %185 : vector<8x32xf32>
    %cst_75 = arith.constant 5.000000e-01 : f32
    %187 = vector.broadcast %cst_75 : f32 to vector<8x1xf32>
    %188 = arith.cmpf ogt, %118, %187 : vector<8x1xf32>
    %cst_76 = arith.constant -1.000000e+30 : f32
    %189 = vector.shape_cast %188 : vector<8x1xi1> to vector<8x1xi1>
    %190 = vector.broadcast %189 : vector<8x1xi1> to vector<8x32xi1>
    %191 = vector.broadcast %cst_76 : f32 to vector<8x32xf32>
    %192 = arith.select %190, %186, %191 : vector<8x32xi1>, vector<8x32xf32>
    %193 = vector.shape_cast %116 : vector<8x8xf32> to vector<8x8x1xf32>
    %cst_77 = arith.constant 5.000000e-01 : f32
    %194 = vector.broadcast %cst_77 : f32 to vector<8x8x1xf32>
    %195 = arith.cmpf ogt, %193, %194 : vector<8x8x1xf32>
    %196 = vector.shape_cast %192 : vector<8x32xf32> to vector<1x8x32xf32>
    %cst_78 = arith.constant -1.000000e+30 : f32
    %197 = vector.shape_cast %195 : vector<8x8x1xi1> to vector<8x8x1xi1>
    %198 = vector.broadcast %197 : vector<8x8x1xi1> to vector<8x8x32xi1>
    %199 = vector.shape_cast %196 : vector<1x8x32xf32> to vector<1x8x32xf32>
    %200 = vector.broadcast %199 : vector<1x8x32xf32> to vector<8x8x32xf32>
    %201 = vector.broadcast %cst_78 : f32 to vector<8x8x32xf32>
    %202 = arith.select %198, %200, %201 : vector<8x8x32xi1>, vector<8x8x32xf32>
    %cst_79 = arith.constant dense<0xFF800000> : vector<8x32xf32>
    %203 = vector.multi_reduction <maximumf>, %202, %cst_79 [1] : vector<8x8x32xf32> to vector<8x32xf32>
    %204 = arith.subf %192, %203 : vector<8x32xf32>
    %205 = math.exp %204 : vector<8x32xf32>
    %206 = vector.broadcast %118 : vector<8x1xf32> to vector<8x32xf32>
    %207 = arith.mulf %206, %205 : vector<8x32xf32>
    %cst_80 = arith.constant dense<0.000000e+00> : vector<8x32xf32>
    %208 = tpu.matmul %116, %207, %cst_80 {dimension_numbers = #tpu.dot_dimension_numbers<[1], [0], [0], [1], [0, 0, 1, 1], [], []>} : vector<8x8xf32>, vector<8x32xf32>, vector<8x32xf32> -> vector<8x32xf32>
    %cst_81 = arith.constant 1.000000e-16 : f32
    %209 = vector.broadcast %cst_81 : f32 to vector<8x32xf32>
    %210 = arith.addf %208, %209 : vector<8x32xf32>
    %211 = arith.divf %207, %210 : vector<8x32xf32>
    %212 = arith.mulf %183, %211 : vector<8x32xf32>
    %cst_82 = arith.constant dense<0.000000e+00> : vector<8x32xf32>
    %213 = tpu.matmul %114, %212, %cst_82 {dimension_numbers = #tpu.dot_dimension_numbers<[1], [0], [0], [1], [0, 0, 1, 1], [], []>} : vector<8x8xf32>, vector<8x32xf32>, vector<8x32xf32> -> vector<8x32xf32>
    %214 = arith.addf %110, %213 : vector<8x32xf32>
    %c2 = arith.constant 2 : index
    %c0_83 = arith.constant 0 : index
    %c0_84 = arith.constant 0 : index
    %215 = vector.load %arg1[%c2, %c0_83, %c0_84] : memref<3x8x8xf32, #tpu.memory_space<vmem>>, vector<1x8x8xf32>
    %216 = vector.shape_cast %215 : vector<1x8x8xf32> to vector<8x8xf32>
    %c2_85 = arith.constant 2 : index
    %c0_86 = arith.constant 0 : index
    %c0_87 = arith.constant 0 : index
    %217 = vector.load %arg2[%c2_85, %c0_86, %c0_87] : memref<3x8x8xf32, #tpu.memory_space<vmem>>, vector<1x8x8xf32>
    %218 = vector.shape_cast %217 : vector<1x8x8xf32> to vector<8x8xf32>
    %c2_88 = arith.constant 2 : index
    %c0_89 = arith.constant 0 : index
    %c0_90 = arith.constant 0 : index
    %219 = vector.load %arg3[%c2_88, %c0_89, %c0_90] : memref<3x8x8xf32, #tpu.memory_space<vmem>>, vector<1x8x8xf32>
    %220 = vector.shape_cast %219 : vector<1x8x8xf32> to vector<8x8xf32>
    %c2_91 = arith.constant 2 : index
    %c0_92 = arith.constant 0 : index
    %c0_93 = arith.constant 0 : index
    %221 = vector.load %arg4[%c2_91, %c0_92, %c0_93] : memref<3x8x1xf32, #tpu.memory_space<vmem>>, vector<1x8x1xf32>
    %222 = vector.shape_cast %221 : vector<1x8x1xf32> to vector<8x1xf32>
    %c2_94 = arith.constant 2 : index
    %c0_95 = arith.constant 0 : index
    %c0_96 = arith.constant 0 : index
    %223 = vector.load %arg5[%c2_94, %c0_95, %c0_96] : memref<3x8x32xf32, #tpu.memory_space<vmem>>, vector<1x8x32xf32>
    %224 = vector.shape_cast %223 : vector<1x8x32xf32> to vector<8x32xf32>
    %cst_97 = arith.constant dense<0.000000e+00> : vector<8x32xf32>
    %225 = tpu.matmul %216, %214, %cst_97 {dimension_numbers = #tpu.dot_dimension_numbers<[1], [0], [0], [1], [0, 0, 1, 1], [], []>} : vector<8x8xf32>, vector<8x32xf32>, vector<8x32xf32> -> vector<8x32xf32>
    %226 = vector.extract_strided_slice %1 {offsets = [0, 0, 0], sizes = [1, 32, 32], strides = [1, 1, 1]} : vector<3x32x32xf32> to vector<1x32x32xf32>
    %227 = vector.shape_cast %226 : vector<1x32x32xf32> to vector<32x32xf32>
    %cst_98 = arith.constant dense<0.000000e+00> : vector<8x32xf32>
    %228 = tpu.matmul %225, %227, %cst_98 {dimension_numbers = #tpu.dot_dimension_numbers<[1], [0], [0], [1], [0, 0, 1, 1], [], []>} : vector<8x32xf32>, vector<32x32xf32>, vector<8x32xf32> -> vector<8x32xf32>
    %229 = vector.extract_strided_slice %3 {offsets = [0, 0, 0], sizes = [1, 1, 32], strides = [1, 1, 1]} : vector<3x1x32xf32> to vector<1x1x32xf32>
    %230 = vector.shape_cast %229 : vector<1x1x32xf32> to vector<1x32xf32>
    %231 = vector.broadcast %230 : vector<1x32xf32> to vector<8x32xf32>
    %232 = arith.addf %228, %231 : vector<8x32xf32>
    %233 = vector.extract_strided_slice %2 {offsets = [0, 0, 0], sizes = [1, 32, 32], strides = [1, 1, 1]} : vector<3x32x32xf32> to vector<1x32x32xf32>
    %234 = vector.shape_cast %233 : vector<1x32x32xf32> to vector<32x32xf32>
    %cst_99 = arith.constant dense<0.000000e+00> : vector<8x32xf32>
    %235 = tpu.matmul %224, %234, %cst_99 {dimension_numbers = #tpu.dot_dimension_numbers<[1], [0], [0], [1], [0, 0, 1, 1], [], []>} : vector<8x32xf32>, vector<32x32xf32>, vector<8x32xf32> -> vector<8x32xf32>
    %236 = arith.addf %232, %235 : vector<8x32xf32>
    %237 = vector.extract_strided_slice %4 {offsets = [0, 0, 0], sizes = [1, 1, 32], strides = [1, 1, 1]} : vector<3x1x32xf32> to vector<1x1x32xf32>
    %238 = vector.shape_cast %237 : vector<1x1x32xf32> to vector<1x32xf32>
    %239 = vector.broadcast %238 : vector<1x32xf32> to vector<8x32xf32>
    %240 = arith.addf %236, %239 : vector<8x32xf32>
    %241 = arith.negf %240 : vector<8x32xf32>
    %242 = math.exp %241 : vector<8x32xf32>
    %cst_100 = arith.constant 1.000000e+00 : f32
    %243 = vector.broadcast %cst_100 : f32 to vector<8x32xf32>
    %244 = arith.addf %243, %242 : vector<8x32xf32>
    %245 = arith.divf %243, %244 : vector<8x32xf32>
    %246 = vector.extract_strided_slice %1 {offsets = [1, 0, 0], sizes = [1, 32, 32], strides = [1, 1, 1]} : vector<3x32x32xf32> to vector<1x32x32xf32>
    %247 = vector.shape_cast %246 : vector<1x32x32xf32> to vector<32x32xf32>
    %cst_101 = arith.constant dense<0.000000e+00> : vector<8x32xf32>
    %248 = tpu.matmul %225, %247, %cst_101 {dimension_numbers = #tpu.dot_dimension_numbers<[1], [0], [0], [1], [0, 0, 1, 1], [], []>} : vector<8x32xf32>, vector<32x32xf32>, vector<8x32xf32> -> vector<8x32xf32>
    %249 = vector.extract_strided_slice %3 {offsets = [1, 0, 0], sizes = [1, 1, 32], strides = [1, 1, 1]} : vector<3x1x32xf32> to vector<1x1x32xf32>
    %250 = vector.shape_cast %249 : vector<1x1x32xf32> to vector<1x32xf32>
    %251 = vector.broadcast %250 : vector<1x32xf32> to vector<8x32xf32>
    %252 = arith.addf %248, %251 : vector<8x32xf32>
    %253 = vector.extract_strided_slice %2 {offsets = [1, 0, 0], sizes = [1, 32, 32], strides = [1, 1, 1]} : vector<3x32x32xf32> to vector<1x32x32xf32>
    %254 = vector.shape_cast %253 : vector<1x32x32xf32> to vector<32x32xf32>
    %cst_102 = arith.constant dense<0.000000e+00> : vector<8x32xf32>
    %255 = tpu.matmul %224, %254, %cst_102 {dimension_numbers = #tpu.dot_dimension_numbers<[1], [0], [0], [1], [0, 0, 1, 1], [], []>} : vector<8x32xf32>, vector<32x32xf32>, vector<8x32xf32> -> vector<8x32xf32>
    %256 = arith.addf %252, %255 : vector<8x32xf32>
    %257 = vector.extract_strided_slice %4 {offsets = [1, 0, 0], sizes = [1, 1, 32], strides = [1, 1, 1]} : vector<3x1x32xf32> to vector<1x1x32xf32>
    %258 = vector.shape_cast %257 : vector<1x1x32xf32> to vector<1x32xf32>
    %259 = vector.broadcast %258 : vector<1x32xf32> to vector<8x32xf32>
    %260 = arith.addf %256, %259 : vector<8x32xf32>
    %261 = arith.negf %260 : vector<8x32xf32>
    %262 = math.exp %261 : vector<8x32xf32>
    %cst_103 = arith.constant 1.000000e+00 : f32
    %263 = vector.broadcast %cst_103 : f32 to vector<8x32xf32>
    %264 = arith.addf %263, %262 : vector<8x32xf32>
    %265 = arith.divf %263, %264 : vector<8x32xf32>
    %266 = vector.extract_strided_slice %1 {offsets = [2, 0, 0], sizes = [1, 32, 32], strides = [1, 1, 1]} : vector<3x32x32xf32> to vector<1x32x32xf32>
    %267 = vector.shape_cast %266 : vector<1x32x32xf32> to vector<32x32xf32>
    %cst_104 = arith.constant dense<0.000000e+00> : vector<8x32xf32>
    %268 = tpu.matmul %225, %267, %cst_104 {dimension_numbers = #tpu.dot_dimension_numbers<[1], [0], [0], [1], [0, 0, 1, 1], [], []>} : vector<8x32xf32>, vector<32x32xf32>, vector<8x32xf32> -> vector<8x32xf32>
    %269 = vector.extract_strided_slice %3 {offsets = [2, 0, 0], sizes = [1, 1, 32], strides = [1, 1, 1]} : vector<3x1x32xf32> to vector<1x1x32xf32>
    %270 = vector.shape_cast %269 : vector<1x1x32xf32> to vector<1x32xf32>
    %271 = vector.broadcast %270 : vector<1x32xf32> to vector<8x32xf32>
    %272 = arith.addf %268, %271 : vector<8x32xf32>
    %273 = vector.extract_strided_slice %2 {offsets = [2, 0, 0], sizes = [1, 32, 32], strides = [1, 1, 1]} : vector<3x32x32xf32> to vector<1x32x32xf32>
    %274 = vector.shape_cast %273 : vector<1x32x32xf32> to vector<32x32xf32>
    %cst_105 = arith.constant dense<0.000000e+00> : vector<8x32xf32>
    %275 = tpu.matmul %224, %274, %cst_105 {dimension_numbers = #tpu.dot_dimension_numbers<[1], [0], [0], [1], [0, 0, 1, 1], [], []>} : vector<8x32xf32>, vector<32x32xf32>, vector<8x32xf32> -> vector<8x32xf32>
    %276 = vector.extract_strided_slice %4 {offsets = [2, 0, 0], sizes = [1, 1, 32], strides = [1, 1, 1]} : vector<3x1x32xf32> to vector<1x1x32xf32>
    %277 = vector.shape_cast %276 : vector<1x1x32xf32> to vector<1x32xf32>
    %278 = vector.broadcast %277 : vector<1x32xf32> to vector<8x32xf32>
    %279 = arith.addf %275, %278 : vector<8x32xf32>
    %280 = arith.mulf %245, %279 : vector<8x32xf32>
    %281 = arith.addf %272, %280 : vector<8x32xf32>
    %282 = math.tanh %281 : vector<8x32xf32>
    %cst_106 = arith.constant 1.000000e+00 : f32
    %283 = vector.broadcast %cst_106 : f32 to vector<8x32xf32>
    %284 = arith.subf %283, %265 : vector<8x32xf32>
    %285 = arith.mulf %284, %282 : vector<8x32xf32>
    %286 = arith.mulf %265, %224 : vector<8x32xf32>
    %287 = arith.addf %285, %286 : vector<8x32xf32>
    %cst_107 = arith.constant dense<0.000000e+00> : vector<8x32xf32>
    %288 = tpu.matmul %287, %5, %cst_107 {dimension_numbers = #tpu.dot_dimension_numbers<[1], [0], [0], [1], [0, 0, 1, 1], [], []>} : vector<8x32xf32>, vector<32x32xf32>, vector<8x32xf32> -> vector<8x32xf32>
    %289 = vector.broadcast %6 : vector<1x32xf32> to vector<8x32xf32>
    %290 = arith.addf %288, %289 : vector<8x32xf32>
    %cst_108 = arith.constant 5.000000e-01 : f32
    %291 = vector.broadcast %cst_108 : f32 to vector<8x1xf32>
    %292 = arith.cmpf ogt, %222, %291 : vector<8x1xf32>
    %cst_109 = arith.constant -1.000000e+30 : f32
    %293 = vector.shape_cast %292 : vector<8x1xi1> to vector<8x1xi1>
    %294 = vector.broadcast %293 : vector<8x1xi1> to vector<8x32xi1>
    %295 = vector.broadcast %cst_109 : f32 to vector<8x32xf32>
    %296 = arith.select %294, %290, %295 : vector<8x32xi1>, vector<8x32xf32>
    %297 = vector.shape_cast %220 : vector<8x8xf32> to vector<8x8x1xf32>
    %cst_110 = arith.constant 5.000000e-01 : f32
    %298 = vector.broadcast %cst_110 : f32 to vector<8x8x1xf32>
    %299 = arith.cmpf ogt, %297, %298 : vector<8x8x1xf32>
    %300 = vector.shape_cast %296 : vector<8x32xf32> to vector<1x8x32xf32>
    %cst_111 = arith.constant -1.000000e+30 : f32
    %301 = vector.shape_cast %299 : vector<8x8x1xi1> to vector<8x8x1xi1>
    %302 = vector.broadcast %301 : vector<8x8x1xi1> to vector<8x8x32xi1>
    %303 = vector.shape_cast %300 : vector<1x8x32xf32> to vector<1x8x32xf32>
    %304 = vector.broadcast %303 : vector<1x8x32xf32> to vector<8x8x32xf32>
    %305 = vector.broadcast %cst_111 : f32 to vector<8x8x32xf32>
    %306 = arith.select %302, %304, %305 : vector<8x8x32xi1>, vector<8x8x32xf32>
    %cst_112 = arith.constant dense<0xFF800000> : vector<8x32xf32>
    %307 = vector.multi_reduction <maximumf>, %306, %cst_112 [1] : vector<8x8x32xf32> to vector<8x32xf32>
    %308 = arith.subf %296, %307 : vector<8x32xf32>
    %309 = math.exp %308 : vector<8x32xf32>
    %310 = vector.broadcast %222 : vector<8x1xf32> to vector<8x32xf32>
    %311 = arith.mulf %310, %309 : vector<8x32xf32>
    %cst_113 = arith.constant dense<0.000000e+00> : vector<8x32xf32>
    %312 = tpu.matmul %220, %311, %cst_113 {dimension_numbers = #tpu.dot_dimension_numbers<[1], [0], [0], [1], [0, 0, 1, 1], [], []>} : vector<8x8xf32>, vector<8x32xf32>, vector<8x32xf32> -> vector<8x32xf32>
    %cst_114 = arith.constant 1.000000e-16 : f32
    %313 = vector.broadcast %cst_114 : f32 to vector<8x32xf32>
    %314 = arith.addf %312, %313 : vector<8x32xf32>
    %315 = arith.divf %311, %314 : vector<8x32xf32>
    %316 = arith.mulf %287, %315 : vector<8x32xf32>
    %cst_115 = arith.constant dense<0.000000e+00> : vector<8x32xf32>
    %317 = tpu.matmul %218, %316, %cst_115 {dimension_numbers = #tpu.dot_dimension_numbers<[1], [0], [0], [1], [0, 0, 1, 1], [], []>} : vector<8x8xf32>, vector<8x32xf32>, vector<8x32xf32> -> vector<8x32xf32>
    %318 = arith.addf %214, %317 : vector<8x32xf32>
    %c0_116 = arith.constant 0 : index
    %c0_117 = arith.constant 0 : index
    %c0_118 = arith.constant 0 : index
    %319 = vector.load %arg24[%c0_116, %c0_117, %c0_118] : memref<3x8x32xf32, #tpu.memory_space<vmem>>, vector<1x8x32xf32>
    %320 = vector.shape_cast %319 : vector<1x8x32xf32> to vector<8x32xf32>
    %321 = vector.shape_cast %318 : vector<8x32xf32> to vector<1x8x32xf32>
    tpu.vector_store %arg24[%c0_116, %c0_117, %c0_118], %321 {strides = array<i32>} : memref<3x8x32xf32, #tpu.memory_space<vmem>>, vector<1x8x32xf32>,
    %c0_119 = arith.constant 0 : index
    %c0_120 = arith.constant 0 : index
    %322 = vector.load %arg12[%c0_119, %c0_120] : memref<16x8xf32, #tpu.memory_space<vmem>>, vector<16x8xf32>
    %c0_121 = arith.constant 0 : index
    %c0_122 = arith.constant 0 : index
    %323 = vector.load %arg13[%c0_121, %c0_122] : memref<16x8xf32, #tpu.memory_space<vmem>>, vector<16x8xf32>
    %c0_123 = arith.constant 0 : index
    %c0_124 = arith.constant 0 : index
    %324 = vector.load %arg14[%c0_123, %c0_124] : memref<8x16xf32, #tpu.memory_space<vmem>>, vector<8x16xf32>
    %c0_125 = arith.constant 0 : index
    %c0_126 = arith.constant 0 : index
    %325 = vector.load %arg15[%c0_125, %c0_126] : memref<16x16xf32, #tpu.memory_space<vmem>>, vector<16x16xf32>
    %c0_127 = arith.constant 0 : index
    %c0_128 = arith.constant 0 : index
    %326 = vector.load %arg16[%c0_127, %c0_128] : memref<16x1xf32, #tpu.memory_space<vmem>>, vector<16x1xf32>
    %c0_129 = arith.constant 0 : index
    %c0_130 = arith.constant 0 : index
    %327 = vector.load %arg17[%c0_129, %c0_130] : memref<16x32xf32, #tpu.memory_space<vmem>>, vector<16x32xf32>
    %c0_131 = arith.constant 0 : index
    %c0_132 = arith.constant 0 : index
    %c0_133 = arith.constant 0 : index
    %c0_134 = arith.constant 0 : index
    %328 = vector.load %arg18[%c0_131, %c0_132, %c0_133, %c0_134] : memref<2x6x32x32xf32, #tpu.memory_space<vmem>>, vector<1x6x32x32xf32>
    %329 = vector.shape_cast %328 : vector<1x6x32x32xf32> to vector<6x32x32xf32>
    %c0_135 = arith.constant 0 : index
    %c0_136 = arith.constant 0 : index
    %c0_137 = arith.constant 0 : index
    %c0_138 = arith.constant 0 : index
    %330 = vector.load %arg19[%c0_135, %c0_136, %c0_137, %c0_138] : memref<2x4x1x32xf32, #tpu.memory_space<vmem>>, vector<1x4x1x32xf32>
    %331 = vector.shape_cast %330 : vector<1x4x1x32xf32> to vector<4x1x32xf32>
    %c0_139 = arith.constant 0 : index
    %c0_140 = arith.constant 0 : index
    %c0_141 = arith.constant 0 : index
    %c0_142 = arith.constant 0 : index
    %332 = vector.load %arg20[%c0_139, %c0_140, %c0_141, %c0_142] : memref<2x3x32x32xf32, #tpu.memory_space<vmem>>, vector<1x3x32x32xf32>
    %333 = vector.shape_cast %332 : vector<1x3x32x32xf32> to vector<3x32x32xf32>
    %c0_143 = arith.constant 0 : index
    %c0_144 = arith.constant 0 : index
    %c0_145 = arith.constant 0 : index
    %c0_146 = arith.constant 0 : index
    %334 = vector.load %arg21[%c0_143, %c0_144, %c0_145, %c0_146] : memref<2x3x32x32xf32, #tpu.memory_space<vmem>>, vector<1x3x32x32xf32>
    %335 = vector.shape_cast %334 : vector<1x3x32x32xf32> to vector<3x32x32xf32>
    %c0_147 = arith.constant 0 : index
    %c0_148 = arith.constant 0 : index
    %c0_149 = arith.constant 0 : index
    %c0_150 = arith.constant 0 : index
    %336 = vector.load %arg22[%c0_147, %c0_148, %c0_149, %c0_150] : memref<2x3x1x32xf32, #tpu.memory_space<vmem>>, vector<1x3x1x32xf32>
    %337 = vector.shape_cast %336 : vector<1x3x1x32xf32> to vector<3x1x32xf32>
    %c0_151 = arith.constant 0 : index
    %c0_152 = arith.constant 0 : index
    %c0_153 = arith.constant 0 : index
    %c0_154 = arith.constant 0 : index
    %338 = vector.load %arg23[%c0_151, %c0_152, %c0_153, %c0_154] : memref<2x3x1x32xf32, #tpu.memory_space<vmem>>, vector<1x3x1x32xf32>
    %339 = vector.shape_cast %338 : vector<1x3x1x32xf32> to vector<3x1x32xf32>
    %cst_155 = arith.constant dense<0.000000e+00> : vector<16x32xf32>
    %340 = tpu.matmul %323, %318, %cst_155 {dimension_numbers = #tpu.dot_dimension_numbers<[1], [0], [0], [1], [0, 0, 1, 1], [], []>} : vector<16x8xf32>, vector<8x32xf32>, vector<16x32xf32> -> vector<16x32xf32>
    %cst_156 = arith.constant dense<0.000000e+00> : vector<16x32xf32>
    %341 = tpu.matmul %322, %318, %cst_156 {dimension_numbers = #tpu.dot_dimension_numbers<[1], [0], [0], [1], [0, 0, 1, 1], [], []>} : vector<16x8xf32>, vector<8x32xf32>, vector<16x32xf32> -> vector<16x32xf32>
    %342 = vector.extract_strided_slice %329 {offsets = [0, 0, 0], sizes = [1, 32, 32], strides = [1, 1, 1]} : vector<6x32x32xf32> to vector<1x32x32xf32>
    %343 = vector.shape_cast %342 : vector<1x32x32xf32> to vector<32x32xf32>
    %cst_157 = arith.constant dense<0.000000e+00> : vector<16x32xf32>
    %344 = tpu.matmul %340, %343, %cst_157 {dimension_numbers = #tpu.dot_dimension_numbers<[1], [0], [0], [1], [0, 0, 1, 1], [], []>} : vector<16x32xf32>, vector<32x32xf32>, vector<16x32xf32> -> vector<16x32xf32>
    %345 = vector.extract_strided_slice %331 {offsets = [0, 0, 0], sizes = [1, 1, 32], strides = [1, 1, 1]} : vector<4x1x32xf32> to vector<1x1x32xf32>
    %346 = vector.shape_cast %345 : vector<1x1x32xf32> to vector<1x32xf32>
    %347 = vector.broadcast %346 : vector<1x32xf32> to vector<16x32xf32>
    %348 = arith.addf %344, %347 : vector<16x32xf32>
    %349 = vector.extract_strided_slice %329 {offsets = [1, 0, 0], sizes = [1, 32, 32], strides = [1, 1, 1]} : vector<6x32x32xf32> to vector<1x32x32xf32>
    %350 = vector.shape_cast %349 : vector<1x32x32xf32> to vector<32x32xf32>
    %cst_158 = arith.constant dense<0.000000e+00> : vector<16x32xf32>
    %351 = tpu.matmul %327, %350, %cst_158 {dimension_numbers = #tpu.dot_dimension_numbers<[1], [0], [0], [1], [0, 0, 1, 1], [], []>} : vector<16x32xf32>, vector<32x32xf32>, vector<16x32xf32> -> vector<16x32xf32>
    %352 = vector.extract_strided_slice %329 {offsets = [2, 0, 0], sizes = [1, 32, 32], strides = [1, 1, 1]} : vector<6x32x32xf32> to vector<1x32x32xf32>
    %353 = vector.shape_cast %352 : vector<1x32x32xf32> to vector<32x32xf32>
    %cst_159 = arith.constant dense<0.000000e+00> : vector<16x32xf32>
    %354 = tpu.matmul %341, %353, %cst_159 {dimension_numbers = #tpu.dot_dimension_numbers<[1], [0], [0], [1], [0, 0, 1, 1], [], []>} : vector<16x32xf32>, vector<32x32xf32>, vector<16x32xf32> -> vector<16x32xf32>
    %355 = arith.addf %351, %354 : vector<16x32xf32>
    %356 = vector.extract_strided_slice %331 {offsets = [1, 0, 0], sizes = [1, 1, 32], strides = [1, 1, 1]} : vector<4x1x32xf32> to vector<1x1x32xf32>
    %357 = vector.shape_cast %356 : vector<1x1x32xf32> to vector<1x32xf32>
    %358 = vector.broadcast %357 : vector<1x32xf32> to vector<16x32xf32>
    %359 = arith.addf %355, %358 : vector<16x32xf32>
    %360 = vector.extract_strided_slice %329 {offsets = [3, 0, 0], sizes = [1, 32, 32], strides = [1, 1, 1]} : vector<6x32x32xf32> to vector<1x32x32xf32>
    %361 = vector.shape_cast %360 : vector<1x32x32xf32> to vector<32x32xf32>
    %cst_160 = arith.constant dense<0.000000e+00> : vector<16x32xf32>
    %362 = tpu.matmul %327, %361, %cst_160 {dimension_numbers = #tpu.dot_dimension_numbers<[1], [0], [0], [1], [0, 0, 1, 1], [], []>} : vector<16x32xf32>, vector<32x32xf32>, vector<16x32xf32> -> vector<16x32xf32>
    %363 = vector.extract_strided_slice %329 {offsets = [4, 0, 0], sizes = [1, 32, 32], strides = [1, 1, 1]} : vector<6x32x32xf32> to vector<1x32x32xf32>
    %364 = vector.shape_cast %363 : vector<1x32x32xf32> to vector<32x32xf32>
    %cst_161 = arith.constant dense<0.000000e+00> : vector<16x32xf32>
    %365 = tpu.matmul %341, %364, %cst_161 {dimension_numbers = #tpu.dot_dimension_numbers<[1], [0], [0], [1], [0, 0, 1, 1], [], []>} : vector<16x32xf32>, vector<32x32xf32>, vector<16x32xf32> -> vector<16x32xf32>
    %366 = arith.addf %362, %365 : vector<16x32xf32>
    %367 = vector.extract_strided_slice %331 {offsets = [2, 0, 0], sizes = [1, 1, 32], strides = [1, 1, 1]} : vector<4x1x32xf32> to vector<1x1x32xf32>
    %368 = vector.shape_cast %367 : vector<1x1x32xf32> to vector<1x32xf32>
    %369 = vector.broadcast %368 : vector<1x32xf32> to vector<16x32xf32>
    %370 = arith.addf %366, %369 : vector<16x32xf32>
    %371 = arith.mulf %348, %359 : vector<16x32xf32>
    %cst_162 = arith.constant dense<0.000000e+00> : vector<16xf32>
    %372 = vector.multi_reduction <add>, %371, %cst_162 [1] : vector<16x32xf32> to vector<16xf32>
    %373 = vector.shape_cast %372 : vector<16xf32> to vector<16x1xf32>
    %cst_163 = arith.constant 0.176776692 : f32
    %374 = vector.broadcast %cst_163 : f32 to vector<16x1xf32>
    %375 = arith.mulf %373, %374 : vector<16x1xf32>
    %cst_164 = arith.constant 0.000000e+00 : f32
    %376 = vector.broadcast %cst_164 : f32 to vector<16x1xf32>
    %377 = arith.cmpf oge, %375, %376 : vector<16x1xf32>
    %cst_165 = arith.constant 2.000000e-01 : f32
    %378 = vector.broadcast %cst_165 : f32 to vector<16x1xf32>
    %379 = arith.mulf %378, %375 : vector<16x1xf32>
    %380 = arith.select %377, %375, %379 : vector<16x1xi1>, vector<16x1xf32>
    %cst_166 = arith.constant 5.000000e-01 : f32
    %381 = vector.broadcast %cst_166 : f32 to vector<16x1xf32>
    %382 = arith.cmpf ogt, %326, %381 : vector<16x1xf32>
    %cst_167 = arith.constant -1.000000e+30 : f32
    %383 = vector.broadcast %cst_167 : f32 to vector<16x1xf32>
    %384 = arith.select %382, %380, %383 : vector<16x1xi1>, vector<16x1xf32>
    %385 = vector.shape_cast %325 : vector<16x16xf32> to vector<16x16x1xf32>
    %cst_168 = arith.constant 5.000000e-01 : f32
    %386 = vector.broadcast %cst_168 : f32 to vector<16x16x1xf32>
    %387 = arith.cmpf ogt, %385, %386 : vector<16x16x1xf32>
    %388 = vector.shape_cast %384 : vector<16x1xf32> to vector<1x16x1xf32>
    %cst_169 = arith.constant -1.000000e+30 : f32
    %389 = vector.shape_cast %388 : vector<1x16x1xf32> to vector<1x16x1xf32>
    %390 = vector.broadcast %389 : vector<1x16x1xf32> to vector<16x16x1xf32>
    %391 = vector.broadcast %cst_169 : f32 to vector<16x16x1xf32>
    %392 = arith.select %387, %390, %391 : vector<16x16x1xi1>, vector<16x16x1xf32>
    %cst_170 = arith.constant dense<0xFF800000> : vector<16x1xf32>
    %393 = vector.multi_reduction <maximumf>, %392, %cst_170 [1] : vector<16x16x1xf32> to vector<16x1xf32>
    %394 = arith.subf %384, %393 : vector<16x1xf32>
    %395 = math.exp %394 : vector<16x1xf32>
    %396 = arith.mulf %326, %395 : vector<16x1xf32>
    %cst_171 = arith.constant dense<0.000000e+00> : vector<16x1xf32>
    %397 = tpu.matmul %325, %396, %cst_171 {dimension_numbers = #tpu.dot_dimension_numbers<[1], [0], [0], [1], [0, 0, 1, 1], [], []>} : vector<16x16xf32>, vector<16x1xf32>, vector<16x1xf32> -> vector<16x1xf32>
    %cst_172 = arith.constant 1.000000e-16 : f32
    %398 = vector.broadcast %cst_172 : f32 to vector<16x1xf32>
    %399 = arith.addf %397, %398 : vector<16x1xf32>
    %400 = arith.divf %396, %399 : vector<16x1xf32>
    %401 = vector.broadcast %400 : vector<16x1xf32> to vector<16x32xf32>
    %402 = arith.mulf %401, %370 : vector<16x32xf32>
    %cst_173 = arith.constant dense<0.000000e+00> : vector<8x32xf32>
    %403 = tpu.matmul %324, %402, %cst_173 {dimension_numbers = #tpu.dot_dimension_numbers<[1], [0], [0], [1], [0, 0, 1, 1], [], []>} : vector<8x16xf32>, vector<16x32xf32>, vector<8x32xf32> -> vector<8x32xf32>
    %404 = vector.extract_strided_slice %329 {offsets = [5, 0, 0], sizes = [1, 32, 32], strides = [1, 1, 1]} : vector<6x32x32xf32> to vector<1x32x32xf32>
    %405 = vector.shape_cast %404 : vector<1x32x32xf32> to vector<32x32xf32>
    %cst_174 = arith.constant dense<0.000000e+00> : vector<8x32xf32>
    %406 = tpu.matmul %403, %405, %cst_174 {dimension_numbers = #tpu.dot_dimension_numbers<[1], [0], [0], [1], [0, 0, 1, 1], [], []>} : vector<8x32xf32>, vector<32x32xf32>, vector<8x32xf32> -> vector<8x32xf32>
    %407 = vector.extract_strided_slice %331 {offsets = [3, 0, 0], sizes = [1, 1, 32], strides = [1, 1, 1]} : vector<4x1x32xf32> to vector<1x1x32xf32>
    %408 = vector.shape_cast %407 : vector<1x1x32xf32> to vector<1x32xf32>
    %409 = vector.broadcast %408 : vector<1x32xf32> to vector<8x32xf32>
    %410 = arith.addf %406, %409 : vector<8x32xf32>
    %411 = vector.extract_strided_slice %333 {offsets = [0, 0, 0], sizes = [1, 32, 32], strides = [1, 1, 1]} : vector<3x32x32xf32> to vector<1x32x32xf32>
    %412 = vector.shape_cast %411 : vector<1x32x32xf32> to vector<32x32xf32>
    %cst_175 = arith.constant dense<0.000000e+00> : vector<8x32xf32>
    %413 = tpu.matmul %318, %412, %cst_175 {dimension_numbers = #tpu.dot_dimension_numbers<[1], [0], [0], [1], [0, 0, 1, 1], [], []>} : vector<8x32xf32>, vector<32x32xf32>, vector<8x32xf32> -> vector<8x32xf32>
    %414 = vector.extract_strided_slice %337 {offsets = [0, 0, 0], sizes = [1, 1, 32], strides = [1, 1, 1]} : vector<3x1x32xf32> to vector<1x1x32xf32>
    %415 = vector.shape_cast %414 : vector<1x1x32xf32> to vector<1x32xf32>
    %416 = vector.broadcast %415 : vector<1x32xf32> to vector<8x32xf32>
    %417 = arith.addf %413, %416 : vector<8x32xf32>
    %418 = vector.extract_strided_slice %335 {offsets = [0, 0, 0], sizes = [1, 32, 32], strides = [1, 1, 1]} : vector<3x32x32xf32> to vector<1x32x32xf32>
    %419 = vector.shape_cast %418 : vector<1x32x32xf32> to vector<32x32xf32>
    %cst_176 = arith.constant dense<0.000000e+00> : vector<8x32xf32>
    %420 = tpu.matmul %410, %419, %cst_176 {dimension_numbers = #tpu.dot_dimension_numbers<[1], [0], [0], [1], [0, 0, 1, 1], [], []>} : vector<8x32xf32>, vector<32x32xf32>, vector<8x32xf32> -> vector<8x32xf32>
    %421 = arith.addf %417, %420 : vector<8x32xf32>
    %422 = vector.extract_strided_slice %339 {offsets = [0, 0, 0], sizes = [1, 1, 32], strides = [1, 1, 1]} : vector<3x1x32xf32> to vector<1x1x32xf32>
    %423 = vector.shape_cast %422 : vector<1x1x32xf32> to vector<1x32xf32>
    %424 = vector.broadcast %423 : vector<1x32xf32> to vector<8x32xf32>
    %425 = arith.addf %421, %424 : vector<8x32xf32>
    %426 = arith.negf %425 : vector<8x32xf32>
    %427 = math.exp %426 : vector<8x32xf32>
    %cst_177 = arith.constant 1.000000e+00 : f32
    %428 = vector.broadcast %cst_177 : f32 to vector<8x32xf32>
    %429 = arith.addf %428, %427 : vector<8x32xf32>
    %430 = arith.divf %428, %429 : vector<8x32xf32>
    %431 = vector.extract_strided_slice %333 {offsets = [1, 0, 0], sizes = [1, 32, 32], strides = [1, 1, 1]} : vector<3x32x32xf32> to vector<1x32x32xf32>
    %432 = vector.shape_cast %431 : vector<1x32x32xf32> to vector<32x32xf32>
    %cst_178 = arith.constant dense<0.000000e+00> : vector<8x32xf32>
    %433 = tpu.matmul %318, %432, %cst_178 {dimension_numbers = #tpu.dot_dimension_numbers<[1], [0], [0], [1], [0, 0, 1, 1], [], []>} : vector<8x32xf32>, vector<32x32xf32>, vector<8x32xf32> -> vector<8x32xf32>
    %434 = vector.extract_strided_slice %337 {offsets = [1, 0, 0], sizes = [1, 1, 32], strides = [1, 1, 1]} : vector<3x1x32xf32> to vector<1x1x32xf32>
    %435 = vector.shape_cast %434 : vector<1x1x32xf32> to vector<1x32xf32>
    %436 = vector.broadcast %435 : vector<1x32xf32> to vector<8x32xf32>
    %437 = arith.addf %433, %436 : vector<8x32xf32>
    %438 = vector.extract_strided_slice %335 {offsets = [1, 0, 0], sizes = [1, 32, 32], strides = [1, 1, 1]} : vector<3x32x32xf32> to vector<1x32x32xf32>
    %439 = vector.shape_cast %438 : vector<1x32x32xf32> to vector<32x32xf32>
    %cst_179 = arith.constant dense<0.000000e+00> : vector<8x32xf32>
    %440 = tpu.matmul %410, %439, %cst_179 {dimension_numbers = #tpu.dot_dimension_numbers<[1], [0], [0], [1], [0, 0, 1, 1], [], []>} : vector<8x32xf32>, vector<32x32xf32>, vector<8x32xf32> -> vector<8x32xf32>
    %441 = arith.addf %437, %440 : vector<8x32xf32>
    %442 = vector.extract_strided_slice %339 {offsets = [1, 0, 0], sizes = [1, 1, 32], strides = [1, 1, 1]} : vector<3x1x32xf32> to vector<1x1x32xf32>
    %443 = vector.shape_cast %442 : vector<1x1x32xf32> to vector<1x32xf32>
    %444 = vector.broadcast %443 : vector<1x32xf32> to vector<8x32xf32>
    %445 = arith.addf %441, %444 : vector<8x32xf32>
    %446 = arith.negf %445 : vector<8x32xf32>
    %447 = math.exp %446 : vector<8x32xf32>
    %cst_180 = arith.constant 1.000000e+00 : f32
    %448 = vector.broadcast %cst_180 : f32 to vector<8x32xf32>
    %449 = arith.addf %448, %447 : vector<8x32xf32>
    %450 = arith.divf %448, %449 : vector<8x32xf32>
    %451 = vector.extract_strided_slice %333 {offsets = [2, 0, 0], sizes = [1, 32, 32], strides = [1, 1, 1]} : vector<3x32x32xf32> to vector<1x32x32xf32>
    %452 = vector.shape_cast %451 : vector<1x32x32xf32> to vector<32x32xf32>
    %cst_181 = arith.constant dense<0.000000e+00> : vector<8x32xf32>
    %453 = tpu.matmul %318, %452, %cst_181 {dimension_numbers = #tpu.dot_dimension_numbers<[1], [0], [0], [1], [0, 0, 1, 1], [], []>} : vector<8x32xf32>, vector<32x32xf32>, vector<8x32xf32> -> vector<8x32xf32>
    %454 = vector.extract_strided_slice %337 {offsets = [2, 0, 0], sizes = [1, 1, 32], strides = [1, 1, 1]} : vector<3x1x32xf32> to vector<1x1x32xf32>
    %455 = vector.shape_cast %454 : vector<1x1x32xf32> to vector<1x32xf32>
    %456 = vector.broadcast %455 : vector<1x32xf32> to vector<8x32xf32>
    %457 = arith.addf %453, %456 : vector<8x32xf32>
    %458 = vector.extract_strided_slice %335 {offsets = [2, 0, 0], sizes = [1, 32, 32], strides = [1, 1, 1]} : vector<3x32x32xf32> to vector<1x32x32xf32>
    %459 = vector.shape_cast %458 : vector<1x32x32xf32> to vector<32x32xf32>
    %cst_182 = arith.constant dense<0.000000e+00> : vector<8x32xf32>
    %460 = tpu.matmul %410, %459, %cst_182 {dimension_numbers = #tpu.dot_dimension_numbers<[1], [0], [0], [1], [0, 0, 1, 1], [], []>} : vector<8x32xf32>, vector<32x32xf32>, vector<8x32xf32> -> vector<8x32xf32>
    %461 = vector.extract_strided_slice %339 {offsets = [2, 0, 0], sizes = [1, 1, 32], strides = [1, 1, 1]} : vector<3x1x32xf32> to vector<1x1x32xf32>
    %462 = vector.shape_cast %461 : vector<1x1x32xf32> to vector<1x32xf32>
    %463 = vector.broadcast %462 : vector<1x32xf32> to vector<8x32xf32>
    %464 = arith.addf %460, %463 : vector<8x32xf32>
    %465 = arith.mulf %430, %464 : vector<8x32xf32>
    %466 = arith.addf %457, %465 : vector<8x32xf32>
    %467 = math.tanh %466 : vector<8x32xf32>
    %cst_183 = arith.constant 1.000000e+00 : f32
    %468 = vector.broadcast %cst_183 : f32 to vector<8x32xf32>
    %469 = arith.subf %468, %450 : vector<8x32xf32>
    %470 = arith.mulf %469, %467 : vector<8x32xf32>
    %471 = arith.mulf %450, %410 : vector<8x32xf32>
    %472 = arith.addf %470, %471 : vector<8x32xf32>
    %473 = arith.addf %472, %318 : vector<8x32xf32>
    %c1_184 = arith.constant 1 : index
    %c0_185 = arith.constant 0 : index
    %c0_186 = arith.constant 0 : index
    %474 = vector.load %arg24[%c1_184, %c0_185, %c0_186] : memref<3x8x32xf32, #tpu.memory_space<vmem>>, vector<1x8x32xf32>
    %475 = vector.shape_cast %474 : vector<1x8x32xf32> to vector<8x32xf32>
    %476 = vector.shape_cast %473 : vector<8x32xf32> to vector<1x8x32xf32>
    tpu.vector_store %arg24[%c1_184, %c0_185, %c0_186], %476 {strides = array<i32>} : memref<3x8x32xf32, #tpu.memory_space<vmem>>, vector<1x8x32xf32>,
    %c1_187 = arith.constant 1 : index
    %c0_188 = arith.constant 0 : index
    %c0_189 = arith.constant 0 : index
    %c0_190 = arith.constant 0 : index
    %477 = vector.load %arg18[%c1_187, %c0_188, %c0_189, %c0_190] : memref<2x6x32x32xf32, #tpu.memory_space<vmem>>, vector<1x6x32x32xf32>
    %478 = vector.shape_cast %477 : vector<1x6x32x32xf32> to vector<6x32x32xf32>
    %c1_191 = arith.constant 1 : index
    %c0_192 = arith.constant 0 : index
    %c0_193 = arith.constant 0 : index
    %c0_194 = arith.constant 0 : index
    %479 = vector.load %arg19[%c1_191, %c0_192, %c0_193, %c0_194] : memref<2x4x1x32xf32, #tpu.memory_space<vmem>>, vector<1x4x1x32xf32>
    %480 = vector.shape_cast %479 : vector<1x4x1x32xf32> to vector<4x1x32xf32>
    %c1_195 = arith.constant 1 : index
    %c0_196 = arith.constant 0 : index
    %c0_197 = arith.constant 0 : index
    %c0_198 = arith.constant 0 : index
    %481 = vector.load %arg20[%c1_195, %c0_196, %c0_197, %c0_198] : memref<2x3x32x32xf32, #tpu.memory_space<vmem>>, vector<1x3x32x32xf32>
    %482 = vector.shape_cast %481 : vector<1x3x32x32xf32> to vector<3x32x32xf32>
    %c1_199 = arith.constant 1 : index
    %c0_200 = arith.constant 0 : index
    %c0_201 = arith.constant 0 : index
    %c0_202 = arith.constant 0 : index
    %483 = vector.load %arg21[%c1_199, %c0_200, %c0_201, %c0_202] : memref<2x3x32x32xf32, #tpu.memory_space<vmem>>, vector<1x3x32x32xf32>
    %484 = vector.shape_cast %483 : vector<1x3x32x32xf32> to vector<3x32x32xf32>
    %c1_203 = arith.constant 1 : index
    %c0_204 = arith.constant 0 : index
    %c0_205 = arith.constant 0 : index
    %c0_206 = arith.constant 0 : index
    %485 = vector.load %arg22[%c1_203, %c0_204, %c0_205, %c0_206] : memref<2x3x1x32xf32, #tpu.memory_space<vmem>>, vector<1x3x1x32xf32>
    %486 = vector.shape_cast %485 : vector<1x3x1x32xf32> to vector<3x1x32xf32>
    %c1_207 = arith.constant 1 : index
    %c0_208 = arith.constant 0 : index
    %c0_209 = arith.constant 0 : index
    %c0_210 = arith.constant 0 : index
    %487 = vector.load %arg23[%c1_207, %c0_208, %c0_209, %c0_210] : memref<2x3x1x32xf32, #tpu.memory_space<vmem>>, vector<1x3x1x32xf32>
    %488 = vector.shape_cast %487 : vector<1x3x1x32xf32> to vector<3x1x32xf32>
    %cst_211 = arith.constant dense<0.000000e+00> : vector<16x32xf32>
    %489 = tpu.matmul %323, %473, %cst_211 {dimension_numbers = #tpu.dot_dimension_numbers<[1], [0], [0], [1], [0, 0, 1, 1], [], []>} : vector<16x8xf32>, vector<8x32xf32>, vector<16x32xf32> -> vector<16x32xf32>
    %cst_212 = arith.constant dense<0.000000e+00> : vector<16x32xf32>
    %490 = tpu.matmul %322, %473, %cst_212 {dimension_numbers = #tpu.dot_dimension_numbers<[1], [0], [0], [1], [0, 0, 1, 1], [], []>} : vector<16x8xf32>, vector<8x32xf32>, vector<16x32xf32> -> vector<16x32xf32>
    %491 = vector.extract_strided_slice %478 {offsets = [0, 0, 0], sizes = [1, 32, 32], strides = [1, 1, 1]} : vector<6x32x32xf32> to vector<1x32x32xf32>
    %492 = vector.shape_cast %491 : vector<1x32x32xf32> to vector<32x32xf32>
    %cst_213 = arith.constant dense<0.000000e+00> : vector<16x32xf32>
    %493 = tpu.matmul %489, %492, %cst_213 {dimension_numbers = #tpu.dot_dimension_numbers<[1], [0], [0], [1], [0, 0, 1, 1], [], []>} : vector<16x32xf32>, vector<32x32xf32>, vector<16x32xf32> -> vector<16x32xf32>
    %494 = vector.extract_strided_slice %480 {offsets = [0, 0, 0], sizes = [1, 1, 32], strides = [1, 1, 1]} : vector<4x1x32xf32> to vector<1x1x32xf32>
    %495 = vector.shape_cast %494 : vector<1x1x32xf32> to vector<1x32xf32>
    %496 = vector.broadcast %495 : vector<1x32xf32> to vector<16x32xf32>
    %497 = arith.addf %493, %496 : vector<16x32xf32>
    %498 = vector.extract_strided_slice %478 {offsets = [1, 0, 0], sizes = [1, 32, 32], strides = [1, 1, 1]} : vector<6x32x32xf32> to vector<1x32x32xf32>
    %499 = vector.shape_cast %498 : vector<1x32x32xf32> to vector<32x32xf32>
    %cst_214 = arith.constant dense<0.000000e+00> : vector<16x32xf32>
    %500 = tpu.matmul %327, %499, %cst_214 {dimension_numbers = #tpu.dot_dimension_numbers<[1], [0], [0], [1], [0, 0, 1, 1], [], []>} : vector<16x32xf32>, vector<32x32xf32>, vector<16x32xf32> -> vector<16x32xf32>
    %501 = vector.extract_strided_slice %478 {offsets = [2, 0, 0], sizes = [1, 32, 32], strides = [1, 1, 1]} : vector<6x32x32xf32> to vector<1x32x32xf32>
    %502 = vector.shape_cast %501 : vector<1x32x32xf32> to vector<32x32xf32>
    %cst_215 = arith.constant dense<0.000000e+00> : vector<16x32xf32>
    %503 = tpu.matmul %490, %502, %cst_215 {dimension_numbers = #tpu.dot_dimension_numbers<[1], [0], [0], [1], [0, 0, 1, 1], [], []>} : vector<16x32xf32>, vector<32x32xf32>, vector<16x32xf32> -> vector<16x32xf32>
    %504 = arith.addf %500, %503 : vector<16x32xf32>
    %505 = vector.extract_strided_slice %480 {offsets = [1, 0, 0], sizes = [1, 1, 32], strides = [1, 1, 1]} : vector<4x1x32xf32> to vector<1x1x32xf32>
    %506 = vector.shape_cast %505 : vector<1x1x32xf32> to vector<1x32xf32>
    %507 = vector.broadcast %506 : vector<1x32xf32> to vector<16x32xf32>
    %508 = arith.addf %504, %507 : vector<16x32xf32>
    %509 = vector.extract_strided_slice %478 {offsets = [3, 0, 0], sizes = [1, 32, 32], strides = [1, 1, 1]} : vector<6x32x32xf32> to vector<1x32x32xf32>
    %510 = vector.shape_cast %509 : vector<1x32x32xf32> to vector<32x32xf32>
    %cst_216 = arith.constant dense<0.000000e+00> : vector<16x32xf32>
    %511 = tpu.matmul %327, %510, %cst_216 {dimension_numbers = #tpu.dot_dimension_numbers<[1], [0], [0], [1], [0, 0, 1, 1], [], []>} : vector<16x32xf32>, vector<32x32xf32>, vector<16x32xf32> -> vector<16x32xf32>
    %512 = vector.extract_strided_slice %478 {offsets = [4, 0, 0], sizes = [1, 32, 32], strides = [1, 1, 1]} : vector<6x32x32xf32> to vector<1x32x32xf32>
    %513 = vector.shape_cast %512 : vector<1x32x32xf32> to vector<32x32xf32>
    %cst_217 = arith.constant dense<0.000000e+00> : vector<16x32xf32>
    %514 = tpu.matmul %490, %513, %cst_217 {dimension_numbers = #tpu.dot_dimension_numbers<[1], [0], [0], [1], [0, 0, 1, 1], [], []>} : vector<16x32xf32>, vector<32x32xf32>, vector<16x32xf32> -> vector<16x32xf32>
    %515 = arith.addf %511, %514 : vector<16x32xf32>
    %516 = vector.extract_strided_slice %480 {offsets = [2, 0, 0], sizes = [1, 1, 32], strides = [1, 1, 1]} : vector<4x1x32xf32> to vector<1x1x32xf32>
    %517 = vector.shape_cast %516 : vector<1x1x32xf32> to vector<1x32xf32>
    %518 = vector.broadcast %517 : vector<1x32xf32> to vector<16x32xf32>
    %519 = arith.addf %515, %518 : vector<16x32xf32>
    %520 = arith.mulf %497, %508 : vector<16x32xf32>
    %cst_218 = arith.constant dense<0.000000e+00> : vector<16xf32>
    %521 = vector.multi_reduction <add>, %520, %cst_218 [1] : vector<16x32xf32> to vector<16xf32>
    %522 = vector.shape_cast %521 : vector<16xf32> to vector<16x1xf32>
    %cst_219 = arith.constant 0.176776692 : f32
    %523 = vector.broadcast %cst_219 : f32 to vector<16x1xf32>
    %524 = arith.mulf %522, %523 : vector<16x1xf32>
    %cst_220 = arith.constant 0.000000e+00 : f32
    %525 = vector.broadcast %cst_220 : f32 to vector<16x1xf32>
    %526 = arith.cmpf oge, %524, %525 : vector<16x1xf32>
    %cst_221 = arith.constant 2.000000e-01 : f32
    %527 = vector.broadcast %cst_221 : f32 to vector<16x1xf32>
    %528 = arith.mulf %527, %524 : vector<16x1xf32>
    %529 = arith.select %526, %524, %528 : vector<16x1xi1>, vector<16x1xf32>
    %cst_222 = arith.constant 5.000000e-01 : f32
    %530 = vector.broadcast %cst_222 : f32 to vector<16x1xf32>
    %531 = arith.cmpf ogt, %326, %530 : vector<16x1xf32>
    %cst_223 = arith.constant -1.000000e+30 : f32
    %532 = vector.broadcast %cst_223 : f32 to vector<16x1xf32>
    %533 = arith.select %531, %529, %532 : vector<16x1xi1>, vector<16x1xf32>
    %534 = vector.shape_cast %325 : vector<16x16xf32> to vector<16x16x1xf32>
    %cst_224 = arith.constant 5.000000e-01 : f32
    %535 = vector.broadcast %cst_224 : f32 to vector<16x16x1xf32>
    %536 = arith.cmpf ogt, %534, %535 : vector<16x16x1xf32>
    %537 = vector.shape_cast %533 : vector<16x1xf32> to vector<1x16x1xf32>
    %cst_225 = arith.constant -1.000000e+30 : f32
    %538 = vector.shape_cast %537 : vector<1x16x1xf32> to vector<1x16x1xf32>
    %539 = vector.broadcast %538 : vector<1x16x1xf32> to vector<16x16x1xf32>
    %540 = vector.broadcast %cst_225 : f32 to vector<16x16x1xf32>
    %541 = arith.select %536, %539, %540 : vector<16x16x1xi1>, vector<16x16x1xf32>
    %cst_226 = arith.constant dense<0xFF800000> : vector<16x1xf32>
    %542 = vector.multi_reduction <maximumf>, %541, %cst_226 [1] : vector<16x16x1xf32> to vector<16x1xf32>
    %543 = arith.subf %533, %542 : vector<16x1xf32>
    %544 = math.exp %543 : vector<16x1xf32>
    %545 = arith.mulf %326, %544 : vector<16x1xf32>
    %cst_227 = arith.constant dense<0.000000e+00> : vector<16x1xf32>
    %546 = tpu.matmul %325, %545, %cst_227 {dimension_numbers = #tpu.dot_dimension_numbers<[1], [0], [0], [1], [0, 0, 1, 1], [], []>} : vector<16x16xf32>, vector<16x1xf32>, vector<16x1xf32> -> vector<16x1xf32>
    %cst_228 = arith.constant 1.000000e-16 : f32
    %547 = vector.broadcast %cst_228 : f32 to vector<16x1xf32>
    %548 = arith.addf %546, %547 : vector<16x1xf32>
    %549 = arith.divf %545, %548 : vector<16x1xf32>
    %550 = vector.broadcast %549 : vector<16x1xf32> to vector<16x32xf32>
    %551 = arith.mulf %550, %519 : vector<16x32xf32>
    %cst_229 = arith.constant dense<0.000000e+00> : vector<8x32xf32>
    %552 = tpu.matmul %324, %551, %cst_229 {dimension_numbers = #tpu.dot_dimension_numbers<[1], [0], [0], [1], [0, 0, 1, 1], [], []>} : vector<8x16xf32>, vector<16x32xf32>, vector<8x32xf32> -> vector<8x32xf32>
    %553 = vector.extract_strided_slice %478 {offsets = [5, 0, 0], sizes = [1, 32, 32], strides = [1, 1, 1]} : vector<6x32x32xf32> to vector<1x32x32xf32>
    %554 = vector.shape_cast %553 : vector<1x32x32xf32> to vector<32x32xf32>
    %cst_230 = arith.constant dense<0.000000e+00> : vector<8x32xf32>
    %555 = tpu.matmul %552, %554, %cst_230 {dimension_numbers = #tpu.dot_dimension_numbers<[1], [0], [0], [1], [0, 0, 1, 1], [], []>} : vector<8x32xf32>, vector<32x32xf32>, vector<8x32xf32> -> vector<8x32xf32>
    %556 = vector.extract_strided_slice %480 {offsets = [3, 0, 0], sizes = [1, 1, 32], strides = [1, 1, 1]} : vector<4x1x32xf32> to vector<1x1x32xf32>
    %557 = vector.shape_cast %556 : vector<1x1x32xf32> to vector<1x32xf32>
    %558 = vector.broadcast %557 : vector<1x32xf32> to vector<8x32xf32>
    %559 = arith.addf %555, %558 : vector<8x32xf32>
    %560 = vector.extract_strided_slice %482 {offsets = [0, 0, 0], sizes = [1, 32, 32], strides = [1, 1, 1]} : vector<3x32x32xf32> to vector<1x32x32xf32>
    %561 = vector.shape_cast %560 : vector<1x32x32xf32> to vector<32x32xf32>
    %cst_231 = arith.constant dense<0.000000e+00> : vector<8x32xf32>
    %562 = tpu.matmul %473, %561, %cst_231 {dimension_numbers = #tpu.dot_dimension_numbers<[1], [0], [0], [1], [0, 0, 1, 1], [], []>} : vector<8x32xf32>, vector<32x32xf32>, vector<8x32xf32> -> vector<8x32xf32>
    %563 = vector.extract_strided_slice %486 {offsets = [0, 0, 0], sizes = [1, 1, 32], strides = [1, 1, 1]} : vector<3x1x32xf32> to vector<1x1x32xf32>
    %564 = vector.shape_cast %563 : vector<1x1x32xf32> to vector<1x32xf32>
    %565 = vector.broadcast %564 : vector<1x32xf32> to vector<8x32xf32>
    %566 = arith.addf %562, %565 : vector<8x32xf32>
    %567 = vector.extract_strided_slice %484 {offsets = [0, 0, 0], sizes = [1, 32, 32], strides = [1, 1, 1]} : vector<3x32x32xf32> to vector<1x32x32xf32>
    %568 = vector.shape_cast %567 : vector<1x32x32xf32> to vector<32x32xf32>
    %cst_232 = arith.constant dense<0.000000e+00> : vector<8x32xf32>
    %569 = tpu.matmul %559, %568, %cst_232 {dimension_numbers = #tpu.dot_dimension_numbers<[1], [0], [0], [1], [0, 0, 1, 1], [], []>} : vector<8x32xf32>, vector<32x32xf32>, vector<8x32xf32> -> vector<8x32xf32>
    %570 = arith.addf %566, %569 : vector<8x32xf32>
    %571 = vector.extract_strided_slice %488 {offsets = [0, 0, 0], sizes = [1, 1, 32], strides = [1, 1, 1]} : vector<3x1x32xf32> to vector<1x1x32xf32>
    %572 = vector.shape_cast %571 : vector<1x1x32xf32> to vector<1x32xf32>
    %573 = vector.broadcast %572 : vector<1x32xf32> to vector<8x32xf32>
    %574 = arith.addf %570, %573 : vector<8x32xf32>
    %575 = arith.negf %574 : vector<8x32xf32>
    %576 = math.exp %575 : vector<8x32xf32>
    %cst_233 = arith.constant 1.000000e+00 : f32
    %577 = vector.broadcast %cst_233 : f32 to vector<8x32xf32>
    %578 = arith.addf %577, %576 : vector<8x32xf32>
    %579 = arith.divf %577, %578 : vector<8x32xf32>
    %580 = vector.extract_strided_slice %482 {offsets = [1, 0, 0], sizes = [1, 32, 32], strides = [1, 1, 1]} : vector<3x32x32xf32> to vector<1x32x32xf32>
    %581 = vector.shape_cast %580 : vector<1x32x32xf32> to vector<32x32xf32>
    %cst_234 = arith.constant dense<0.000000e+00> : vector<8x32xf32>
    %582 = tpu.matmul %473, %581, %cst_234 {dimension_numbers = #tpu.dot_dimension_numbers<[1], [0], [0], [1], [0, 0, 1, 1], [], []>} : vector<8x32xf32>, vector<32x32xf32>, vector<8x32xf32> -> vector<8x32xf32>
    %583 = vector.extract_strided_slice %486 {offsets = [1, 0, 0], sizes = [1, 1, 32], strides = [1, 1, 1]} : vector<3x1x32xf32> to vector<1x1x32xf32>
    %584 = vector.shape_cast %583 : vector<1x1x32xf32> to vector<1x32xf32>
    %585 = vector.broadcast %584 : vector<1x32xf32> to vector<8x32xf32>
    %586 = arith.addf %582, %585 : vector<8x32xf32>
    %587 = vector.extract_strided_slice %484 {offsets = [1, 0, 0], sizes = [1, 32, 32], strides = [1, 1, 1]} : vector<3x32x32xf32> to vector<1x32x32xf32>
    %588 = vector.shape_cast %587 : vector<1x32x32xf32> to vector<32x32xf32>
    %cst_235 = arith.constant dense<0.000000e+00> : vector<8x32xf32>
    %589 = tpu.matmul %559, %588, %cst_235 {dimension_numbers = #tpu.dot_dimension_numbers<[1], [0], [0], [1], [0, 0, 1, 1], [], []>} : vector<8x32xf32>, vector<32x32xf32>, vector<8x32xf32> -> vector<8x32xf32>
    %590 = arith.addf %586, %589 : vector<8x32xf32>
    %591 = vector.extract_strided_slice %488 {offsets = [1, 0, 0], sizes = [1, 1, 32], strides = [1, 1, 1]} : vector<3x1x32xf32> to vector<1x1x32xf32>
    %592 = vector.shape_cast %591 : vector<1x1x32xf32> to vector<1x32xf32>
    %593 = vector.broadcast %592 : vector<1x32xf32> to vector<8x32xf32>
    %594 = arith.addf %590, %593 : vector<8x32xf32>
    %595 = arith.negf %594 : vector<8x32xf32>
    %596 = math.exp %595 : vector<8x32xf32>
    %cst_236 = arith.constant 1.000000e+00 : f32
    %597 = vector.broadcast %cst_236 : f32 to vector<8x32xf32>
    %598 = arith.addf %597, %596 : vector<8x32xf32>
    %599 = arith.divf %597, %598 : vector<8x32xf32>
    %600 = vector.extract_strided_slice %482 {offsets = [2, 0, 0], sizes = [1, 32, 32], strides = [1, 1, 1]} : vector<3x32x32xf32> to vector<1x32x32xf32>
    %601 = vector.shape_cast %600 : vector<1x32x32xf32> to vector<32x32xf32>
    %cst_237 = arith.constant dense<0.000000e+00> : vector<8x32xf32>
    %602 = tpu.matmul %473, %601, %cst_237 {dimension_numbers = #tpu.dot_dimension_numbers<[1], [0], [0], [1], [0, 0, 1, 1], [], []>} : vector<8x32xf32>, vector<32x32xf32>, vector<8x32xf32> -> vector<8x32xf32>
    %603 = vector.extract_strided_slice %486 {offsets = [2, 0, 0], sizes = [1, 1, 32], strides = [1, 1, 1]} : vector<3x1x32xf32> to vector<1x1x32xf32>
    %604 = vector.shape_cast %603 : vector<1x1x32xf32> to vector<1x32xf32>
    %605 = vector.broadcast %604 : vector<1x32xf32> to vector<8x32xf32>
    %606 = arith.addf %602, %605 : vector<8x32xf32>
    %607 = vector.extract_strided_slice %484 {offsets = [2, 0, 0], sizes = [1, 32, 32], strides = [1, 1, 1]} : vector<3x32x32xf32> to vector<1x32x32xf32>
    %608 = vector.shape_cast %607 : vector<1x32x32xf32> to vector<32x32xf32>
    %cst_238 = arith.constant dense<0.000000e+00> : vector<8x32xf32>
    %609 = tpu.matmul %559, %608, %cst_238 {dimension_numbers = #tpu.dot_dimension_numbers<[1], [0], [0], [1], [0, 0, 1, 1], [], []>} : vector<8x32xf32>, vector<32x32xf32>, vector<8x32xf32> -> vector<8x32xf32>
    %610 = vector.extract_strided_slice %488 {offsets = [2, 0, 0], sizes = [1, 1, 32], strides = [1, 1, 1]} : vector<3x1x32xf32> to vector<1x1x32xf32>
    %611 = vector.shape_cast %610 : vector<1x1x32xf32> to vector<1x32xf32>
    %612 = vector.broadcast %611 : vector<1x32xf32> to vector<8x32xf32>
    %613 = arith.addf %609, %612 : vector<8x32xf32>
    %614 = arith.mulf %579, %613 : vector<8x32xf32>
    %615 = arith.addf %606, %614 : vector<8x32xf32>
    %616 = math.tanh %615 : vector<8x32xf32>
    %cst_239 = arith.constant 1.000000e+00 : f32
    %617 = vector.broadcast %cst_239 : f32 to vector<8x32xf32>
    %618 = arith.subf %617, %599 : vector<8x32xf32>
    %619 = arith.mulf %618, %616 : vector<8x32xf32>
    %620 = arith.mulf %599, %559 : vector<8x32xf32>
    %621 = arith.addf %619, %620 : vector<8x32xf32>
    %622 = arith.addf %621, %473 : vector<8x32xf32>
    %c2_240 = arith.constant 2 : index
    %c0_241 = arith.constant 0 : index
    %c0_242 = arith.constant 0 : index
    %623 = vector.load %arg24[%c2_240, %c0_241, %c0_242] : memref<3x8x32xf32, #tpu.memory_space<vmem>>, vector<1x8x32xf32>
    %624 = vector.shape_cast %623 : vector<1x8x32xf32> to vector<8x32xf32>
    %625 = vector.shape_cast %622 : vector<8x32xf32> to vector<1x8x32xf32>
    tpu.vector_store %arg24[%c2_240, %c0_241, %c0_242], %625 {strides = array<i32>} : memref<3x8x32xf32, #tpu.memory_space<vmem>>, vector<1x8x32xf32>,
    return
  }
}

</mosaic_0001>

<bundles_post_ra>
// kernel: tpu_custom_call.1
= control target key start
LH: loop header
LB: loop body
LE: loop exit
PB: predicated region body
PF: predicated region fallthrough
CT: control target
= control target key end

     0   :  { %s5616_s0 = inlined_call_operand.vmem [shape: f32[8,32], index: 0, kind: input, shape index: {}]   ;;  %s5617_s1 = inlined_call_operand.vmem [shape: f32[3,8,8], index: 1, kind: input, shape index: {}]   ;;  %s5618_s2 = inlined_call_operand.hbm [shape: f32[3,8,8], index: 2, kind: input, shape index: {}]   ;;  %s5619_s3 = inlined_call_operand.hbm [shape: f32[3,8,8], index: 3, kind: input, shape index: {}]   ;;  %s5620_s4 = inlined_call_operand.vmem [shape: f32[3,8,1], index: 4, kind: input, shape index: {}]   ;;  %s5621_s5 = inlined_call_operand.hbm [shape: f32[3,8,32], index: 5, kind: input, shape index: {}]   ;;  %s5622_s6 = inlined_call_operand.hbm [shape: f32[3,32,32], index: 6, kind: input, shape index: {}]   ;;  %s5623_s7 = inlined_call_operand.hbm [shape: f32[3,32,32], index: 7, kind: input, shape index: {}]   ;;  %s5624_s8 = inlined_call_operand.hbm [shape: f32[3,1,32], index: 8, kind: input, shape index: {}]   ;;  %s5625_s9 = inlined_call_operand.hbm [shape: f32[3,1,32], index: 9, kind: input, shape index: {}]   ;;  %s5626_s10 = inlined_call_operand.vmem [shape: f32[32,32], index: 10, kind: input, shape index: {}]   ;;  %s5627_s11 = inlined_call_operand.vmem [shape: f32[1,32], index: 11, kind: input, shape index: {}]   ;;  %s5628_s12 = inlined_call_operand.vmem [shape: f32[16,8], index: 12, kind: input, shape index: {}]   ;;  %s5629_s13 = inlined_call_operand.vmem [shape: f32[16,8], index: 13, kind: input, shape index: {}]   ;;  %s5630_s14 = inlined_call_operand.hbm [shape: f32[8,16], index: 14, kind: input, shape index: {}]   ;;  %s5631_s15 = inlined_call_operand.vmem [shape: f32[16,16], index: 15, kind: input, shape index: {}]   ;;  %s5632_s16 = inlined_call_operand.vmem [shape: f32[16,1], index: 16, kind: input, shape index: {}]   ;;  %s5633_s17 = inlined_call_operand.hbm [shape: f32[16,32], index: 17, kind: input, shape index: {}]   ;;  %s5634_s18 = inlined_call_operand.hbm [shape: f32[2,6,32,32], index: 18, kind: input, shape index: {}]   ;;  %s5635_s19 = inlined_call_operand.vmem [shape: f32[2,4,1,32], index: 19, kind: input, shape index: {}]   ;;  %s5636_s20 = inlined_call_operand.hbm [shape: f32[2,3,32,32], index: 20, kind: input, shape index: {}]   ;;  %s5637_s21 = inlined_call_operand.hbm [shape: f32[2,3,32,32], index: 21, kind: input, shape index: {}]   ;;  %s5638_s22 = inlined_call_operand.hbm [shape: f32[2,3,1,32], index: 22, kind: input, shape index: {}]   ;;  %s5639_s23 = inlined_call_operand.hbm [shape: f32[2,3,1,32], index: 23, kind: input, shape index: {}]   ;;  %s5640_s24 = inlined_call_operand.hbm [shape: f32[3,8,32], index: 24, kind: output, shape index: {}]  }
   0x1   :  { %5702 = sst [smem:[#allocation47_spill]] %s5616_s0 }
   0x2   :  { %5703 = sst [smem:[#allocation48_spill]] %s5617_s1 }
   0x3   :  { %5704 = sst [smem:[#allocation49_spill]] %s5618_s2 }
   0x4   :  { %5705 = sst [smem:[#allocation50_spill]] %s5619_s3 }
   0x5   :  { %5706 = sst [smem:[#allocation51_spill]] %s5620_s4 }
   0x6   :  { %5707 = sst [smem:[#allocation52_spill]] %s5621_s5 }
   0x7   :  { %5708 = sst [smem:[#allocation53_spill]] %s5622_s6 }
   0x8   :  { %5709 = sst [smem:[#allocation54_spill]] %s5623_s7 }
   0x9   :  { %5710 = sst [smem:[#allocation55_spill]] %s5624_s8 }
   0xa   :  { %5711 = sst [smem:[#allocation56_spill]] %s5640_s24 }
   0xb   :  { %29 = vsyncpa [#allocation3], 0 }
   0xc   :  { %30 = vsyncpa [#allocation6], 0 }
   0xd   :  { %31 = vsyncpa [#allocation9], 0 }
   0xe   :  { %32 = vsyncpa [#allocation12], 0 }
   0xf   :  { %33 = vsyncpa [#allocation15], 0 }
  0x10   :  { %34 = vsyncpa [#allocation18], 0 }
  0x11   :  { %35 = vsyncpa [#allocation21], 0 }
  0x12   :  { %36 = vsyncpa [#allocation24], 0 }
  0x13   :  { %37 = vsyncpa [#allocation4], 0  ;;  %s5712_s27 = sld [smem:[#allocation50_spill]]  ;;  %s4311_s6 = smov [#allocation5]  }
  0x14   :  { %s61_s2 = sshll.u32 %s4311_s6, 4  ;;  %s5713_s7 = sld [smem:[#allocation53_spill]]  ;;  %s62_s2 = int_to_ptr.vmem [resolvable:$true] %s61_s2 }
  0x15   :  { %s4312_s3 = smov 128   ;;  %s4313_s25 = smov 8  }
  0x16   :  { %s4314_s8 = smov [#allocation8]   ;;  %s5714_s26 = sld [smem:[#allocation55_spill]] }
  0x17   :  { %s89_s4 = sshll.u32 %s4314_s8, 4  ;;  %s4315_s6 = smov [#allocation11]   ;;  %s90_s4 = int_to_ptr.vmem [resolvable:$true] %s89_s4 }
  0x18   :  { %s115_s29 = sshll.u32 %s4315_s6, 4  ;;  %s4317_s24 = smov 1   ;;  %s116_s29 = int_to_ptr.vmem [resolvable:$true] %s115_s29 }
  0x19   :  { %s59_s28 = sshll.u32 %s5712_s27, 4  ;;  %s4318_s8 = smov [#allocation14]   ;;  %s60_s28 = int_to_ptr.hbm [resolvable:$true] %s59_s28 }
  0x1a   :  { %s87_s30 = sshll.u32 %s5713_s7, 4  ;;  %s150_s1 = sshll.u32 %s4318_s8, 4  ;;  %s88_s30 = int_to_ptr.hbm [resolvable:$true] %s87_s30  ;;  %s151_s1 = int_to_ptr.vmem [resolvable:$true] %s150_s1 }
  0x1b   :  { %67 = dma.hbm_to_vmem [thread:$0]  %s60_s28, 384, %s62_s2, [#allocation6], %s4312_s3, %s4312_s3, %s4313_s25  }
  0x1c   :  { %s113_s27 = sshll.u32 %s5714_s26, 4  ;;  %s148_s28 = sshll.u32 %s5630_s14, 4  ;;  %s114_s27 = int_to_ptr.hbm [resolvable:$true] %s113_s27  ;;  %s149_s28 = int_to_ptr.hbm [resolvable:$true] %s148_s28 }
  0x1d   :  { %95 = dma.hbm_to_vmem [thread:$0]  %s88_s30, 1536, %s90_s4, [#allocation9], %s4312_s3, %s4312_s3, %s4313_s25  }
  0x1e   :  { %s4316_s2 = smov 16   ;;  %s175_s30 = sshll.u32 %s5634_s18, 4  ;;  %s176_s30 = int_to_ptr.hbm [resolvable:$true] %s175_s30 }
  0x1f   :  { %121 = dma.hbm_to_vmem [thread:$0]  %s114_s27, 48, %s116_s29, [#allocation12], %s4316_s2, %s4316_s2, %s4317_s24  }
  0x20   :  { %153 = dma.hbm_to_vmem [thread:$0]  %s149_s28, 128, %s151_s1, [#allocation15]  }
  0x21   :  { %s203_s14 = sshll.u32 %s5637_s21, 4  ;;  %s4319_s0 = smov [#allocation17]   ;;  %s204_s14 = int_to_ptr.hbm [resolvable:$true] %s203_s14 }
  0x22   :  { %s177_s7 = sshll.u32 %s4319_s0, 4  ;;  %s4320_s27 = smov [#allocation20]   ;;  %s178_s7 = int_to_ptr.vmem [resolvable:$true] %s177_s7 }
  0x23   :  { %183 = dma.hbm_to_vmem [thread:$0]  %s176_s30, 6144, %s178_s7, [#allocation18], %s4312_s3, %s4312_s3, %s4313_s25  }
  0x24   :  { %s205_s29 = sshll.u32 %s4320_s27, 4  ;;  %s5715_s18 = sld [smem:[#allocation49_spill]]  ;;  %s206_s29 = int_to_ptr.vmem [resolvable:$true] %s205_s29 }
  0x25   :  { %211 = dma.hbm_to_vmem [thread:$0]  %s204_s14, 3072, %s206_s29, [#allocation21], %s4312_s3, %s4312_s3, %s4313_s25  }
  0x26   :  { %s5716_s1 = sld [smem:[#allocation52_spill]]  ;;  %s4321_s6 = smov [#allocation2]  }
  0x27   :  { %s48_s0 = sshll.u32 %s4321_s6, 4  ;;  %s4322_s30 = smov [#allocation7]   ;;  %s49_s0 = int_to_ptr.vmem [resolvable:$true] %s48_s0 }
  0x28   :  { %s76_s7 = sshll.u32 %s4322_s30, 4  ;;  %s5717_s5 = sld [smem:[#allocation54_spill]]  ;;  %s77_s7 = int_to_ptr.vmem [resolvable:$true] %s76_s7 }
  0x29   :  { %s126_s21 = sshll.u32 %s5625_s9, 4  ;;  %s4323_s28 = smov [#allocation10]   ;;  %s127_s21 = int_to_ptr.hbm [resolvable:$true] %s126_s21 }
  0x2a   :  { %s46_s26 = sshll.u32 %s5715_s18, 4  ;;  %s162_s27 = sshll.u32 %s5633_s17, 4  ;;  %s47_s26 = int_to_ptr.hbm [resolvable:$true] %s46_s26  ;;  %s163_s27 = int_to_ptr.hbm [resolvable:$true] %s162_s27 }
  0x2b   :  { %54 = dma.hbm_to_vmem [thread:$0]  %s47_s26, 384, %s49_s0, [#allocation3], %s4312_s3, %s4312_s3, %s4313_s25  }
  0x2c   :  { %s74_s4 = sshll.u32 %s5716_s1, 4  ;;  %s102_s1 = sshll.u32 %s4323_s28, 4  ;;  %s75_s4 = int_to_ptr.hbm [resolvable:$true] %s74_s4  ;;  %s103_s1 = int_to_ptr.vmem [resolvable:$true] %s102_s1 }
  0x2d   :  { %82 = dma.hbm_to_vmem [thread:$0]  %s75_s4, 384, %s77_s7, [#allocation6], %s4312_s3, %s4312_s3, %s4313_s25  }
  0x2e   :  { %s100_s18 = sshll.u32 %s5717_s5, 4  ;;  %s4324_s26 = smov [#allocation13]   ;;  %s101_s18 = int_to_ptr.hbm [resolvable:$true] %s100_s18 }
  0x2f   :  { %108 = dma.hbm_to_vmem [thread:$0]  %s101_s18, 1536, %s103_s1, [#allocation9], %s4312_s3, %s4312_s3, %s4313_s25  }
  0x30   :  { %s128_s6 = sshll.u32 %s4324_s26, 4  ;;  %s190_s7 = sshll.u32 %s5636_s20, 4  ;;  %s129_s6 = int_to_ptr.vmem [resolvable:$true] %s128_s6  ;;  %s191_s7 = int_to_ptr.hbm [resolvable:$true] %s190_s7 }
  0x31   :  { %134 = dma.hbm_to_vmem [thread:$0]  %s127_s21, 48, %s129_s6, [#allocation12], %s4316_s2, %s4316_s2, %s4317_s24  }
  0x32   :  { %s4325_s8 = smov [#allocation16]   ;;  %s4326_s18 = smov [#allocation19]  }
  0x33   :  { %s164_s5 = sshll.u32 %s4325_s8, 4  ;;  %s192_s17 = sshll.u32 %s4326_s18, 4  ;;  %s165_s5 = int_to_ptr.vmem [resolvable:$true] %s164_s5  ;;  %s193_s17 = int_to_ptr.vmem [resolvable:$true] %s192_s17 }
  0x34   :  { %170 = dma.hbm_to_vmem [thread:$0]  %s163_s27, 256, %s165_s5, [#allocation15], %s4312_s3, %s4312_s3, %s4313_s25  }
  0x35   :  { %s216_s28 = sshll.u32 %s5638_s22, 4  ;;  %s229_s1 = sshll.u32 %s5639_s23, 4  ;;  %s217_s28 = int_to_ptr.hbm [resolvable:$true] %s216_s28  ;;  %s230_s1 = int_to_ptr.hbm [resolvable:$true] %s229_s1 }
  0x36   :  { %198 = dma.hbm_to_vmem [thread:$0]  %s191_s7, 3072, %s193_s17, [#allocation18], %s4312_s3, %s4312_s3, %s4313_s25  }
  0x37   :  { %s4327_s26 = smov [#allocation22]   ;;  %s4328_s0 = smov [#allocation23]  }
  0x38   :  { %s218_s6 = sshll.u32 %s4327_s26, 4  ;;  %s231_s22 = sshll.u32 %s4328_s0, 4  ;;  %s219_s6 = int_to_ptr.vmem [resolvable:$true] %s218_s6  ;;  %s232_s22 = int_to_ptr.vmem [resolvable:$true] %s231_s22 }
  0x39   :  { %224 = dma.hbm_to_vmem [thread:$0]  %s217_s28, 96, %s219_s6, [#allocation21], %s4316_s2, %s4316_s2, %s4317_s24  }
  0x3a   :  { %237 = dma.hbm_to_vmem [thread:$0]  %s230_s1, 96, %s232_s22, [#allocation24], %s4316_s2, %s4316_s2, %s4317_s24  }
  0x3b   :  { %4293 = dma.done.wait [#allocation3], 384  }
  0x3c   :  { %4294 = vsyncadd [#allocation3], 4294966912 }
  0x3d   :  { %4295 = dma.done.wait [#allocation6], 768  }
  0x3e   :  { %4296 = vsyncadd [#allocation6], 4294966528 }
  0x3f   :  { %4297 = dma.done.wait [#allocation9], 3072  }
  0x40   :  { %4298 = vsyncadd [#allocation9], 4294964224 }
  0x41   :  { %4299 = dma.done.wait [#allocation12], 96  }
  0x42   :  { %4300 = vsyncadd [#allocation12], 4294967200 }
  0x43   :  { %4301 = dma.done.wait [#allocation15], 384  }
  0x44   :  { %4302 = vsyncadd [#allocation15], 4294966912 }
  0x45   :  { %4303 = dma.done.wait [#allocation18], 9216  }
  0x46   :  { %4304 = vsyncadd [#allocation18], 4294958080 }
  0x47   :  { %4305 = dma.done.wait [#allocation21], 3168  }
  0x48   :  { %4306 = vsyncadd [#allocation21], 4294964128 }
  0x49   :  { %4307 = dma.done.wait [#allocation24], 96  }
  0x4a   :  { %4308 = vsyncadd [#allocation24], 4294967200  ;;  %vm5659_vm0 = vcmask 64512   ;;  %s5718_s24 = sld [smem:[#allocation47_spill]]  ;;  %v4545_v2 = vld [vmem:[#allocation10 + $0x18] sm:$0xff]  ;;  %v4549_v3 = vld [vmem:[#allocation10 + $0x10] sm:$0xff]  ;;  %v587_v31 = vlaneseq }
  0x4b   :  { %s5719_s9 = sld [smem:[#allocation48_spill]]  ;;  %401 = vmatpush.msra.mxu2 %v4545_v2  ;;  %v4551_v4 = vld [vmem:[#allocation8 + $0x18] sm:$0xff]  ;;  %v4553_v5 = vld [vmem:[#allocation10 + $0x8] sm:$0xff]  ;;  %v4559_v7 = vld [vmem:[#allocation8 + $0x10] sm:$0xff]  ;;  %vm5661_vm1 = vcmask 261120   ;;  %v5643_v29 = vmov 0  }
  0x4c   :  { %378 = vmatpush.msra.mxu1 %v4551_v4  ;;  %v4557_v6 = vld [vmem:[#allocation8 + $0x38] sm:$0xff]  ;;  %v4561_v8 = vld [vmem:[#allocation10] sm:$0xff]  ;;  %v4565_v9 = vld [vmem:[#allocation8 + $0x30] sm:$0xff]  ;;  %s5724_s8 = sld [smem:[#allocation51_spill]]  ;;  %3766 = vset.pattern.permute.xlu0 %v5643_v29  ;;  %v4638_v32 = vshrl.u32 %v587_v31, 7 }
  0x4d   :  { %402 = vmatpush.msra.mxu2 %v4549_v3  ;;  %448 = vmatpush.msra.mxu3 %v4557_v6  ;;  %v4567_v10 = vld [vmem:[#allocation7] sm:$0xff]  ;;  %v4581_v13 = vld [vmem:[#allocation8] sm:$0xff]  ;;  %v4587_v15 = vld [vmem:[#allocation10 + $0x38] sm:$0xff] }
  0x4e   :  { %v4569_v11 = vld [vmem:[#allocation8 + $0x8] sm:$0xff]  ;;  %379 = vmatpush.msra.mxu1 %v4559_v7  ;;  %v4583_v14 = vld [vmem:[#allocation8 + $0x20] sm:$0xff]  ;;  %v4589_v16 = vld [vmem:[#allocation8 + $0x58] sm:$0xff]  ;;  %5725 = vst [vmem:[#allocation39_spill] sm:$0xff] %v4638_v32  ;;  %3768 = vset.pattern.permute.xlu1 %v4638_v32 }
  0x4f   :  { %v4572_v12 = vld [vmem:[#allocation8 + $0x28] sm:$0xff]  ;;  %403 = vmatpush.msra.mxu2 %v4553_v5  ;;  %449 = vmatpush.msra.mxu3 %v4565_v9  ;;  %5720 = vst [vmem:[#allocation35_spill] sm:$0xff] %v4589_v16  ;;  %v4591_v17 = vld [vmem:[#allocation10 + $0x30] sm:$0xff]  ;;  %v4603_v21 = vld [vmem:[#allocation10 + $0x20] sm:$0xff] }
  0x50   :  { %v4540_v0 = vld [vmem:[%s5718_s24] sm:$0xff]  ;;  %380 = vmatpush.msra.mxu1 %v4569_v11  ;;  %v4595_v18 = vld [vmem:[#allocation8 + $0x50] sm:$0xff]  ;;  %v4597_v19 = vld [vmem:[#allocation10 + $0x28] sm:$0xff]  ;;  %3769 = vset.pattern.permute.xlu2 %v4638_v32  ;;  %s5868_s24 = sld [smem:[#allocation56_spill]] }
  0x51   :  { %v330_v1 = vld [vmem:[%s5719_s9] sm:$0xff]  ;;  %354 = vmatpush.msra.mxu0 %v4540_v0  ;;  %404 = vmatpush.msra.mxu2 %v4561_v8  ;;  %5721 = vst [vmem:[#allocation36_spill] sm:$0xff] %v4595_v18  ;;  %v4599_v20 = vld [vmem:[#allocation8 + $0x48] sm:$0xff]  ;;  %v4605_v22 = vld [vmem:[#allocation8 + $0x40] sm:$0xff] }
  0x52   :  { %3650 = vmatmul.msk.f32.vlgmr.msra.gmra.mxu0 %vm5659_vm0, %v330_v1  ;;  %450 = vmatpush.msra.mxu3 %v4572_v12  ;;  %5722 = vst [vmem:[#allocation37_spill] sm:$0xff] %v4599_v20  ;;  %v4613_v23 = vld [vmem:[#allocation10 + $0x58] sm:$0xff]  ;;  %v4615_v24 = vld [vmem:[#allocation10 + $0x50] sm:$0xff]  ;;  %v4618_v25 = vld [vmem:[#allocation10 + $0x48] sm:$0xff] }
  0x53   :  { %3652 = vmatmul.msk.f32.vlgmr.msra.gmra.mxu2 %vm5661_vm1, %v4567_v10  ;;  %381 = vmatpush.msra.mxu1 %v4581_v13  ;;  %5723 = vst [vmem:[#allocation38_spill] sm:$0xff] %v4605_v22  ;;  %v4621_v26 = vld [vmem:[#allocation10 + $0x40] sm:$0xff]  ;;  %v4633_v28 = vld [vmem:[%s5724_s8] sm:$0xff]  ;;  %v4645_v36 = vld [vmem:[#allocation5] sm:$0xff] }
  0x54   :  { %451 = vmatpush.msra.mxu3 %v4583_v14  ;;  %468 = vmatpush.msrb.mxu0 %v4587_v15  ;;  %vm579_vm2 = vcmp.gt.f32.partialorder %v4633_v28, 0.5  ;;  %v4643_v33 = vld [vmem:[#allocation11] ss:$0 sm:$0xff]  ;;  %v4648_v38 = vld [vmem:[#allocation13] ss:$0 sm:$0xff]  ;;  %v586_v39 = vperm.slane %v4645_v36, 0 }
  0x55   :  { %515 = vmatpush.msrb.mxu1 %v4589_v16  ;;  %538 = vmatpush.msrb.mxu2 %v4613_v23  ;;  %v580_v30 = vsel %vm579_vm2, 1, %v5643_v29  ;;  %5726 = vst [vmem:[#allocation40_spill] sm:$0xff] %v4643_v33  ;;  %v4651_v41 = vld [vmem:[#allocation11 + $0x1] ss:$0 sm:$0xff]  ;;  %v4654_v45 = vld [vmem:[#allocation13 + $0x1] ss:$0 sm:$0xff] }
  0x56   :  { %469 = vmatpush.msrb.mxu0 %v4591_v17  ;;  %582 = vperm.xlu0 %3766, %v580_v30   ;;  %5727 = vst [vmem:[#allocation41_spill] sm:$0xff] %v4648_v38  ;;  %v593_v48 = vperm.slane %v4645_v36, 1  ;;  %v635_v49 = vperm.slane %v4645_v36, 7  ;;  %v4662_v50 = vld [vmem:[%s5626_s10 + $0x18] sm:$0xff]  ;;  %v4667_v51 = vld [vmem:[%s5626_s10 + $0x10] sm:$0xff]  ;;  %v4673_v53 = vld [vmem:[%s5626_s10 + $0x8] sm:$0xff] }
  0x57   :  { %516 = vmatpush.msrb.mxu1 %v4595_v18  ;;  %539 = vmatpush.msrb.mxu2 %v4615_v24  ;;  %5728 = vst [vmem:[#allocation42_spill] sm:$0xff] %v4654_v45  ;;  %v4680_v55 = vld [vmem:[%s5626_s10] sm:$0xff]  ;;  %v600_v57 = vperm.slane %v4645_v36, 2  ;;  %v607_v62 = vperm.slane %v4645_v36, 3  ;;  %v621_v1 = vperm.slane %v4645_v36, 5  ;;  %s3630_s2 = sshll.u32 %s5868_s24, 4  ;;  %s3631_s2 = int_to_ptr.hbm [resolvable:$true] %s3630_s2 }
  0x58   :  { %470 = vmatpush.msrb.mxu0 %v4597_v19  ;;  %571 = vmatpush.msrb.mxu3 %v4662_v50  ;;  %v4686_v60 = vld [vmem:[#allocation5 + $0x8] sm:$0xff] }
  0x59   :  { %517 = vmatpush.msrb.mxu1 %v4599_v20  ;;  %540 = vmatpush.msrb.mxu2 %v4618_v25  ;;  %v1063_v61 = vperm.slane %v4686_v60, 0  ;;  %v1084_v30 = vperm.slane %v4686_v60, 3 }
  0x5a   :  { %471 = vmatpush.msrb.mxu0 %v4603_v21  ;;  %598 = vperm.xlu1 %3768, %v593_v48  }
  0x5b   :  { %518 = vmatpush.msrb.mxu1 %v4605_v22  ;;  %3655 = vmatmul.msk.f32.vlgmr.msrb.gmra.mxu0 %vm5661_vm1, %v4567_v10 }
  0x5c   :  { %541 = vmatpush.msrb.mxu2 %v4621_v26  ;;  %572 = vmatpush.msrb.mxu3 %v4667_v51 }
  0x5d   :  { %3658 = vmatmul.msk.f32.vlgmr.msrb.gmra.mxu2 %vm5661_vm1, %v4567_v10  ;;  %612 = vperm.xlu2 %3769, %v607_v62   ;;  %v628_v62 = vperm.slane %v4645_v36, 6 }
  0x5e   :  { %3767 = vset.pattern.permute.xlu0 %v4638_v32  ;;  %573 = vmatpush.msrb.mxu3 %v4673_v53 }
  0x60   :  { %574 = vmatpush.msrb.mxu3 %v4680_v55 }
  0x62   :  { %605 = vperm.xlu1 %3768, %v600_v57  }
  0x66   :  { %591 = vperm.xlu0 %3767, %v586_v39  }
  0x6a   :  { %626 = vperm.xlu1 %3768, %v621_v1  }
  0x6e   :  { %640 = vperm.xlu0 %3767, %v635_v49  }
  0x72   :  { %3770 = vset.pattern.permute.xlu1 %v5643_v29 }
  0x73   :  { %758 = vperm.xlu1 %3770, %v4633_v28  }
  0x76   :  { %1068 = vperm.xlu0 %3767, %v1063_v61  }
  0x7b   :  { %3772 = vset.pattern.permute.xlu1 %v4638_v32 }
  0x7e   :  { %1089 = vperm.xlu0 %3767, %v1084_v30  }
  0xcf   :  { %v356_v27 = vpop.f32.mrf.mxu0 }
  0xd0   :  { %3651 = vmatmul.msk.f32.vlgmr.msra.gmra.mxu1 %vm5661_vm1, %v356_v27  ;;  %3654 = vmatmul.msk.f32.vlgmr.msra.gmra.mxu3 %vm5661_vm1, %v356_v27 }
  0xd1   :  { %873 = vmatpush.msra.mxu3 %v4551_v4 }
  0xd3   :  { %874 = vmatpush.msra.mxu3 %v4559_v7 }
  0xd5   :  { %875 = vmatpush.msra.mxu3 %v4569_v11 }
  0xd6   :  { %v406_v35 = vpop.f32.mrf.mxu2 }
  0xd7   :  { %876 = vmatpush.msra.mxu3 %v4581_v13 }
  0xd8   :  { %3657 = vmatmul.msk.f32.vlgmr.msrb.gmra.mxu1 %vm5661_vm1, %v356_v27  ;;  %v473_v44 = vpop.f32.mrf.mxu0 }
 0x14d   :  { %v383_v34 = vpop.f32.mrf.mxu1 }
 0x14e   :  { %v384_v37 = vadd.f32 %v4643_v33, %v383_v34 }
 0x150   :  { %v409_v40 = vadd.f32 %v406_v35, %v384_v37  ;;  %v614_v35 = vperm.slane %v4645_v36, 4  ;;  %v4696_v37 = vld [vmem:[#allocation13 + $0x2] ss:$0 sm:$0xff] }
 0x151   :  { %5729 = vst [vmem:[#allocation43_spill] sm:$0xff] %v4696_v37 }
 0x152   :  { %v413_v42 = vadd.f32 %v4648_v38, %v409_v40  ;;  %v543_v40 = vpop.f32.mrf.mxu2  ;;  %619 = vperm.xlu2 %3769, %v614_v35  }
 0x153   :  { %v453_v43 = vpop.f32.mrf.mxu3  ;;  %v544_v48 = vadd.f32 %v4696_v37, %v543_v40 }
 0x154   :  { %v3653_v46 = vmul.f32 -1.442695, %v413_v42  ;;  %v454_v47 = vadd.f32 %v4651_v41, %v453_v43 }
 0x156   :  { %3828 = vpow2.f32 %v3653_v46  ;;  %v476_v52 = vadd.f32 %v473_v44, %v454_v47  ;;  %v4698_v47 = vld [vmem:[#allocation11 + $0x2] ss:$0 sm:$0xff] }
 0x157   :  { %5730 = vst [vmem:[#allocation44_spill] sm:$0xff] %v4698_v47 }
 0x158   :  { %v480_v54 = vadd.f32 %v4654_v45, %v476_v52  ;;  %v520_v52 = vpop.f32.mrf.mxu1 }
 0x15a   :  { %v3656_v56 = vmul.f32 -1.442695, %v480_v54  ;;  %633 = vperm.xlu2 %3769, %v628_v62  }
 0x15c   :  { %v3829_v58 = vpop.eup %3828  ;;  %3830 = vpow2.f32 %v3656_v56  ;;  %v1105_v56 = vperm.slane %v4686_v60, 6 }
 0x15d   :  { %v417_v59 = vadd.f32 1.0, %v3829_v58 }
 0x15e   :  { %1110 = vperm.xlu0 %3767, %v1105_v56  }
 0x15f   :  { %3832 = vrcp.f32 %v417_v59  ;;  %v429_v42 = vand.u32 2147483648, %v417_v59  ;;  %v427_v44 = vand.u32 2147483647, %v417_v59  ;;  %vm423_vm4 = vweird.f32 %v417_v59 }
 0x161   :  { %v430_v57 = vor.u32 1.1754944e-38, %v429_v42  ;;  %vm428_vm6 = vcmp.eq.f32.partialorder %v427_v44, 8.507059e+37 }
 0x162   :  { %v3831_v63 = vpop.eup %3830  ;;  %3771 = vset.pattern.permute.xlu2 %v5643_v29 }
 0x163   :  { %v484_v27 = vadd.f32 1.0, %v3831_v63  ;;  %v521_v63 = vadd.f32 %v4698_v47, %v520_v52 }
 0x165   :  { %v3833_v31 = vpop.eup %3832  ;;  %3834 = vrcp.f32 %v484_v27  ;;  %v494_v35 = vand.u32 2147483647, %v484_v27  ;;  %vm490_vm8 = vweird.f32 %v484_v27 }
 0x166   :  { %v419_v34 = vmul.f32 %v3833_v31, %v417_v59  ;;  %vm424_vm3 = vweird.f32 %v3833_v31  ;;  %v496_v59 = vand.u32 2147483648, %v484_v27  ;;  %3775 = vset.pattern.permute.xlu0 %v5643_v29 }
 0x167   :  { %vm425_vm5 = vmor %vm423_vm4, %vm424_vm3  ;;  %vm495_vm10 = vcmp.eq.f32.partialorder %v494_v35, 8.507059e+37 }
 0x168   :  { %v420_v39 = vsub.f32 1.0, %v419_v34  ;;  %v497_v42 = vor.u32 1.1754944e-38, %v496_v59 }
 0x16a   :  { %v421_v43 = vmul.f32 %v3833_v31, %v420_v39 }
 0x16b   :  { %v3835_v46 = vpop.eup %3834 }
 0x16c   :  { %v486_v49 = vmul.f32 %v3835_v46, %v484_v27  ;;  %v422_v54 = vadd.f32 %v3833_v31, %v421_v43  ;;  %vm491_vm7 = vweird.f32 %v3835_v46  ;;  %v613_v27 = vpop.permute.xlu2 %612 }
 0x16d   :  { %vm492_vm9 = vmor %vm490_vm8, %vm491_vm7  ;;  %vm645_vm12 = vcmp.gt.f32.partialorder %v613_v27, 0.5  ;;  %vm5666_vm7 = vcmask 1042434   ;;  %vm5665_vm8 = vcmask 1043459  }
 0x16e   :  { %v487_v58 = vsub.f32 1.0, %v486_v49  ;;  %v426_v61 = vsel %vm425_vm5, %v3833_v31, %v422_v54  ;;  %v583_v54 = vpop.permute.xlu0 %582 }
 0x16f   :  { %v431_v1 = vsel %vm428_vm6, %v430_v57, %v426_v61  ;;  %vm584_vm11 = vcmp.eq.s32.totalorder %v583_v54, 1  ;;  %vm5667_vm6 = vcmask 1041409  }
 0x170   :  { %v546_v30 = vmul.f32 %v544_v48, %v431_v1  ;;  %v488_v34 = vmul.f32 %v3835_v46, %v487_v58 }
 0x172   :  { %v547_v39 = vadd.f32 %v546_v30, %v521_v63  ;;  %v489_v40 = vadd.f32 %v3835_v46, %v488_v34 }
 0x174   :  { %3836 = vtanh.f32 %v547_v39  ;;  %v493_v31 = vsel %vm492_vm9, %v3835_v46, %v489_v40  ;;  %v599_v46 = vpop.permute.xlu1 %598  ;;  %vm5664_vm9 = vcmask 1044484  }
 0x175   :  { %v498_v43 = vsel %vm495_vm10, %v497_v42, %v493_v31  ;;  %vm643_vm14 = vcmp.gt.f32.partialorder %v599_v46, 0.5  ;;  %vm5663_vm10 = vcmask 1045509  }
 0x176   :  { %v549_v28 = vsub.f32 1.0, %v498_v43  ;;  %v551_v49 = vmul.f32 %v498_v43, %v4567_v10  ;;  %v592_v58 = vpop.permute.xlu0 %591  ;;  %v4721_v10 = vld [vmem:[%s5627_s11] ss:$0 sm:$0xff] }
 0x177   :  { %5731 = vst [vmem:[#allocation45_spill] sm:$0xff] %v4721_v10  ;;  %vm642_vm13 = vcmp.gt.f32.partialorder %v592_v58, 0.5 }
 0x17a   :  { %v3837_v44 = vpop.eup %3836 }
 0x17b   :  { %v550_v48 = vmul.f32 %v3837_v44, %v549_v28 }
 0x17c   :  { %v606_v57 = vpop.permute.xlu1 %605 }
 0x17d   :  { %v4710_v52 = vadd.f32 %v551_v49, %v550_v48  ;;  %vm644_vm3 = vcmp.gt.f32.partialorder %v606_v57, 0.5 }
 0x17e   :  { %v641_v1 = vpop.permute.xlu0 %640 }
 0x17f   :  { %3659 = vmatmul.msk.f32.vlgmr.msrb.gmra.mxu3 %vm5661_vm1, %v4710_v52  ;;  %vm649_vm15 = vcmp.gt.f32.partialorder %v641_v1, 0.5 }
 0x180   :  { %998 = vmatpush.msrb.mxu3 %v4589_v16 }
 0x182   :  { %999 = vmatpush.msrb.mxu3 %v4595_v18 }
 0x184   :  { %1000 = vmatpush.msrb.mxu3 %v4599_v20  ;;  %v627_v62 = vpop.permute.xlu1 %626 }
 0x185   :  { %vm647_vm4 = vcmp.gt.f32.partialorder %v627_v62, 0.5 }
 0x186   :  { %1001 = vmatpush.msrb.mxu3 %v4605_v22 }
 0x1ac   :  { %v620_v56 = vpop.permute.xlu2 %619 }
 0x1ad   :  { %vm646_vm2 = vcmp.gt.f32.partialorder %v620_v56, 0.5 }
 0x1b4   :  { %v634_v61 = vpop.permute.xlu2 %633 }
 0x1b5   :  { %vm648_vm5 = vcmp.gt.f32.partialorder %v634_v61, 0.5 }
 0x202   :  { %v576_v63 = vpop.f32.mrf.mxu3 }
 0x203   :  { %v577_v30 = vadd.f32 %v4721_v10, %v576_v63 }
 0x205   :  { %v4724_v34 = vsel %vm584_vm11, %v577_v30, -1e+30  ;;  %vm5662_vm11 = vcmask 1046534  }
 0x206   :  { %v666_v59 = vsel %vm642_vm13, %v4724_v34, -1e+30  ;;  %v667_v35 = vsel %vm643_vm14, %v4724_v34, -1e+30  ;;  %v668_v39 = vsel %vm644_vm3, %v4724_v34, -1e+30 }
 0x207   :  { %v669_v40 = vsel %vm645_vm12, %v4724_v34, -1e+30  ;;  %v670_v31 = vsel %vm646_vm2, %v4724_v34, -1e+30  ;;  %v671_v42 = vsel %vm647_vm4, %v4724_v34, -1e+30 }
 0x208   :  { %v674_v43 = vsel %vm5661_vm1, %v666_v59, -inf  ;;  %v681_v28 = vsel %vm5661_vm1, %v667_v35, -inf  ;;  %v688_v44 = vsel %vm5661_vm1, %v668_v39, -inf  ;;  %v695_v48 = vsel %vm5661_vm1, %v669_v40, -inf }
 0x209   :  { %v675_v49 = vrot.slane %v674_v43, 4  ;;  %v682_v27 = vrot.slane %v681_v28, 4  ;;  %v689_v46 = vrot.slane %v688_v44, 4  ;;  %v696_v54 = vrot.slane %v695_v48, 4 }
 0x20a   :  { %v702_v56 = vsel %vm5661_vm1, %v670_v31, -inf  ;;  %v672_v57 = vsel %vm648_vm5, %v4724_v34, -1e+30  ;;  %v673_v58 = vsel %vm649_vm15, %v4724_v34, -1e+30  ;;  %v709_v62 = vsel %vm5661_vm1, %v671_v42, -inf }
 0x20b   :  { %v676_v63 = vmax.f32 %v674_v43, %v675_v49  ;;  %v683_v30 = vmax.f32 %v681_v28, %v682_v27  ;;  %v690_v59 = vmax.f32 %v688_v44, %v689_v46  ;;  %v697_v35 = vmax.f32 %v695_v48, %v696_v54 }
 0x20c   :  { %v703_v39 = vrot.slane %v702_v56, 4  ;;  %v710_v40 = vrot.slane %v709_v62, 4  ;;  %v716_v29 = vsel %vm5661_vm1, %v672_v57, -inf  ;;  %v723_v10 = vsel %vm5661_vm1, %v673_v58, -inf }
 0x20d   :  { %v677_v31 = vrot.slane %v676_v63, 2  ;;  %v684_v22 = vrot.slane %v683_v30, 2  ;;  %v691_v20 = vrot.slane %v690_v59, 2  ;;  %v698_v61 = vrot.slane %v697_v35, 2 }
 0x20e   :  { %v704_v18 = vmax.f32 %v702_v56, %v703_v39  ;;  %v711_v16 = vmax.f32 %v709_v62, %v710_v40  ;;  %v717_v1 = vrot.slane %v716_v29, 4  ;;  %v724_v47 = vrot.slane %v723_v10, 4 }
 0x20f   :  { %v678_v37 = vmax.f32 %v676_v63, %v677_v31  ;;  %v685_v42 = vmax.f32 %v683_v30, %v684_v22  ;;  %v692_v43 = vmax.f32 %v690_v59, %v691_v20  ;;  %v699_v28 = vmax.f32 %v697_v35, %v698_v61 }
 0x210   :  { %v705_v44 = vrot.slane %v704_v18, 2  ;;  %v712_v48 = vrot.slane %v711_v16, 2  ;;  %v718_v49 = vmax.f32 %v716_v29, %v717_v1  ;;  %v725_v27 = vmax.f32 %v723_v10, %v724_v47 }
 0x211   :  { %v679_v46 = vrot.slane %v678_v37, 1  ;;  %v686_v54 = vrot.slane %v685_v42, 1  ;;  %v693_v57 = vrot.slane %v692_v43, 1  ;;  %v700_v58 = vrot.slane %v699_v28, 1 }
 0x212   :  { %v706_v32 = vmax.f32 %v704_v18, %v705_v44  ;;  %v713_v38 = vmax.f32 %v711_v16, %v712_v48  ;;  %v719_v33 = vrot.slane %v718_v49, 2  ;;  %v726_v45 = vrot.slane %v725_v27, 2 }
 0x213   :  { %v680_v56 = vmax.f32 %v678_v37, %v679_v46  ;;  %v687_v62 = vmax.f32 %v685_v42, %v686_v54  ;;  %v694_v39 = vmax.f32 %v692_v43, %v693_v57  ;;  %v701_v47 = vmax.f32 %v699_v28, %v700_v58  ;;  %v759_v43 = vpop.permute.xlu1 %758 }
 0x214   :  { %v707_v63 = vrot.slane %v706_v32, 1  ;;  %v714_v22 = vrot.slane %v713_v38, 1  ;;  %v720_v20 = vmax.f32 %v718_v49, %v719_v33  ;;  %v727_v30 = vmax.f32 %v725_v27, %v726_v45 }
 0x215   :  { %v739_v29 = vsel %vm5667_vm6, %v687_v62, %v680_v56  ;;  %vm5660_vm12 = vcmask 1047559   ;;  %v331_v56 = vld [vmem:[#allocation2] sm:$0xff] }
 0x216   :  { %v721_v10 = vrot.slane %v720_v20, 1  ;;  %v728_v59 = vrot.slane %v727_v30, 1  ;;  %v708_v18 = vmax.f32 %v706_v32, %v707_v63  ;;  %v741_v16 = vsel %vm5666_vm7, %v694_v39, %v739_v29  ;;  %v5732_v62 = vld [vmem:[#allocation42_spill] sm:$0xff] }
 0x217   :  { %v715_v35 = vmax.f32 %v713_v38, %v714_v22  ;;  %v743_v37 = vsel %vm5665_vm8, %v701_v47, %v741_v16 }
 0x218   :  { %v722_v40 = vmax.f32 %v720_v20, %v721_v10  ;;  %v745_v33 = vsel %vm5664_vm9, %v708_v18, %v743_v37  ;;  %v729_v45 = vmax.f32 %v727_v30, %v728_v59  ;;  %v5733_v30 = vld [vmem:[#allocation40_spill] sm:$0xff]  ;;  %v5734_v10 = vld [vmem:[#allocation41_spill] sm:$0xff] }
 0x219   :  { %v747_v31 = vsel %vm5663_vm10, %v715_v35, %v745_v33 }
 0x21a   :  { %v749_v61 = vsel %vm5662_vm11, %v722_v40, %v747_v31 }
 0x21b   :  { %v751_v1 = vsel %vm5660_vm12, %v729_v45, %v749_v61  ;;  %v3663_v45 = vld [vmem:[%s5724_s8 + $0x8] sm:$0xff]  ;;  %v5735_v61 = vmov 0  }
 0x21c   :  { %v753_v42 = vsub.f32 %v4724_v34, %v751_v1  ;;  %vm1056_vm3 = vcmp.gt.f32.partialorder %v3663_v45, 0.5 }
 0x21d   :  { %v1057_v1 = vsel %vm1056_vm3, 1, %v5735_v61 }
 0x21e   :  { %v754_v32 = vmul.f32 1.442695, %v753_v42  ;;  %1059 = vperm.xlu2 %3771, %v1057_v1  }
 0x220   :  { %3838 = vpow2.f32 %v754_v32 }
 0x226   :  { %v3839_v28 = vpop.eup %3838 }
 0x227   :  { %v761_v38 = vmul.f32 %v3839_v28, %v759_v43 }
 0x229   :  { %780 = vmatpush.msra.mxu0 %v761_v38 }
 0x22a   :  { %3660 = vmatmul.msk.f32.vlgmr.msra.gmra.mxu0 %vm5659_vm0, %v4645_v36 }
 0x22b   :  { %896 = vmatpush.msrb.mxu0 %v4545_v2 }
 0x22d   :  { %897 = vmatpush.msrb.mxu0 %v4549_v3 }
 0x22f   :  { %898 = vmatpush.msrb.mxu0 %v4553_v5 }
 0x231   :  { %899 = vmatpush.msrb.mxu0 %v4561_v8 }
 0x233   :  { %1018 = vmatpush.msra.mxu0 %v4613_v23 }
 0x235   :  { %1019 = vmatpush.msra.mxu0 %v4615_v24 }
 0x237   :  { %1020 = vmatpush.msra.mxu0 %v4618_v25 }
 0x239   :  { %1021 = vmatpush.msra.mxu0 %v4621_v26 }
 0x2a7   :  { %v782_v34 = vpop.f32.mrf.mxu0 }
 0x2a8   :  { %v783_v44 = vadd.f32 1e-16, %v782_v34 }
 0x2aa   :  { %3840 = vrcp.f32 %v783_v44  ;;  %v796_v49 = vand.u32 2147483648, %v783_v44  ;;  %v794_v5 = vand.u32 2147483647, %v783_v44  ;;  %vm790_vm14 = vweird.f32 %v783_v44 }
 0x2ac   :  { %v797_v27 = vor.u32 1.1754944e-38, %v796_v49  ;;  %vm795_vm2 = vcmp.eq.f32.partialorder %v794_v5, 8.507059e+37  ;;  %v5736_v49 = vld [vmem:[#allocation39_spill] sm:$0xff] }
 0x2ad   :  { %3773 = vset.pattern.permute.xlu2 %v5736_v49 }
 0x2b0   :  { %v3841_v36 = vpop.eup %3840 }
 0x2b1   :  { %v786_v48 = vmul.f32 %v3841_v36, %v783_v44  ;;  %vm791_vm13 = vweird.f32 %v3841_v36 }
 0x2b2   :  { %vm792_vm15 = vmor %vm790_vm14, %vm791_vm13 }
 0x2b3   :  { %v787_v2 = vsub.f32 1.0, %v786_v48 }
 0x2b5   :  { %v788_v3 = vmul.f32 %v3841_v36, %v787_v2 }
 0x2b7   :  { %v789_v8 = vadd.f32 %v3841_v36, %v788_v3 }
 0x2b9   :  { %v793_v46 = vsel %vm792_vm15, %v3841_v36, %v789_v8  ;;  %v5737_v8 = vld [vmem:[#allocation43_spill] sm:$0xff] }
 0x2ba   :  { %v798_v54 = vsel %vm795_vm2, %v797_v27, %v793_v46 }
 0x2bb   :  { %v799_v57 = vmul.f32 %v798_v54, %v761_v38 }
 0x2bd   :  { %v800_v58 = vmul.f32 %v799_v57, %v4710_v52  ;;  %v4772_v52 = vld [vmem:[#allocation7 + $0x8] sm:$0xff] }
 0x2be   :  { %3666 = vmatmul.msk.f32.vlgmr.msrb.gmra.mxu0 %vm5661_vm1, %v4772_v52 }
 0x2bf   :  { %819 = vmatpush.msra.mxu1 %v800_v58  ;;  %v1077_v58 = vperm.slane %v4686_v60, 2 }
 0x2c0   :  { %3661 = vmatmul.msk.f32.vlgmr.msra.gmra.mxu1 %vm5659_vm0, %v331_v56 }
 0x2c1   :  { %937 = vmatpush.msrb.mxu1 %v4557_v6  ;;  %1082 = vperm.xlu2 %3773, %v1077_v58  }
 0x2c3   :  { %938 = vmatpush.msrb.mxu1 %v4565_v9 }
 0x2c5   :  { %939 = vmatpush.msrb.mxu1 %v4572_v12  ;;  %v3662_v12 = vld [vmem:[%s5719_s9 + $0x8] sm:$0xff] }
 0x2c6   :  { %3672 = vmatmul.msk.f32.vlgmr.msra.gmra.mxu0 %vm5661_vm1, %v4772_v52 }
 0x2c7   :  { %940 = vmatpush.msrb.mxu1 %v4583_v14  ;;  %v1070_v14 = vperm.slane %v4686_v60, 1 }
 0x2c9   :  { %1048 = vmatpush.msra.mxu1 %v4662_v50  ;;  %1075 = vperm.xlu1 %3772, %v1070_v14  }
 0x2cb   :  { %1049 = vmatpush.msra.mxu1 %v4667_v51 }
 0x2cd   :  { %1050 = vmatpush.msra.mxu1 %v4673_v53 }
 0x2cf   :  { %1051 = vmatpush.msra.mxu1 %v4680_v55 }
 0x33b   :  { %v901_v22 = vpop.f32.mrf.mxu0 }
 0x33d   :  { %v821_v6 = vpop.f32.mrf.mxu1 }
 0x33e   :  { %v4779_v9 = vadd.f32 %v821_v6, %v4540_v0 }
 0x340   :  { %853 = vmatpush.msra.mxu2 %v4779_v9 }
 0x341   :  { %3664 = vmatmul.msk.f32.vlgmr.msra.gmra.mxu2 %vm5659_vm0, %v3662_v12 }
 0x342   :  { %957 = vmatpush.msrb.mxu2 %v4587_v15  ;;  %v1091_v15 = vperm.slane %v4686_v60, 4 }
 0x343   :  { %v1023_v36 = vpop.f32.mrf.mxu0 }
 0x344   :  { %958 = vmatpush.msrb.mxu2 %v4591_v17  ;;  %1096 = vperm.xlu1 %3772, %v1091_v15   ;;  %v1112_v17 = vperm.slane %v4686_v60, 7  ;;  %v1024_v27 = vadd.f32 %v5737_v8, %v1023_v36 }
 0x346   :  { %959 = vmatpush.msrb.mxu2 %v4597_v19 }
 0x348   :  { %960 = vmatpush.msrb.mxu2 %v4603_v21 }
 0x349   :  { %3669 = vmatmul.msk.f32.vlgmr.msrb.gmra.mxu2 %vm5661_vm1, %v4772_v52 }
 0x34c   :  { %1117 = vperm.xlu1 %3772, %v1112_v17  }
 0x3c4   :  { %v855_v0 = vpop.f32.mrf.mxu2 }
 0x3c5   :  { %3665 = vmatmul.msk.f32.vlgmr.msra.gmra.mxu3 %vm5661_vm1, %v855_v0  ;;  %3668 = vmatmul.msk.f32.vlgmr.msrb.gmra.mxu1 %vm5661_vm1, %v855_v0 }
 0x3c6   :  { %1343 = vmatpush.msrb.mxu1 %v4551_v4  ;;  %v4802_v4 = vld [vmem:[#allocation5 + $0x10] sm:$0xff] }
 0x3c7   :  { %v1547_v16 = vperm.slane %v4802_v4, 2  ;;  %v1568_v37 = vperm.slane %v4802_v4, 5  ;;  %v1582_v42 = vperm.slane %v4802_v4, 7 }
 0x3c8   :  { %1344 = vmatpush.msrb.mxu1 %v4559_v7 }
 0x3ca   :  { %1345 = vmatpush.msrb.mxu1 %v4569_v11 }
 0x3cc   :  { %1346 = vmatpush.msrb.mxu1 %v4581_v13  ;;  %v962_v21 = vpop.f32.mrf.mxu2  ;;  %v1533_v13 = vperm.slane %v4802_v4, 0 }
 0x3cd   :  { %3671 = vmatmul.msk.f32.vlgmr.msrb.gmra.mxu3 %vm5661_vm1, %v855_v0  ;;  %v5738_v0 = vld [vmem:[#allocation44_spill] sm:$0xff] }
 0x3ce   :  { %1538 = vperm.xlu1 %3772, %v1533_v13   ;;  %v1098_v13 = vperm.slane %v4686_v60, 5 }
 0x3d0   :  { %1103 = vperm.xlu2 %3773, %v1098_v13  }
 0x3d6   :  { %1552 = vperm.xlu1 %3772, %v1547_v16  }
 0x3d8   :  { %3774 = vset.pattern.permute.xlu2 %v5735_v61 }
 0x3d9   :  { %1228 = vperm.xlu2 %3774, %v3663_v45  }
 0x3de   :  { %1573 = vperm.xlu1 %3772, %v1568_v37  }
 0x3e1   :  { %3776 = vset.pattern.permute.xlu2 %v5736_v49 }
 0x3e6   :  { %1587 = vperm.xlu1 %3772, %v1582_v42  }
 0x442   :  { %v942_v19 = vpop.f32.mrf.mxu1 }
 0x443   :  { %v943_v7 = vadd.f32 %v4651_v41, %v942_v19 }
 0x445   :  { %v965_v11 = vadd.f32 %v962_v21, %v943_v7 }
 0x447   :  { %v966_v39 = vadd.f32 %v5732_v62, %v965_v11 }
 0x448   :  { %v878_v63 = vpop.f32.mrf.mxu3 }
 0x449   :  { %v3670_v20 = vmul.f32 -1.442695, %v966_v39  ;;  %v879_v29 = vadd.f32 %v5733_v30, %v878_v63  ;;  %v5739_v30 = vld [vmem:[#allocation35_spill] sm:$0xff] }
 0x44b   :  { %3842 = vpow2.f32 %v3670_v20  ;;  %v904_v47 = vadd.f32 %v901_v22, %v879_v29  ;;  %v5740_v29 = vld [vmem:[#allocation36_spill] sm:$0xff] }
 0x44d   :  { %v905_v59 = vadd.f32 %v5734_v10, %v904_v47  ;;  %v5741_v47 = vld [vmem:[#allocation37_spill] sm:$0xff]  ;;  %v5742_v10 = vld [vmem:[#allocation38_spill] sm:$0xff] }
 0x44f   :  { %v3667_v18 = vmul.f32 -1.442695, %v905_v59  ;;  %v1069_v59 = vpop.permute.xlu0 %1068 }
 0x450   :  { %v1003_v46 = vpop.f32.mrf.mxu3 }
 0x451   :  { %v3843_v35 = vpop.eup %3842  ;;  %3844 = vpow2.f32 %v3667_v18  ;;  %v1004_v14 = vadd.f32 %v5738_v0, %v1003_v46  ;;  %v1076_v18 = vpop.permute.xlu1 %1075 }
 0x452   :  { %v970_v41 = vadd.f32 1.0, %v3843_v35 }
 0x454   :  { %3846 = vrcp.f32 %v970_v41  ;;  %v982_v12 = vand.u32 2147483648, %v970_v41  ;;  %vm976_vm2 = vweird.f32 %v970_v41  ;;  %v980_v17 = vand.u32 2147483647, %v970_v41 }
 0x456   :  { %v983_v7 = vor.u32 1.1754944e-38, %v982_v12 }
 0x457   :  { %v3845_v40 = vpop.eup %3844  ;;  %v1090_v16 = vpop.permute.xlu0 %1089 }
 0x458   :  { %v909_v33 = vadd.f32 1.0, %v3845_v40 }
 0x45a   :  { %3848 = vrcp.f32 %v909_v33  ;;  %v3847_v31 = vpop.eup %3846  ;;  %v921_v44 = vand.u32 2147483648, %v909_v33  ;;  %v919_v2 = vand.u32 2147483647, %v909_v33  ;;  %vm915_vm5 = vweird.f32 %v909_v33 }
 0x45b   :  { %v972_v32 = vmul.f32 %v3847_v31, %v970_v41  ;;  %vm977_vm15 = vweird.f32 %v3847_v31  ;;  %v1097_v41 = vpop.permute.xlu1 %1096 }
 0x45c   :  { %v922_v54 = vor.u32 1.1754944e-38, %v921_v44  ;;  %vm920_vm14 = vcmp.eq.f32.partialorder %v919_v2, 8.507059e+37  ;;  %vm978_vm3 = vmor %vm976_vm2, %vm977_vm15  ;;  %vm1120_vm15 = vcmp.gt.f32.partialorder %v1076_v18, 0.5  ;;  %vm1123_vm2 = vcmp.gt.f32.partialorder %v1097_v41, 0.5 }
 0x45d   :  { %v973_v38 = vsub.f32 1.0, %v972_v32 }
 0x45f   :  { %v974_v3 = vmul.f32 %v3847_v31, %v973_v38  ;;  %v1111_v37 = vpop.permute.xlu0 %1110 }
 0x460   :  { %v3849_v43 = vpop.eup %3848 }
 0x461   :  { %v911_v28 = vmul.f32 %v3849_v43, %v909_v33  ;;  %vm916_vm4 = vweird.f32 %v3849_v43  ;;  %v975_v6 = vadd.f32 %v3847_v31, %v974_v3 }
 0x462   :  { %vm917_vm13 = vmor %vm915_vm5, %vm916_vm4  ;;  %vm981_vm4 = vcmp.eq.f32.partialorder %v980_v17, 8.507059e+37  ;;  %vm1119_vm5 = vcmp.gt.f32.partialorder %v1069_v59, 0.5 }
 0x463   :  { %v912_v34 = vsub.f32 1.0, %v911_v28  ;;  %v979_v21 = vsel %vm978_vm3, %v3847_v31, %v975_v6  ;;  %v5743_v31 = vld [vmem:[#allocation45_spill] sm:$0xff]  ;;  %v1118_v45 = vpop.permute.xlu1 %1117 }
 0x464   :  { %v984_v11 = vsel %vm981_vm4, %v983_v7, %v979_v21  ;;  %vm1126_vm4 = vcmp.gt.f32.partialorder %v1118_v45, 0.5 }
 0x465   :  { %v913_v48 = vmul.f32 %v3849_v43, %v912_v34  ;;  %v1029_v62 = vsub.f32 1.0, %v984_v11  ;;  %v1031_v22 = vmul.f32 %v984_v11, %v4772_v52  ;;  %v1060_v52 = vpop.permute.xlu2 %1059 }
 0x466   :  { %vm1061_vm3 = vcmp.eq.s32.totalorder %v1060_v52, 1 }
 0x467   :  { %v914_v5 = vadd.f32 %v3849_v43, %v913_v48 }
 0x469   :  { %v918_v57 = vsel %vm917_vm13, %v3849_v43, %v914_v5  ;;  %vm1122_vm13 = vcmp.gt.f32.partialorder %v1090_v16, 0.5 }
 0x46a   :  { %v923_v56 = vsel %vm920_vm14, %v922_v54, %v918_v57  ;;  %vm1125_vm14 = vcmp.gt.f32.partialorder %v1111_v37, 0.5 }
 0x46b   :  { %v1026_v15 = vmul.f32 %v1024_v27, %v923_v56 }
 0x46d   :  { %v1027_v19 = vadd.f32 %v1026_v15, %v1004_v14  ;;  %v1083_v35 = vpop.permute.xlu2 %1082 }
 0x46e   :  { %vm1121_vm0 = vcmp.gt.f32.partialorder %v1083_v35, 0.5 }
 0x46f   :  { %3850 = vtanh.f32 %v1027_v19 }
 0x475   :  { %v3851_v39 = vpop.eup %3850  ;;  %v1104_v40 = vpop.permute.xlu2 %1103 }
 0x476   :  { %v1030_v63 = vmul.f32 %v3851_v39, %v1029_v62  ;;  %vm1124_vm12 = vcmp.gt.f32.partialorder %v1104_v40, 0.5 }
 0x478   :  { %v4822_v20 = vadd.f32 %v1031_v22, %v1030_v63 }
 0x47a   :  { %3673 = vmatmul.msk.f32.vlgmr.msra.gmra.mxu1 %vm5661_vm1, %v4822_v20 }
 0x47b   :  { %1468 = vmatpush.msra.mxu1 %v5739_v30 }
 0x47d   :  { %1469 = vmatpush.msra.mxu1 %v5740_v29 }
 0x47f   :  { %1470 = vmatpush.msra.mxu1 %v5741_v47 }
 0x481   :  { %1471 = vmatpush.msra.mxu1 %v5742_v10 }
 0x4f7   :  { %v1053_v33 = vpop.f32.mrf.mxu1 }
 0x4f8   :  { %v1054_v1 = vadd.f32 %v5743_v31, %v1053_v33 }
 0x4fa   :  { %v4833_v42 = vsel %vm1061_vm3, %v1054_v1, -1e+30 }
 0x4fb   :  { %v1143_v32 = vsel %vm1119_vm5, %v4833_v42, -1e+30  ;;  %v1144_v43 = vsel %vm1120_vm15, %v4833_v42, -1e+30  ;;  %v1145_v28 = vsel %vm1121_vm0, %v4833_v42, -1e+30 }
 0x4fc   :  { %v1146_v38 = vsel %vm1122_vm13, %v4833_v42, -1e+30  ;;  %v1147_v34 = vsel %vm1123_vm2, %v4833_v42, -1e+30  ;;  %v1148_v44 = vsel %vm1124_vm12, %v4833_v42, -1e+30 }
 0x4fd   :  { %v1151_v36 = vsel %vm5661_vm1, %v1143_v32, -inf  ;;  %v1158_v48 = vsel %vm5661_vm1, %v1144_v43, -inf  ;;  %v1165_v2 = vsel %vm5661_vm1, %v1145_v28, -inf  ;;  %v1172_v3 = vsel %vm5661_vm1, %v1146_v38, -inf }
 0x4fe   :  { %v1152_v5 = vrot.slane %v1151_v36, 4  ;;  %v1159_v8 = vrot.slane %v1158_v48, 4  ;;  %v1166_v27 = vrot.slane %v1165_v2, 4  ;;  %v1173_v46 = vrot.slane %v1172_v3, 4 }
 0x4ff   :  { %v1179_v54 = vsel %vm5661_vm1, %v1147_v34, -inf  ;;  %v1149_v57 = vsel %vm1125_vm14, %v4833_v42, -1e+30  ;;  %v1150_v58 = vsel %vm1126_vm4, %v4833_v42, -1e+30  ;;  %v1186_v56 = vsel %vm5661_vm1, %v1148_v44, -inf }
 0x500   :  { %v1153_v6 = vmax.f32 %v1151_v36, %v1152_v5  ;;  %v1160_v12 = vmax.f32 %v1158_v48, %v1159_v8  ;;  %v1167_v14 = vmax.f32 %v1165_v2, %v1166_v27  ;;  %v1174_v15 = vmax.f32 %v1172_v3, %v1173_v46 }
 0x501   :  { %v1180_v17 = vrot.slane %v1179_v54, 4  ;;  %v1187_v19 = vrot.slane %v1186_v56, 4  ;;  %v1193_v21 = vsel %vm5661_vm1, %v1149_v57, -inf  ;;  %v1200_v7 = vsel %vm5661_vm1, %v1150_v58, -inf }
 0x502   :  { %v1154_v11 = vrot.slane %v1153_v6, 2  ;;  %v1161_v13 = vrot.slane %v1160_v12, 2  ;;  %v1168_v62 = vrot.slane %v1167_v14, 2  ;;  %v1175_v39 = vrot.slane %v1174_v15, 2 }
 0x503   :  { %v1181_v63 = vmax.f32 %v1179_v54, %v1180_v17  ;;  %v1188_v22 = vmax.f32 %v1186_v56, %v1187_v19  ;;  %v1194_v30 = vrot.slane %v1193_v21, 4  ;;  %v1201_v29 = vrot.slane %v1200_v7, 4 }
 0x504   :  { %v1155_v47 = vmax.f32 %v1153_v6, %v1154_v11  ;;  %v1162_v10 = vmax.f32 %v1160_v12, %v1161_v13  ;;  %v1169_v59 = vmax.f32 %v1167_v14, %v1168_v62  ;;  %v1176_v52 = vmax.f32 %v1174_v15, %v1175_v39  ;;  %v1229_v11 = vpop.permute.xlu2 %1228  ;;  %v3906_v39 = vld [vmem:[#allocation10 + $0x18] sm:$0xff] }
 0x505   :  { %v1182_v18 = vrot.slane %v1181_v63, 2  ;;  %v1189_v16 = vrot.slane %v1188_v22, 2  ;;  %v1195_v35 = vmax.f32 %v1193_v21, %v1194_v30  ;;  %v1202_v41 = vmax.f32 %v1200_v7, %v1201_v29  ;;  %v3909_v30 = vld [vmem:[#allocation10] sm:$0xff] }
 0x506   :  { %v1156_v37 = vrot.slane %v1155_v47, 1  ;;  %v1163_v40 = vrot.slane %v1162_v10, 1  ;;  %v1170_v33 = vrot.slane %v1169_v59, 1  ;;  %v1177_v1 = vrot.slane %v1176_v52, 1 }
 0x507   :  { %v1183_v45 = vmax.f32 %v1181_v63, %v1182_v18  ;;  %v1190_v32 = vmax.f32 %v1188_v22, %v1189_v16  ;;  %v1196_v43 = vrot.slane %v1195_v35, 2  ;;  %v1203_v28 = vrot.slane %v1202_v41, 2  ;;  %v3907_v63 = vld [vmem:[#allocation10 + $0x10] sm:$0xff]  ;;  %v3908_v22 = vld [vmem:[#allocation10 + $0x8] sm:$0xff] }
 0x508   :  { %v1157_v38 = vmax.f32 %v1155_v47, %v1156_v37  ;;  %v1164_v34 = vmax.f32 %v1162_v10, %v1163_v40  ;;  %v1171_v44 = vmax.f32 %v1169_v59, %v1170_v33  ;;  %v1178_v8 = vmax.f32 %v1176_v52, %v1177_v1  ;;  %v3910_v37 = vld [vmem:[#allocation8 + $0x38] sm:$0xff]  ;;  %v3911_v40 = vld [vmem:[#allocation8 + $0x30] sm:$0xff]  ;;  %v3912_v33 = vld [vmem:[#allocation8 + $0x28] sm:$0xff] }
 0x509   :  { %v1184_v36 = vrot.slane %v1183_v45, 1  ;;  %v1191_v48 = vrot.slane %v1190_v32, 1  ;;  %v1197_v2 = vmax.f32 %v1195_v35, %v1196_v43  ;;  %v1204_v3 = vmax.f32 %v1202_v41, %v1203_v28  ;;  %v828_v41 = vld [vmem:[#allocation2 + $0x8] sm:$0xff] }
 0x50a   :  { %v1215_v5 = vsel %vm5667_vm6, %v1164_v34, %v1157_v38  ;;  %vm5744_vm0 = vcmask 1047559   ;;  %vm5745_vm12 = vcmask 64512   ;;  %v3913_v1 = vld [vmem:[#allocation8 + $0x20] sm:$0xff] }
 0x50b   :  { %v1198_v27 = vrot.slane %v1197_v2, 1  ;;  %v1205_v46 = vrot.slane %v1204_v3, 1  ;;  %v1185_v54 = vmax.f32 %v1183_v45, %v1184_v36  ;;  %v1216_v57 = vsel %vm5666_vm7, %v1171_v44, %v1215_v5  ;;  %vm5746_vm2 = vmmov %vm5745_vm12  ;;  %v3917_v43 = vld [vmem:[#allocation10 + $0x20] sm:$0xff] }
 0x50c   :  { %v1192_v58 = vmax.f32 %v1190_v32, %v1191_v48  ;;  %v1217_v56 = vsel %vm5665_vm8, %v1178_v8, %v1216_v57  ;;  %vm5747_vm3 = vmmov %vm5746_vm2  ;;  %v3918_v34 = vld [vmem:[#allocation11] ss:$0 sm:$0xff]  ;;  %v3919_v48 = vld [vmem:[#allocation13] ss:$0 sm:$0xff] }
 0x50d   :  { %v1199_v6 = vmax.f32 %v1197_v2, %v1198_v27  ;;  %v1218_v12 = vsel %vm5664_vm9, %v1185_v54, %v1217_v56  ;;  %v1206_v14 = vmax.f32 %v1204_v3, %v1205_v46  ;;  %v3920_v27 = vld [vmem:[#allocation11 + $0x1] ss:$0 sm:$0xff]  ;;  %v3921_v57 = vld [vmem:[#allocation13 + $0x1] ss:$0 sm:$0xff] }
 0x50e   :  { %v1219_v15 = vsel %vm5663_vm10, %v1192_v58, %v1218_v12 }
 0x50f   :  { %v1220_v17 = vsel %vm5662_vm11, %v1199_v6, %v1219_v15  ;;  %v1540_v15 = vperm.slane %v4802_v4, 1 }
 0x510   :  { %v1221_v19 = vsel %vm5744_vm0, %v1206_v14, %v1220_v17  ;;  %v3677_v14 = vld [vmem:[%s5724_s8 + $0x10] sm:$0xff] }
 0x511   :  { %v1223_v21 = vsub.f32 %v4833_v42, %v1221_v19  ;;  %vm1526_vm4 = vcmp.gt.f32.partialorder %v3677_v14, 0.5  ;;  %1545 = vperm.xlu2 %3776, %v1540_v15  }
 0x512   :  { %v1527_v17 = vsel %vm1526_vm4, 1, %v5735_v61 }
 0x513   :  { %v1224_v7 = vmul.f32 1.442695, %v1223_v21  ;;  %1529 = vperm.xlu0 %3775, %v1527_v17  }
 0x515   :  { %3852 = vpow2.f32 %v1224_v7 }
 0x51b   :  { %v3853_v13 = vpop.eup %3852  ;;  %3777 = vset.pattern.permute.xlu0 %v5736_v49 }
 0x51c   :  { %v1231_v62 = vmul.f32 %v3853_v13, %v1229_v11  ;;  %v1554_v13 = vperm.slane %v4802_v4, 3 }
 0x51e   :  { %1250 = vmatpush.msra.mxu2 %v1231_v62  ;;  %1559 = vperm.xlu2 %3776, %v1554_v13  }
 0x51f   :  { %3674 = vmatmul.msk.f32.vlgmr.msra.gmra.mxu2 %vm5745_vm12, %v4686_v60 }
 0x520   :  { %1366 = vmatpush.msrb.mxu2 %v3906_v39 }
 0x522   :  { %1367 = vmatpush.msrb.mxu2 %v3907_v63 }
 0x524   :  { %1368 = vmatpush.msrb.mxu2 %v3908_v22 }
 0x526   :  { %1369 = vmatpush.msrb.mxu2 %v3909_v30 }
 0x528   :  { %1488 = vmatpush.msra.mxu2 %v4613_v23 }
 0x52a   :  { %1489 = vmatpush.msra.mxu2 %v4615_v24 }
 0x52c   :  { %1490 = vmatpush.msra.mxu2 %v4618_v25 }
 0x52e   :  { %1491 = vmatpush.msra.mxu2 %v4621_v26 }
 0x5a2   :  { %v1252_v42 = vpop.f32.mrf.mxu2 }
 0x5a3   :  { %v1253_v29 = vadd.f32 1e-16, %v1252_v42 }
 0x5a5   :  { %3854 = vrcp.f32 %v1253_v29  ;;  %v1266_v59 = vand.u32 2147483648, %v1253_v29  ;;  %v1264_v18 = vand.u32 2147483647, %v1253_v29  ;;  %vm1260_vm13 = vweird.f32 %v1253_v29 }
 0x5a7   :  { %v1267_v23 = vor.u32 1.1754944e-38, %v1266_v59  ;;  %vm1265_vm15 = vcmp.eq.f32.partialorder %v1264_v18, 8.507059e+37  ;;  %v1561_v18 = vperm.slane %v4802_v4, 4 }
 0x5a9   :  { %1566 = vperm.xlu0 %3777, %v1561_v18  }
 0x5ab   :  { %v3855_v60 = vpop.eup %3854 }
 0x5ac   :  { %v1256_v47 = vmul.f32 %v3855_v60, %v1253_v29  ;;  %vm1261_vm5 = vweird.f32 %v3855_v60 }
 0x5ad   :  { %vm1262_vm14 = vmor %vm1260_vm13, %vm1261_vm5 }
 0x5ae   :  { %v1257_v10 = vsub.f32 1.0, %v1256_v47 }
 0x5b0   :  { %v1258_v52 = vmul.f32 %v3855_v60, %v1257_v10  ;;  %v3922_v10 = vld [vmem:[#allocation13 + $0x2] ss:$0 sm:$0xff] }
 0x5b2   :  { %v1259_v16 = vadd.f32 %v3855_v60, %v1258_v52 }
 0x5b4   :  { %v1263_v35 = vsel %vm1262_vm14, %v3855_v60, %v1259_v16 }
 0x5b5   :  { %v1268_v24 = vsel %vm1265_vm15, %v1267_v23, %v1263_v35  ;;  %v1575_v35 = vperm.slane %v4802_v4, 6 }
 0x5b6   :  { %v1269_v25 = vmul.f32 %v1268_v24, %v1231_v62 }
 0x5b7   :  { %1580 = vperm.xlu2 %3776, %v1575_v35  }
 0x5b8   :  { %v1270_v26 = vmul.f32 %v1269_v25, %v4822_v20  ;;  %v4873_v20 = vld [vmem:[#allocation7 + $0x10] sm:$0xff] }
 0x5b9   :  { %3680 = vmatmul.msk.f32.vlgmr.msrb.gmra.mxu2 %vm5661_vm1, %v4873_v20 }
 0x5ba   :  { %1289 = vmatpush.msra.mxu3 %v1270_v26 }
 0x5bb   :  { %3675 = vmatmul.msk.f32.vlgmr.msra.gmra.mxu3 %vm5746_vm2, %v828_v41 }
 0x5bc   :  { %1407 = vmatpush.msrb.mxu3 %v3910_v37 }
 0x5be   :  { %1408 = vmatpush.msrb.mxu3 %v3911_v40 }
 0x5bf   :  { %3778 = vset.pattern.permute.xlu2 %v5735_v61 }
 0x5c0   :  { %1409 = vmatpush.msrb.mxu3 %v3912_v33  ;;  %1698 = vperm.xlu2 %3778, %v3677_v14  }
 0x5c1   :  { %3686 = vmatmul.msk.f32.vlgmr.msra.gmra.mxu2 %vm5661_vm1, %v4873_v20 }
 0x5c2   :  { %1410 = vmatpush.msrb.mxu3 %v3913_v1 }
 0x5c4   :  { %1518 = vmatpush.msra.mxu3 %v4662_v50  ;;  %v3676_v50 = vld [vmem:[%s5719_s9 + $0x10] sm:$0xff] }
 0x5c6   :  { %1519 = vmatpush.msra.mxu3 %v4667_v51  ;;  %v3914_v51 = vld [vmem:[#allocation10 + $0x38] sm:$0xff] }
 0x5c8   :  { %1520 = vmatpush.msra.mxu3 %v4673_v53  ;;  %v3915_v53 = vld [vmem:[#allocation10 + $0x30] sm:$0xff]  ;;  %3779 = vset.pattern.permute.xlu2 %v5736_v49 }
 0x5ca   :  { %1521 = vmatpush.msra.mxu3 %v4680_v55  ;;  %v3916_v55 = vld [vmem:[#allocation10 + $0x28] sm:$0xff] }
 0x63c   :  { %v1371_v38 = vpop.f32.mrf.mxu2 }
 0x63e   :  { %v1291_v45 = vpop.f32.mrf.mxu3 }
 0x63f   :  { %v4880_v32 = vadd.f32 %v1291_v45, %v4779_v9 }
 0x641   :  { %1323 = vmatpush.msrb.mxu0 %v4880_v32 }
 0x642   :  { %3678 = vmatmul.msk.f32.vlgmr.msrb.gmra.mxu0 %vm5747_vm3, %v3676_v50 }
 0x643   :  { %1427 = vmatpush.msra.mxu0 %v3914_v51 }
 0x644   :  { %v1493_v63 = vpop.f32.mrf.mxu2 }
 0x645   :  { %1428 = vmatpush.msra.mxu0 %v3915_v53  ;;  %v1494_v59 = vadd.f32 %v3922_v10, %v1493_v63 }
 0x647   :  { %1429 = vmatpush.msra.mxu0 %v3916_v55 }
 0x649   :  { %1430 = vmatpush.msra.mxu0 %v3917_v43 }
 0x64a   :  { %3683 = vmatmul.msk.f32.vlgmr.msra.gmra.mxu0 %vm5661_vm1, %v4873_v20 }
 0x6bf   :  { %v1325_v9 = vpop.f32.mrf.mxu0 }
 0x6c0   :  { %3679 = vmatmul.msk.f32.vlgmr.msrb.gmra.mxu1 %vm5661_vm1, %v1325_v9  ;;  %3682 = vmatmul.msk.f32.vlgmr.msrb.gmra.mxu3 %vm5661_vm1, %v1325_v9 }
 0x6c7   :  { %v1432_v5 = vpop.f32.mrf.mxu0 }
 0x6c8   :  { %3685 = vmatmul.msk.f32.vlgmr.msra.gmra.mxu1 %vm5661_vm1, %v1325_v9 }
 0x73d   :  { %v1348_v28 = vpop.f32.mrf.mxu1 }
 0x73e   :  { %v1349_v44 = vadd.f32 %v3918_v34, %v1348_v28  ;;  %v1539_v28 = vpop.permute.xlu1 %1538  ;;  %v1546_v34 = vpop.permute.xlu2 %1545 }
 0x73f   :  { %vm1589_vm4 = vcmp.gt.f32.partialorder %v1539_v28, 0.5 }
 0x740   :  { %v1374_v36 = vadd.f32 %v1371_v38, %v1349_v44 }
 0x742   :  { %v1375_v2 = vadd.f32 %v3919_v48, %v1374_v36  ;;  %v1530_v48 = vpop.permute.xlu0 %1529 }
 0x743   :  { %v1412_v3 = vpop.f32.mrf.mxu3 }
 0x744   :  { %v3681_v8 = vmul.f32 -1.442695, %v1375_v2  ;;  %v1413_v46 = vadd.f32 %v3920_v27, %v1412_v3 }
 0x745   :  { %v1473_v60 = vpop.f32.mrf.mxu1 }
 0x746   :  { %3856 = vpow2.f32 %v3681_v8  ;;  %v1435_v54 = vadd.f32 %v1432_v5, %v1413_v46  ;;  %v1474_v24 = vadd.f32 %v5738_v0, %v1473_v60  ;;  %v1553_v38 = vpop.permute.xlu1 %1552  ;;  %v1560_v36 = vpop.permute.xlu2 %1559 }
 0x748   :  { %v1436_v58 = vadd.f32 %v3921_v57, %v1435_v54 }
 0x74a   :  { %v3684_v56 = vmul.f32 -1.442695, %v1436_v58  ;;  %v1567_v8 = vpop.permute.xlu0 %1566 }
 0x74c   :  { %v3857_v6 = vpop.eup %3856  ;;  %3858 = vpow2.f32 %v3684_v56 }
 0x74d   :  { %v1379_v12 = vadd.f32 1.0, %v3857_v6 }
 0x74e   :  { %v1574_v44 = vpop.permute.xlu1 %1573  ;;  %v1581_v3 = vpop.permute.xlu2 %1580 }
 0x74f   :  { %3860 = vrcp.f32 %v1379_v12  ;;  %v1391_v39 = vand.u32 2147483648, %v1379_v12  ;;  %v1389_v30 = vand.u32 2147483647, %v1379_v12  ;;  %vm1385_vm12 = vweird.f32 %v1379_v12 }
 0x751   :  { %v1392_v52 = vor.u32 1.1754944e-38, %v1391_v39  ;;  %vm1390_vm13 = vcmp.eq.f32.partialorder %v1389_v30, 8.507059e+37 }
 0x752   :  { %v3859_v19 = vpop.eup %3858 }
 0x753   :  { %v1440_v21 = vadd.f32 1.0, %v3859_v19 }
 0x755   :  { %v3861_v7 = vpop.eup %3860  ;;  %3862 = vrcp.f32 %v1440_v21  ;;  %v1452_v41 = vand.u32 2147483648, %v1440_v21  ;;  %v1450_v40 = vand.u32 2147483647, %v1440_v21  ;;  %vm1446_vm15 = vweird.f32 %v1440_v21 }
 0x756   :  { %v1381_v11 = vmul.f32 %v3861_v7, %v1379_v12  ;;  %vm1386_vm0 = vweird.f32 %v3861_v7  ;;  %v1588_v2 = vpop.permute.xlu1 %1587 }
 0x757   :  { %vm1387_vm5 = vmor %vm1385_vm12, %vm1386_vm0  ;;  %v1453_v45 = vor.u32 1.1754944e-38, %v1452_v41  ;;  %vm1451_vm3 = vcmp.eq.f32.partialorder %v1450_v40, 8.507059e+37  ;;  %vm1591_vm0 = vcmp.gt.f32.partialorder %v1553_v38, 0.5  ;;  %vm1594_vm12 = vcmp.gt.f32.partialorder %v1574_v44, 0.5 }
 0x758   :  { %v1382_v62 = vsub.f32 1.0, %v1381_v11 }
 0x75a   :  { %v1383_v22 = vmul.f32 %v3861_v7, %v1382_v62 }
 0x75b   :  { %v3863_v42 = vpop.eup %3862 }
 0x75c   :  { %v1442_v29 = vmul.f32 %v3863_v42, %v1440_v21  ;;  %v1384_v47 = vadd.f32 %v3861_v7, %v1383_v22  ;;  %vm1447_vm14 = vweird.f32 %v3863_v42 }
 0x75d   :  { %vm1448_vm2 = vmor %vm1446_vm15, %vm1447_vm14  ;;  %vm1531_vm14 = vcmp.eq.s32.totalorder %v1530_v48, 1  ;;  %vm1592_vm15 = vcmp.gt.f32.partialorder %v1560_v36, 0.5 }
 0x75e   :  { %v1443_v16 = vsub.f32 1.0, %v1442_v29  ;;  %v1388_v23 = vsel %vm1387_vm5, %v3861_v7, %v1384_v47  ;;  %vm1596_vm5 = vcmp.gt.f32.partialorder %v1588_v2, 0.5 }
 0x75f   :  { %v1393_v25 = vsel %vm1390_vm13, %v1392_v52, %v1388_v23  ;;  %vm1590_vm13 = vcmp.gt.f32.partialorder %v1546_v34, 0.5 }
 0x760   :  { %v1444_v26 = vmul.f32 %v3863_v42, %v1443_v16  ;;  %v1496_v37 = vmul.f32 %v1494_v59, %v1393_v25 }
 0x762   :  { %v1445_v33 = vadd.f32 %v3863_v42, %v1444_v26  ;;  %v1497_v1 = vadd.f32 %v1496_v37, %v1474_v24 }
 0x764   :  { %v1449_v50 = vsel %vm1448_vm2, %v3863_v42, %v1445_v33  ;;  %3864 = vtanh.f32 %v1497_v1  ;;  %vm1595_vm2 = vcmp.gt.f32.partialorder %v1581_v3, 0.5 }
 0x765   :  { %v1454_v51 = vsel %vm1451_vm3, %v1453_v45, %v1449_v50  ;;  %vm1593_vm3 = vcmp.gt.f32.partialorder %v1567_v8, 0.5 }
 0x766   :  { %v1499_v53 = vsub.f32 1.0, %v1454_v51  ;;  %v1501_v43 = vmul.f32 %v1454_v51, %v4873_v20 }
 0x76a   :  { %v3865_v55 = vpop.eup %3864 }
 0x76b   :  { %v1500_v0 = vmul.f32 %v3865_v55, %v1499_v53 }
 0x76d   :  { %v4904_v9 = vadd.f32 %v1501_v43, %v1500_v0 }
 0x76f   :  { %3687 = vmatmul.msk.f32.vlgmr.msra.gmra.mxu3 %vm5661_vm1, %v4904_v9 }
 0x7f2   :  { %v1523_v5 = vpop.f32.mrf.mxu3 }
 0x7f3   :  { %v1524_v20 = vadd.f32 %v5743_v31, %v1523_v5 }
 0x7f5   :  { %v4910_v27 = vsel %vm1531_vm14, %v1524_v20, -1e+30 }
 0x7f6   :  { %v1613_v46 = vsel %vm1589_vm4, %v4910_v27, -1e+30  ;;  %v1614_v54 = vsel %vm1590_vm13, %v4910_v27, -1e+30  ;;  %v1615_v57 = vsel %vm1591_vm0, %v4910_v27, -1e+30 }
 0x7f7   :  { %v1616_v58 = vsel %vm1592_vm15, %v4910_v27, -1e+30  ;;  %v1618_v56 = vsel %vm1594_vm12, %v4910_v27, -1e+30  ;;  %v1621_v31 = vsel %vm5661_vm1, %v1613_v46, -inf  ;;  %v1628_v6 = vsel %vm5661_vm1, %v1614_v54, -inf }
 0x7f8   :  { %v1622_v12 = vrot.slane %v1621_v31, 4  ;;  %v1629_v14 = vrot.slane %v1628_v6, 4  ;;  %v1635_v15 = vsel %vm5661_vm1, %v1615_v57, -inf  ;;  %v1617_v17 = vsel %vm1593_vm3, %v4910_v27, -1e+30 }
 0x7f9   :  { %v1636_v19 = vrot.slane %v1635_v15, 4  ;;  %v1642_v21 = vsel %vm5661_vm1, %v1616_v58, -inf  ;;  %v1649_v7 = vsel %vm5661_vm1, %v1617_v17, -inf  ;;  %v1619_v11 = vsel %vm1595_vm2, %v4910_v27, -1e+30 }
 0x7fa   :  { %v1623_v13 = vmax.f32 %v1621_v31, %v1622_v12  ;;  %v1630_v62 = vmax.f32 %v1628_v6, %v1629_v14  ;;  %v1643_v39 = vrot.slane %v1642_v21, 4  ;;  %v1650_v63 = vrot.slane %v1649_v7, 4 }
 0x7fb   :  { %v1637_v22 = vmax.f32 %v1635_v15, %v1636_v19  ;;  %v1620_v30 = vsel %vm1596_vm5, %v4910_v27, -1e+30  ;;  %v1656_v42 = vsel %vm5661_vm1, %v1618_v56, -inf  ;;  %v1663_v29 = vsel %vm5661_vm1, %v1619_v11, -inf }
 0x7fc   :  { %v1624_v60 = vrot.slane %v1623_v13, 2  ;;  %v1631_v47 = vrot.slane %v1630_v62, 2  ;;  %v1644_v10 = vmax.f32 %v1642_v21, %v1643_v39  ;;  %v1651_v59 = vmax.f32 %v1649_v7, %v1650_v63 }
 0x7fd   :  { %v1638_v52 = vrot.slane %v1637_v22, 2  ;;  %v1657_v18 = vrot.slane %v1656_v42, 4  ;;  %v1664_v16 = vrot.slane %v1663_v29, 4  ;;  %v1670_v23 = vsel %vm5661_vm1, %v1620_v30, -inf }
 0x7fe   :  { %v1625_v35 = vmax.f32 %v1623_v13, %v1624_v60  ;;  %v1632_v24 = vmax.f32 %v1630_v62, %v1631_v47  ;;  %v1645_v25 = vrot.slane %v1644_v10, 2  ;;  %v1652_v26 = vrot.slane %v1651_v59, 2  ;;  %v1699_v13 = vpop.permute.xlu2 %1698 }
 0x7ff   :  { %v1639_v41 = vmax.f32 %v1637_v22, %v1638_v52  ;;  %v1658_v37 = vmax.f32 %v1656_v42, %v1657_v18  ;;  %v1665_v40 = vmax.f32 %v1663_v29, %v1664_v16  ;;  %v1671_v33 = vrot.slane %v1670_v23, 4 }
 0x800   :  { %v1626_v1 = vrot.slane %v1625_v35, 1  ;;  %v1633_v45 = vrot.slane %v1632_v24, 1  ;;  %v1646_v50 = vmax.f32 %v1644_v10, %v1645_v25  ;;  %v1653_v51 = vmax.f32 %v1651_v59, %v1652_v26  ;;  %v1788_v26 = vld [vmem:[#allocation17 + $0x58] sm:$0xff] }
 0x801   :  { %v1640_v53 = vrot.slane %v1639_v41, 1  ;;  %v1659_v55 = vrot.slane %v1658_v37, 2  ;;  %v1666_v0 = vrot.slane %v1665_v40, 2  ;;  %v1672_v43 = vmax.f32 %v1670_v23, %v1671_v33  ;;  %v1298_v23 = vld [vmem:[#allocation2 + $0x10] sm:$0xff] }
 0x802   :  { %v1627_v28 = vmax.f32 %v1625_v35, %v1626_v1  ;;  %v1634_v38 = vmax.f32 %v1632_v24, %v1633_v45  ;;  %v1647_v34 = vrot.slane %v1646_v50, 1  ;;  %v1654_v44 = vrot.slane %v1653_v51, 1  ;;  %v4945_v35 = vld [vmem:[%s5631_s15 + $0x8] sm:$0xff]  ;;  %v1786_v33 = vld [vmem:[#allocation17 + $0x48] sm:$0xff] }
 0x803   :  { %v1641_v36 = vmax.f32 %v1639_v41, %v1640_v53  ;;  %v1660_v48 = vmax.f32 %v1658_v37, %v1659_v55  ;;  %v1667_v2 = vmax.f32 %v1665_v40, %v1666_v0  ;;  %v1673_v3 = vrot.slane %v1672_v43, 2  ;;  %v1779_v41 = vld [vmem:[#allocation17 + $0x10] sm:$0xff]  ;;  %v1778_v40 = vld [vmem:[#allocation17 + $0x8] sm:$0xff]  ;;  %v1784_v53 = vld [vmem:[#allocation17 + $0x38] sm:$0xff] }
 0x804   :  { %v1648_v5 = vmax.f32 %v1646_v50, %v1647_v34  ;;  %v1655_v8 = vmax.f32 %v1653_v51, %v1654_v44  ;;  %v1685_v20 = vsel %vm5667_vm6, %v1634_v38, %v1627_v28  ;;  %vm5748_vm4 = vcmask 1047559   ;;  %v1787_v37 = vld [vmem:[#allocation17 + $0x50] sm:$0xff]  ;;  %v1768_v50 = vld [vmem:[%s5629_s13] sm:$0xff]  ;;  %v1794_v28 = vld [vmem:[#allocation17 + $0x88] sm:$0xff] }
 0x805   :  { %v1686_v46 = vsel %vm5666_vm7, %v1641_v36, %v1685_v20  ;;  %v1661_v54 = vrot.slane %v1660_v48, 1  ;;  %v1668_v57 = vrot.slane %v1667_v2, 1  ;;  %v1674_v58 = vmax.f32 %v1672_v43, %v1673_v3  ;;  %v1766_v51 = vld [vmem:[%s5628_s12] sm:$0xff]  ;;  %v1795_v0 = vld [vmem:[#allocation17 + $0x90] sm:$0xff]  ;;  %v1782_v43 = vld [vmem:[#allocation17 + $0x28] sm:$0xff] }
 0x806   :  { %v1687_v56 = vsel %vm5665_vm8, %v1648_v5, %v1686_v46  ;;  %vm5749_vm0 = vcmask 64512   ;;  %v4948_v24 = vadd.s32 8, %v5736_v49  ;;  %v2163_v25 = vperm.slane %v4945_v35, 0  ;;  %v1796_v55 = vld [vmem:[#allocation17 + $0x98] sm:$0xff]  ;;  %v1781_v38 = vld [vmem:[#allocation17 + $0x20] sm:$0xff] }
 0x807   :  { %v1688_v31 = vsel %vm5664_vm9, %v1655_v8, %v1687_v56  ;;  %v1662_v6 = vmax.f32 %v1660_v48, %v1661_v54  ;;  %v1675_v12 = vrot.slane %v1674_v58, 1  ;;  %v1669_v14 = vmax.f32 %v1667_v2, %v1668_v57  ;;  %vm5750_vm15 = vmmov %vm5749_vm0  ;;  %v1769_v34 = vld [vmem:[%s5629_s13 + $0x8] sm:$0xff]  ;;  %v1775_v48 = vld [vmem:[#allocation16] sm:$0xff] }
 0x808   :  { %3785 = vset.pattern.permute.xlu1 %v4948_v24  ;;  %3789 = vset.pattern.permute.xlu0 %v4948_v24  ;;  %vm5751_vm2 = vmmov %vm5749_vm0  ;;  %v1767_v44 = vld [vmem:[%s5628_s12 + $0x8] sm:$0xff]  ;;  %v2176_v36 = vperm.slane %v4945_v35, 1  ;;  %v1776_v8 = vld [vmem:[#allocation16 + $0x8] sm:$0xff] }
 0x809   :  { %v1676_v15 = vmax.f32 %v1674_v58, %v1675_v12  ;;  %v1689_v17 = vsel %vm5663_vm10, %v1662_v6, %v1688_v31  ;;  %2168 = vperm.xlu2 %3779, %v2163_v25   ;;  %vm5752_vm3 = vmmov %vm5749_vm0  ;;  %v1777_v2 = vld [vmem:[#allocation17] sm:$0xff]  ;;  %v4985_v20 = vld [vmem:[%s5631_s15] sm:$0xff]  ;;  %v2189_v31 = vperm.slane %v4945_v35, 2 }
 0x80a   :  { %v1690_v19 = vsel %vm5662_vm11, %v1669_v14, %v1689_v17  ;;  %v1785_v3 = vld [vmem:[#allocation17 + $0x40] sm:$0xff]  ;;  %v2059_v46 = vperm.slane %v4985_v20, 0  ;;  %v1792_v54 = vld [vmem:[#allocation17 + $0x78] sm:$0xff]  ;;  %v1791_v57 = vld [vmem:[#allocation17 + $0x70] sm:$0xff]  ;;  %v2085_v6 = vperm.slane %v4985_v20, 2 }
 0x80b   :  { %v1691_v21 = vsel %vm5748_vm4, %v1676_v15, %v1690_v19  ;;  %vm5753_vm4 = vmmov %vm5749_vm0  ;;  %v1793_v5 = vld [vmem:[#allocation17 + $0x80] sm:$0xff]  ;;  %v1790_v58 = vld [vmem:[#allocation17 + $0x68] sm:$0xff]  ;;  %v2215_v19 = vperm.slane %v4945_v35, 4 }
 0x80c   :  { %v1693_v7 = vsub.f32 %v4910_v27, %v1691_v21  ;;  %v1789_v56 = vld [vmem:[#allocation17 + $0x60] sm:$0xff]  ;;  %v1808_v12 = vld [vmem:[#allocation19 + $0x18] sm:$0xff]  ;;  %v1807_v17 = vld [vmem:[#allocation19 + $0x10] sm:$0xff] }
 0x80d   :  { %v1806_v21 = vld [vmem:[#allocation19 + $0x8] sm:$0xff] }
 0x80e   :  { %v1694_v11 = vmul.f32 1.442695, %v1693_v7  ;;  %v1805_v7 = vld [vmem:[#allocation19] sm:$0xff] }
 0x810   :  { %3866 = vpow2.f32 %v1694_v11  ;;  %2070 = vperm.xlu1 %3785, %v2059_v46   ;;  %2096 = vperm.xlu0 %3789, %v2085_v6  }
 0x811   :  { %3780 = vset.pattern.permute.xlu2 %v4948_v24 }
 0x816   :  { %v3867_v62 = vpop.eup %3866 }
 0x817   :  { %v1701_v39 = vmul.f32 %v3867_v62, %v1699_v13  ;;  %v2098_v62 = vperm.slane %v4985_v20, 3 }
 0x818   :  { %3788 = vset.pattern.permute.xlu1 %v5736_v49 }
 0x819   :  { %1720 = vmatpush.msrb.mxu0 %v1701_v39  ;;  %2174 = vperm.xlu2 %3780, %v2163_v25  }
 0x81a   :  { %3688 = vmatmul.msk.f32.vlgmr.msrb.gmra.mxu0 %vm5749_vm0, %v4802_v4 }
 0x820   :  { %2090 = vperm.xlu1 %3788, %v2085_v6  }
 0x821   :  { %3781 = vset.pattern.permute.xlu2 %v5736_v49 }
 0x828   :  { %3791 = vset.pattern.permute.xlu1 %v4948_v24 }
 0x829   :  { %2181 = vperm.xlu2 %3781, %v2176_v36  }
 0x830   :  { %2226 = vperm.xlu1 %3791, %v2215_v19  }
 0x831   :  { %3782 = vset.pattern.permute.xlu2 %v4948_v24 }
 0x838   :  { %2109 = vperm.xlu1 %3791, %v2098_v62  }
 0x839   :  { %2187 = vperm.xlu2 %3782, %v2176_v36  }
 0x840   :  { %3793 = vset.pattern.permute.xlu1 %v5736_v49 }
 0x841   :  { %3783 = vset.pattern.permute.xlu2 %v5736_v49 }
 0x849   :  { %2194 = vperm.xlu2 %3783, %v2189_v31  }
 0x851   :  { %3784 = vset.pattern.permute.xlu2 %v4948_v24 }
 0x859   :  { %2200 = vperm.xlu2 %3784, %v2189_v31  }
 0x861   :  { %3786 = vset.pattern.permute.xlu2 %v5736_v49 }
 0x897   :  { %v1722_v63 = vpop.f32.mrf.mxu0 }
 0x898   :  { %v1723_v22 = vadd.f32 1e-16, %v1722_v63  ;;  %v1816_v63 = vld [vmem:[#allocation19 + $0x58] sm:$0xff] }
 0x89a   :  { %3868 = vrcp.f32 %v1723_v22  ;;  %v1736_v60 = vand.u32 2147483648, %v1723_v22  ;;  %v1734_v10 = vand.u32 2147483647, %v1723_v22  ;;  %vm1730_vm5 = vweird.f32 %v1723_v22 }
 0x89c   :  { %v1737_v59 = vor.u32 1.1754944e-38, %v1736_v60  ;;  %vm1735_vm14 = vcmp.eq.f32.partialorder %v1734_v10, 8.507059e+37  ;;  %v2111_v60 = vperm.slane %v4985_v20, 4  ;;  %v2228_v10 = vperm.slane %v4945_v35, 5 }
 0x89e   :  { %2116 = vperm.xlu1 %3793, %v2111_v60  }
 0x8a0   :  { %v3869_v30 = vpop.eup %3868 }
 0x8a1   :  { %v1726_v42 = vmul.f32 %v3869_v30, %v1723_v22  ;;  %vm1731_vm12 = vweird.f32 %v3869_v30  ;;  %v2072_v22 = vperm.slane %v4985_v20, 1 }
 0x8a2   :  { %vm1732_vm13 = vmor %vm1730_vm5, %vm1731_vm12 }
 0x8a3   :  { %v1727_v29 = vsub.f32 1.0, %v1726_v42  ;;  %v1814_v42 = vld [vmem:[#allocation19 + $0x48] sm:$0xff]  ;;  %2077 = vperm.xlu2 %3786, %v2072_v22  }
 0x8a5   :  { %v1728_v47 = vmul.f32 %v3869_v30, %v1727_v29  ;;  %v1813_v29 = vld [vmem:[#allocation19 + $0x40] sm:$0xff] }
 0x8a7   :  { %v1729_v27 = vadd.f32 %v3869_v30, %v1728_v47  ;;  %v2202_v47 = vperm.slane %v4945_v35, 3 }
 0x8a9   :  { %v1733_v52 = vsel %vm1732_vm13, %v3869_v30, %v1729_v27  ;;  %v1815_v30 = vld [vmem:[#allocation19 + $0x50] sm:$0xff]  ;;  %v2124_v27 = vperm.slane %v4985_v20, 5 }
 0x8aa   :  { %v1738_v18 = vsel %vm1735_vm14, %v1737_v59, %v1733_v52  ;;  %v2254_v59 = vperm.slane %v4945_v35, 7  ;;  %v5024_v52 = vpop.permute.xlu2 %2168 }
 0x8ab   :  { %v1739_v16 = vmul.f32 %v1738_v18, %v1701_v39  ;;  %v2241_v39 = vperm.slane %v4945_v35, 6  ;;  %3787 = vset.pattern.permute.xlu2 %v4948_v24  ;;  %vm2283_vm12 = vcmp.gt.f32.partialorder %v5024_v52, 0.5 }
 0x8ad   :  { %v1740_v4 = vmul.f32 %v1739_v16, %v4904_v9  ;;  %v1780_v9 = vld [vmem:[#allocation17 + $0x18] sm:$0xff]  ;;  %2252 = vperm.xlu0 %3789, %v2241_v39   ;;  %2246 = vperm.xlu1 %3793, %v2241_v39  }
 0x8ae   :  { %1914 = vmatpush.msra.mxu0 %v1780_v9  ;;  %v3808_v16 = vld [vmem:[%s5635_s19] ss:$0 sm:$0xff] }
 0x8af   :  { %1759 = vmatpush.msrb.mxu1 %v1740_v4  ;;  %v3809_v4 = vld [vmem:[%s5635_s19 + $0x1] ss:$0 sm:$0xff] }
 0x8b0   :  { %3689 = vmatmul.msk.f32.vlgmr.msrb.gmra.mxu1 %vm5750_vm15, %v1298_v23  ;;  %1915 = vmatpush.msra.mxu0 %v1779_v41 }
 0x8b1   :  { %1943 = vmatpush.msra.mxu1 %v1788_v26 }
 0x8b2   :  { %1916 = vmatpush.msra.mxu0 %v1778_v40 }
 0x8b3   :  { %1944 = vmatpush.msra.mxu1 %v1787_v37  ;;  %2083 = vperm.xlu2 %3787, %v2072_v22   ;;  %v2137_v37 = vperm.slane %v4985_v20, 6 }
 0x8b4   :  { %1917 = vmatpush.msra.mxu0 %v1777_v2  ;;  %v5053_v2 = vpop.permute.xlu1 %2070 }
 0x8b5   :  { %1945 = vmatpush.msra.mxu1 %v1786_v33  ;;  %3794 = vset.pattern.permute.xlu0 %v5736_v49  ;;  %5755 = vst [vmem:[#allocation40_spill] sm:$0xff] %v5053_v2  ;;  %vm5682_vm9 = vcmp.gt.f32.partialorder %v5053_v2, 0.5 }
 0x8b6   :  { %2023 = vmatpush.msrb.mxu0 %v1792_v54  ;;  %3796 = vset.pattern.permute.xlu1 %v4948_v24 }
 0x8b7   :  { %1946 = vmatpush.msra.mxu1 %v1785_v3 }
 0x8b8   :  { %2024 = vmatpush.msrb.mxu0 %v1791_v57 }
 0x8ba   :  { %2025 = vmatpush.msrb.mxu0 %v1790_v58 }
 0x8bb   :  { %2213 = vperm.xlu2 %3787, %v2202_v47  }
 0x8bc   :  { %2026 = vmatpush.msrb.mxu0 %v1789_v56 }
 0x8bd   :  { %2064 = vperm.xlu0 %3794, %v2059_v46   ;;  %v5061_v46 = vpop.permute.xlu0 %2096 }
 0x8be   :  { %2135 = vperm.xlu1 %3796, %v2124_v27   ;;  %5756 = vst [vmem:[#allocation41_spill] sm:$0xff] %v5061_v46 }
 0x8c3   :  { %3790 = vset.pattern.permute.xlu2 %v5736_v49 }
 0x8c5   :  { %2207 = vperm.xlu0 %3794, %v2202_v47  }
 0x8c6   :  { %2265 = vperm.xlu1 %3796, %v2254_v59  }
 0x8cb   :  { %2220 = vperm.xlu2 %3790, %v2215_v19  }
 0x8cd   :  { %2233 = vperm.xlu0 %3794, %v2228_v10  }
 0x8ce   :  { %3798 = vset.pattern.permute.xlu1 %v5736_v49 }
 0x8d3   :  { %2103 = vperm.xlu2 %3790, %v2098_v62  }
 0x8db   :  { %3792 = vset.pattern.permute.xlu2 %v4948_v24 }
 0x8e3   :  { %2239 = vperm.xlu2 %3792, %v2228_v10  }
 0x8eb   :  { %2122 = vperm.xlu2 %3792, %v2111_v60  }
 0x8f3   :  { %3795 = vset.pattern.permute.xlu2 %v5736_v49  ;;  %v5033_v49 = vpop.permute.xlu2 %2174 }
 0x8fb   :  { %2129 = vperm.xlu2 %3795, %v2124_v27  }
 0x903   :  { %2259 = vperm.xlu2 %3795, %v2254_v59  }
 0x90b   :  { %3797 = vset.pattern.permute.xlu2 %v4948_v24 }
 0x913   :  { %2148 = vperm.xlu2 %3797, %v2137_v37  }
 0x91f   :  { %v5067_v58 = vpop.permute.xlu0 %2252 }
 0x92d   :  { %v1761_v1 = vpop.f32.mrf.mxu1 }
 0x92e   :  { %v4955_v45 = vadd.f32 %v1761_v1, %v4880_v32  ;;  %v1783_v32 = vld [vmem:[#allocation17 + $0x30] sm:$0xff] }
 0x92f   :  { %v5075_v6 = vpop.permute.xlu0 %2064 }
 0x930   :  { %1765 = vst.msk [vmem:[#allocation25] sm:$0xff] %vm5661_vm1, %v4955_v45  ;;  %1856 = vmatpush.msrb.mxu2 %v4955_v45  ;;  %1885 = vmatpush.msrb.mxu3 %v4955_v45 }
 0x931   :  { %3690 = vmatmul.msk.f32.vlgmr.msrb.gmra.mxu2 %vm5751_vm2, %v1768_v50  ;;  %3692 = vmatmul.msk.f32.vlgmr.msrb.gmra.mxu3 %vm5752_vm3, %v1766_v51 }
 0x932   :  { %1972 = vmatpush.msra.mxu2 %v1784_v53  ;;  %2000 = vmatpush.msra.mxu3 %v1796_v55  ;;  %v5037_v55 = vpop.permute.xlu2 %2181 }
 0x933   :  { %vm2285_vm5 = vcmp.gt.f32.partialorder %v5037_v55, 0.5 }
 0x934   :  { %1973 = vmatpush.msra.mxu2 %v1783_v32  ;;  %2001 = vmatpush.msra.mxu3 %v1795_v0  ;;  %v2150_v0 = vperm.slane %v4985_v20, 7 }
 0x936   :  { %1974 = vmatpush.msra.mxu2 %v1782_v43  ;;  %2002 = vmatpush.msra.mxu3 %v1794_v28 }
 0x937   :  { %2161 = vperm.xlu2 %3797, %v2150_v0  }
 0x938   :  { %1975 = vmatpush.msra.mxu2 %v1781_v38  ;;  %2003 = vmatpush.msra.mxu3 %v1793_v5  ;;  %v5057_v5 = vpop.permute.xlu1 %2090 }
 0x939   :  { %3691 = vmatmul.msk.f32.gmra.mxu2 %vm5753_vm4, %v1769_v34  ;;  %3693 = vmatmul.msk.f32.gmra.mxu3 %vm5749_vm0, %v1767_v44  ;;  %vm5687_vm2 = vcmp.gt.f32.partialorder %v5057_v5, 0.5 }
 0x93a   :  { %v5041_v38 = vpop.permute.xlu2 %2187 }
 0x940   :  { %v5063_v54 = vpop.permute.xlu1 %2226 }
 0x941   :  { %3698 = vmatmul.msk.f32.vlgmr.msra.gmra.mxu2 %vm5661_vm1, %v1775_v48 }
 0x942   :  { %v5043_v34 = vpop.permute.xlu2 %2194 }
 0x948   :  { %v5069_v56 = vpop.permute.xlu1 %2109 }
 0x949   :  { %3699 = vmatmul.msk.f32.gmra.mxu2 %vm5661_vm1, %v1776_v8  ;;  %5757 = vst [vmem:[#allocation39_spill] sm:$0xff] %v5069_v56 }
 0x94a   :  { %v5045_v44 = vpop.permute.xlu2 %2200 }
 0x950   :  { %v5073_v31 = vpop.permute.xlu1 %2116 }
 0x951   :  { %vm5672_vm4 = vcmp.gt.f32.partialorder %v5073_v31, 0.5 }
 0x952   :  { %v5048_v36 = vpop.permute.xlu2 %2077 }
 0x953   :  { %vm5669_vm3 = vcmp.gt.f32.partialorder %v5048_v36, 0.5 }
 0x9b4   :  { %v1858_v14 = vpop.f32.mrf.mxu2  ;;  %v1887_v15 = vpop.f32.mrf.mxu3 }
 0x9b5   :  { %3694 = vmatmul.msk.f32.vlgmr.msra.gmra.mxu0 %vm5661_vm1, %v1858_v14  ;;  %3696 = vmatmul.msk.f32.vlgmr.msra.gmra.mxu1 %vm5661_vm1, %v1887_v15  ;;  %v5079_v14 = vpop.permute.xlu1 %2246 }
 0x9b6   :  { %3700 = vmatmul.msk.f32.vlgmr.msra.gmra.mxu3 %vm5661_vm1, %v1887_v15  ;;  %2655 = vmatpush.msra.mxu0 %v1808_v12  ;;  %v5081_v15 = vpop.permute.xlu0 %2207 }
 0x9b7   :  { %vm2289_vm7 = vcmp.gt.f32.partialorder %v5081_v15, 0.5 }
 0x9b8   :  { %2656 = vmatpush.msra.mxu0 %v1807_v17 }
 0x9ba   :  { %2657 = vmatpush.msra.mxu0 %v1806_v21 }
 0x9bc   :  { %v1861_v11 = vpop.f32.mrf.mxu2  ;;  %v1890_v13 = vpop.f32.mrf.mxu3  ;;  %2658 = vmatpush.msra.mxu0 %v1805_v7 }
 0x9bd   :  { %3695 = vmatmul.msk.f32.gmra.mxu0 %vm5661_vm1, %v1861_v11  ;;  %3697 = vmatmul.msk.f32.gmra.mxu1 %vm5661_vm1, %v1890_v13  ;;  %v5085_v19 = vpop.permute.xlu1 %2135 }
 0x9be   :  { %3701 = vmatmul.msk.f32.gmra.mxu3 %vm5661_vm1, %v1890_v13  ;;  %5760 = vst [vmem:[#allocation35_spill] sm:$0xff] %v5085_v19  ;;  %v5087_v21 = vpop.permute.xlu0 %2233  ;;  %v5096_v13 = vld [vmem:[%s5632_s16] sm:$0xff] }
 0x9bf   :  { %vm5668_vm13 = vcmp.gt.f32.partialorder %v5096_v13, 0.5  ;;  %vm2293_vm6 = vcmp.gt.f32.partialorder %v5087_v21, 0.5 }
 0x9c4   :  { %v1977_v18 = vpop.f32.mrf.mxu2 }
 0x9c5   :  { %3702 = vmatmul.msk.f32.vlgmr.msrb.gmra.mxu0 %vm5661_vm1, %v1775_v48  ;;  %v5051_v48 = vpop.permute.xlu2 %2083  ;;  %v5091_v11 = vpop.permute.xlu1 %2265 }
 0x9c6   :  { %2792 = vmatpush.msrb.mxu0 %v1816_v63  ;;  %5754 = vst [vmem:[#allocation42_spill] sm:$0xff] %v5051_v48 }
 0x9c7   :  { %5761 = vst [vmem:[#allocation36_spill] sm:$0xff] %v5091_v11 }
 0x9c8   :  { %2793 = vmatpush.msrb.mxu0 %v1815_v30 }
 0x9ca   :  { %2794 = vmatpush.msrb.mxu0 %v1814_v42 }
 0x9cc   :  { %2795 = vmatpush.msrb.mxu0 %v1813_v29  ;;  %v1980_v33 = vpop.f32.mrf.mxu2  ;;  %v5125_v29 = vld [vmem:[%s5632_s16 + $0x8] sm:$0xff] }
 0x9cd   :  { %3703 = vmatmul.msk.f32.gmra.mxu0 %vm5661_vm1, %v1776_v8  ;;  %v5055_v3 = vpop.permute.xlu2 %2213 }
 0x9d5   :  { %3708 = vmatmul.msk.f32.vlgmr.msra.gmra.mxu0 %vm5661_vm1, %v4955_v45  ;;  %v5059_v8 = vpop.permute.xlu2 %2220 }
 0x9dd   :  { %3714 = vmatmul.msk.f32.vlgmr.msrb.gmra.mxu0 %vm5661_vm1, %v4955_v45  ;;  %v5065_v57 = vpop.permute.xlu2 %2103 }
 0x9de   :  { %vm5670_vm10 = vcmp.gt.f32.partialorder %v5065_v57, 0.5 }
 0xa32   :  { %v1919_v23 = vpop.f32.mrf.mxu0  ;;  %v1948_v25 = vpop.f32.mrf.mxu1 }
 0xa33   :  { %v1920_v9 = vadd.f32 %v3808_v16, %v1919_v23  ;;  %v1978_v26 = vadd.f32 %v1977_v18, %v1948_v25 }
 0xa35   :  { %v1986_v41 = vadd.f32 %v3809_v4, %v1978_v26 }
 0xa37   :  { %v2039_v40 = vmul.f32 %v1986_v41, %v1920_v9 }
 0xa39   :  { %v2041_v1 = vsel %vm5661_vm1, %v2039_v40, 0.0 }
 0xa3a   :  { %v1951_v50 = vpop.f32.mrf.mxu1  ;;  %2042 = vadd.xlane.f32.xlu0 %v2041_v1  ;;  %v1922_v24 = vpop.f32.mrf.mxu0 }
 0xa3b   :  { %v1981_v51 = vadd.f32 %v1980_v33, %v1951_v50  ;;  %v1923_v53 = vadd.f32 %v3808_v16, %v1922_v24 }
 0xa3d   :  { %v1987_v32 = vadd.f32 %v3809_v4, %v1981_v51 }
 0xa3f   :  { %v2040_v43 = vmul.f32 %v1987_v32, %v1923_v53 }
 0xa41   :  { %v2044_v28 = vsel %vm5661_vm1, %v2040_v43, 0.0  ;;  %vm2267_vm1 = vcmp.gt.f32.partialorder %v5075_v6, 0.5 }
 0xa42   :  { %2045 = vadd.xlane.f32.xlu1 %v2044_v28 }
 0xa4e   :  { %2142 = vperm.xlu0 %3794, %v2137_v37  }
 0xa56   :  { %3800 = vset.pattern.permute.xlu0 %v5735_v61 }
 0xa5b   :  { %2155 = vperm.xlu1 %3798, %v2150_v0  }
 0xa63   :  { %3799 = vset.pattern.permute.xlu1 %v5735_v61  ;;  %v5071_v61 = vpop.permute.xlu2 %2239 }
 0xa6b   :  { %v5077_v12 = vpop.permute.xlu2 %2122 }
 0xa6c   :  { %5758 = vst [vmem:[#allocation43_spill] sm:$0xff] %v5077_v12  ;;  %vm5681_vm0 = vcmp.gt.f32.partialorder %v5077_v12, 0.5 }
 0xa73   :  { %v5083_v17 = vpop.permute.xlu2 %2129 }
 0xa74   :  { %5759 = vst [vmem:[#allocation44_spill] sm:$0xff] %v5083_v17  ;;  %vm5671_vm15 = vcmp.gt.f32.partialorder %v5083_v17, 0.5 }
 0xa7b   :  { %v5089_v7 = vpop.permute.xlu2 %2259 }
 0xa7c   :  { %vm2297_vm11 = vcmp.gt.f32.partialorder %v5089_v7, 0.5 }
 0xa83   :  { %v5105_v22 = vpop.permute.xlu2 %2148 }
 0xa84   :  { %5762 = vst [vmem:[#allocation37_spill] sm:$0xff] %v5105_v22  ;;  %vm5679_vm8 = vcmp.gt.f32.partialorder %v5105_v22, 0.5 }
 0xa8b   :  { %v5180_v43 = vpop.permute.xlu2 %2161 }
 0xa8c   :  { %5765 = vst [vmem:[#allocation38_spill] sm:$0xff] %v5180_v43 }
 0xaad   :  { %v2043_v62 = vpop.xlane.xlu0 %2042 }
 0xaae   :  { %v2047_v39 = vmul.f32 0.17677669, %v2043_v62 }
 0xab0   :  { %vm2049_vm14 = vcmp.ge.f32.partialorder %v2047_v39, 0.0  ;;  %v2051_v63 = vmul.f32 0.2, %v2047_v39 }
 0xab2   :  { %v2053_v30 = vsel %vm2049_vm14, %v2047_v39, %v2051_v63  ;;  %vm2331_vm14 = vcmask 7168  }
 0xab3   :  { %v5118_v42 = vsel %vm5668_vm13, %v2053_v30, -1e+30  ;;  %vm5680_vm13 = vcmp.gt.f32.partialorder %v5085_v19, 0.5 }
 0xab4   :  { %v2299_v60 = vsel %vm2267_vm1, %v5118_v42, -1e+30  ;;  %v2301_v47 = vsel %vm5669_vm3, %v5118_v42, -1e+30  ;;  %v2303_v27 = vsel %vm5687_vm2, %v5118_v42, -1e+30 }
 0xab5   :  { %v2046_v10 = vpop.xlane.xlu1 %2045  ;;  %v2305_v59 = vsel %vm5670_vm10, %v5118_v42, -1e+30  ;;  %v2307_v16 = vsel %vm5672_vm4, %v5118_v42, -1e+30  ;;  %v2309_v4 = vsel %vm5671_vm15, %v5118_v42, -1e+30 }
 0xab6   :  { %v2048_v18 = vmul.f32 0.17677669, %v2046_v10  ;;  %vm5684_vm3 = vcmp.gt.f32.partialorder %v5125_v29, 0.5  ;;  %v2332_v23 = vsel %vm2331_vm14, %v2299_v60, -inf  ;;  %v2341_v25 = vsel %vm2331_vm14, %v2301_v47, -inf }
 0xab7   :  { %v2315_v9 = vsel %vm2283_vm12, %v5118_v42, -1e+30  ;;  %v2350_v41 = vsel %vm2331_vm14, %v2303_v27, -inf  ;;  %v2359_v37 = vsel %vm2331_vm14, %v2305_v59, -inf  ;;  %v2368_v40 = vsel %vm2331_vm14, %v2307_v16, -inf }
 0xab8   :  { %vm2050_vm10 = vcmp.ge.f32.partialorder %v2048_v18, 0.0  ;;  %v2052_v26 = vmul.f32 0.2, %v2048_v18  ;;  %v2377_v33 = vsel %vm2331_vm14, %v2309_v4, -inf  ;;  %v2317_v1 = vsel %vm2285_vm5, %v5118_v42, -1e+30 }
 0xab9   :  { %v5163_v50 = vsel %vm2331_vm14, %v2315_v9, -inf  ;;  %vm5763_vm15 = vcmp.gt.f32.partialorder %v5043_v34, 0.5  ;;  %v2321_v53 = vsel %vm2289_vm7, %v5118_v42, -1e+30  ;;  %vm5764_vm4 = vcmp.gt.f32.partialorder %v5059_v8, 0.5 }
 0xaba   :  { %v2054_v24 = vsel %vm2050_vm10, %v2048_v18, %v2052_v26  ;;  %v2319_v51 = vsel %vm5763_vm15, %v5118_v42, -1e+30  ;;  %v5174_v32 = vsel %vm5764_vm4, %v5118_v42, -1e+30  ;;  %v5185_v28 = vsel %vm2293_vm6, %v5118_v42, -1e+30 }
 0xabb   :  { %v5178_v0 = vsel %vm5684_vm3, %v2054_v24, -1e+30  ;;  %vm5766_vm10 = vcmp.gt.f32.partialorder %v5079_v14, 0.5  ;;  %vm5767_vm15 = vcmp.gt.f32.partialorder %v5051_v48, 0.5  ;;  %v5201_v30 = vsel %vm2297_vm11, %v5118_v42, -1e+30 }
 0xabc   :  { %v5190_v62 = vsel %vm5766_vm10, %v5118_v42, -1e+30  ;;  %v2300_v39 = vsel %vm5682_vm9, %v5178_v0, -1e+30  ;;  %v2302_v63 = vsel %vm5767_vm15, %v5178_v0, -1e+30 }
 0xabd   :  { %vm5768_vm4 = vcmp.gt.f32.partialorder %v5061_v46, 0.5  ;;  %vm5769_vm10 = vcmp.gt.f32.partialorder %v5069_v56, 0.5  ;;  %v2333_v10 = vsel %vm2331_vm14, %v2300_v39, -inf  ;;  %v5211_v27 = vsel %vm2331_vm14, %v2317_v1, -inf }
 0xabe   :  { %v2304_v60 = vsel %vm5768_vm4, %v5178_v0, -1e+30  ;;  %v2306_v47 = vsel %vm5769_vm10, %v5178_v0, -1e+30  ;;  %vm5689_vm15 = vcmp.gt.f32.partialorder %v5180_v43, 0.5  ;;  %v2334_v4 = vmax.f32 %v2332_v23, %v2333_v10 }
 0xabf   :  { %v2308_v59 = vsel %vm5681_vm0, %v5178_v0, -1e+30  ;;  %v2310_v18 = vsel %vm5680_vm13, %v5178_v0, -1e+30  ;;  %v2312_v16 = vsel %vm5679_vm8, %v5178_v0, -1e+30 }
 0xac0   :  { %v2342_v9 = vsel %vm2331_vm14, %v2302_v63, -inf  ;;  %v2351_v26 = vsel %vm2331_vm14, %v2304_v60, -inf  ;;  %v2360_v1 = vsel %vm2331_vm14, %v2306_v47, -inf  ;;  %v2369_v24 = vsel %vm2331_vm14, %v2308_v59, -inf  ;;  %v5227_v39 = vpop.permute.xlu0 %2142 }
 0xac1   :  { %5770 = vst [vmem:[#allocation45_spill] sm:$0xff] %v5227_v39  ;;  %v2335_v12 = vrot.slane %v2334_v4, 4  ;;  %v2343_v56 = vmax.f32 %v2341_v25, %v2342_v9  ;;  %v2352_v46 = vmax.f32 %v2350_v41, %v2351_v26  ;;  %v2361_v19 = vmax.f32 %v2359_v37, %v2360_v1 }
 0xac2   :  { %vm5683_vm4 = vcmp.gt.f32.partialorder %v5227_v39, 0.5  ;;  %v2370_v48 = vmax.f32 %v2368_v40, %v2369_v24  ;;  %v2378_v22 = vsel %vm2331_vm14, %v2310_v18, -inf  ;;  %v2387_v23 = vsel %vm2331_vm14, %v2312_v16, -inf }
 0xac3   :  { %vm5690_vm10 = vcmp.gt.f32.partialorder %v5033_v49, 0.5  ;;  %v2311_v63 = vsel %vm5683_vm4, %v5118_v42, -1e+30  ;;  %v2336_v60 = vmax.f32 %v2334_v4, %v2335_v12  ;;  %v2344_v47 = vrot.slane %v2343_v56, 4 }
 0xac4   :  { %v2353_v10 = vrot.slane %v2352_v46, 4  ;;  %vm5701_vm8 = vcmp.gt.f32.partialorder %v5041_v38, 0.5  ;;  %v2362_v25 = vrot.slane %v2361_v19, 4  ;;  %v2371_v41 = vrot.slane %v2370_v48, 4 }
 0xac5   :  { %v2379_v37 = vmax.f32 %v2377_v33, %v2378_v22  ;;  %v2386_v40 = vsel %vm2331_vm14, %v2311_v63, -inf  ;;  %vm5700_vm13 = vcmp.gt.f32.partialorder %v5045_v44, 0.5  ;;  %vm5691_vm0 = vcmp.gt.f32.partialorder %v5055_v3, 0.5 }
 0xac6   :  { %v2337_v59 = vrot.slane %v2336_v60, 2  ;;  %v2345_v18 = vmax.f32 %v2343_v56, %v2344_v47  ;;  %v2354_v16 = vmax.f32 %v2352_v46, %v2353_v10  ;;  %v2388_v9 = vmax.f32 %v2386_v40, %v2387_v23 }
 0xac7   :  { %vm5699_vm9 = vcmp.gt.f32.partialorder %v5063_v54, 0.5  ;;  %v2363_v12 = vmax.f32 %v2361_v19, %v2362_v25  ;;  %v2372_v4 = vmax.f32 %v2370_v48, %v2371_v41  ;;  %v2380_v26 = vrot.slane %v2379_v37, 4 }
 0xac8   :  { %v2422_v1 = vsel %vm2331_vm14, %v2319_v51, -inf  ;;  %vm5698_vm4 = vcmp.gt.f32.partialorder %v5071_v61, 0.5  ;;  %v2338_v22 = vmax.f32 %v2336_v60, %v2337_v59  ;;  %v2346_v33 = vrot.slane %v2345_v18, 2 }
 0xac9   :  { %v2355_v24 = vrot.slane %v2354_v16, 2  ;;  %v2389_v63 = vrot.slane %v2388_v9, 4  ;;  %vm5697_vm3 = vcmp.gt.f32.partialorder %v5067_v58, 0.5  ;;  %v2364_v2 = vrot.slane %v2363_v12, 2 }
 0xaca   :  { %v2373_v39 = vrot.slane %v2372_v4, 2  ;;  %v2381_v56 = vmax.f32 %v2379_v37, %v2380_v26  ;;  %v2431_v46 = vsel %vm2331_vm14, %v2321_v53, -inf  ;;  %v2339_v23 = vrot.slane %v2338_v22, 1 }
 0xacb   :  { %v2347_v47 = vmax.f32 %v2345_v18, %v2346_v33  ;;  %v2356_v19 = vmax.f32 %v2354_v16, %v2355_v24  ;;  %v2390_v48 = vmax.f32 %v2388_v9, %v2389_v63  ;;  %vm5696_vm2 = vcmp.gt.f32.partialorder %v5091_v11, 0.5 }
 0xacc   :  { %v2314_v51 = vsel %vm5689_vm15, %v5178_v0, -1e+30  ;;  %v2365_v60 = vmax.f32 %v2363_v12, %v2364_v2  ;;  %v2374_v10 = vmax.f32 %v2372_v4, %v2373_v39  ;;  %v2382_v25 = vrot.slane %v2381_v56, 2 }
 0xacd   :  { %v2340_v41 = vmax.f32 %v2338_v22, %v2339_v23  ;;  %v2348_v40 = vrot.slane %v2347_v47, 1  ;;  %v2357_v59 = vrot.slane %v2356_v19, 1  ;;  %v2391_v17 = vrot.slane %v2390_v48, 2  ;;  %v5258_v4 = vpop.permute.xlu1 %2155 }
 0xace   :  { %v2366_v37 = vrot.slane %v2365_v60, 1  ;;  %v2375_v26 = vrot.slane %v2374_v10, 1  ;;  %v2383_v53 = vmax.f32 %v2381_v56, %v2382_v25  ;;  %v2316_v18 = vsel %vm5690_vm10, %v5178_v0, -1e+30  ;;  %5771 = vst [vmem:[#allocation46_spill] sm:$0xff] %v5258_v4 }
 0xacf   :  { %v2349_v16 = vmax.f32 %v2347_v47, %v2348_v40  ;;  %v2358_v9 = vmax.f32 %v2356_v19, %v2357_v59  ;;  %v5252_v33 = vmax.f32 %v2390_v48, %v2391_v17  ;;  %v2318_v2 = vsel %vm5701_vm8, %v5178_v0, -1e+30 }
 0xad0   :  { %v2396_v39 = vsel %vm2331_vm14, %v2314_v51, -inf  ;;  %v2384_v12 = vrot.slane %v2383_v53, 1  ;;  %v2320_v22 = vsel %vm5700_vm13, %v5178_v0, -1e+30  ;;  %v2322_v24 = vsel %vm5691_vm0, %v5178_v0, -1e+30 }
 0xad1   :  { %v2367_v63 = vmax.f32 %v2365_v60, %v2366_v37  ;;  %vm5772_vm15 = vcmask 1041409   ;;  %vm5695_vm10 = vcmp.gt.f32.partialorder %v5258_v4, 0.5  ;;  %v2324_v56 = vsel %vm5699_vm9, %v5178_v0, -1e+30 }
 0xad2   :  { %v2492_v17 = vsel %vm5772_vm15, %v2349_v16, %v2340_v41  ;;  %v2376_v23 = vmax.f32 %v2374_v10, %v2375_v26  ;;  %v2313_v19 = vsel %vm5695_vm10, %v5118_v42, -1e+30  ;;  %v2326_v48 = vsel %vm5698_vm4, %v5178_v0, -1e+30 }
 0xad3   :  { %vm5773_vm0 = vcmask 1042434   ;;  %v2395_v60 = vsel %vm2331_vm14, %v2313_v19, -inf  ;;  %v2328_v25 = vsel %vm5697_vm3, %v5178_v0, -1e+30  ;;  %v2405_v10 = vsel %vm2331_vm14, %v2316_v18, -inf }
 0xad4   :  { %v2493_v51 = vsel %vm5773_vm0, %v2358_v9, %v2492_v17  ;;  %v5284_v41 = vmax.f32 %v2383_v53, %v2384_v12  ;;  %v2397_v40 = vmax.f32 %v2395_v60, %v2396_v39  ;;  %v2406_v59 = vmax.f32 %v5163_v50, %v2405_v10 }
 0xad5   :  { %v2414_v37 = vsel %vm2331_vm14, %v2318_v2, -inf  ;;  %v2330_v26 = vsel %vm5696_vm2, %v5178_v0, -1e+30  ;;  %v2423_v9 = vsel %vm2331_vm14, %v2320_v22, -inf  ;;  %v2432_v17 = vsel %vm2331_vm14, %v2322_v24, -inf }
 0xad6   :  { %v2415_v16 = vmax.f32 %v5211_v27, %v2414_v37  ;;  %vm5774_vm0 = vcmask 1043459   ;;  %v2398_v18 = vrot.slane %v2397_v40, 4  ;;  %v2407_v53 = vrot.slane %v2406_v59, 4 }
 0xad7   :  { %v2494_v19 = vsel %vm5774_vm0, %v2367_v63, %v2493_v51  ;;  %v2424_v12 = vmax.f32 %v2422_v1, %v2423_v9  ;;  %v2433_v60 = vmax.f32 %v2431_v46, %v2432_v17  ;;  %v2440_v50 = vsel %vm2331_vm14, %v5174_v32, -inf }
 0xad8   :  { %v2416_v39 = vrot.slane %v2415_v16, 4  ;;  %v2441_v2 = vsel %vm2331_vm14, %v2324_v56, -inf  ;;  %v2399_v10 = vmax.f32 %v2397_v40, %v2398_v18  ;;  %v2408_v47 = vmax.f32 %v2406_v59, %v2407_v53 }
 0xad9   :  { %v2425_v43 = vrot.slane %v2424_v12, 4  ;;  %v2442_v27 = vmax.f32 %v2440_v50, %v2441_v2  ;;  %v2434_v22 = vrot.slane %v2433_v60, 4  ;;  %v2449_v24 = vsel %vm2331_vm14, %v5185_v28, -inf }
 0xada   :  { %v2417_v37 = vmax.f32 %v2415_v16, %v2416_v39  ;;  %v2450_v63 = vsel %vm2331_vm14, %v2326_v48, -inf  ;;  %v2400_v51 = vrot.slane %v2399_v10, 2  ;;  %v2409_v1 = vrot.slane %v2408_v47, 2 }
 0xadb   :  { %v2426_v9 = vmax.f32 %v2424_v12, %v2425_v43  ;;  %v2443_v46 = vrot.slane %v2442_v27, 4  ;;  %vm5775_vm15 = vcmask 1044484   ;;  %v2435_v4 = vmax.f32 %v2433_v60, %v2434_v22 }
 0xadc   :  { %v2495_v17 = vsel %vm5775_vm15, %v2376_v23, %v2494_v19  ;;  %v2418_v32 = vrot.slane %v2417_v37, 2  ;;  %v2451_v56 = vmax.f32 %v2449_v24, %v2450_v63  ;;  %v2401_v40 = vmax.f32 %v2399_v10, %v2400_v51 }
 0xadd   :  { %v2410_v59 = vmax.f32 %v2408_v47, %v2409_v1  ;;  %v2427_v18 = vrot.slane %v2426_v9, 2  ;;  %v2444_v53 = vmax.f32 %v2442_v27, %v2443_v46  ;;  %v2436_v39 = vrot.slane %v2435_v4, 2 }
 0xade   :  { %v2419_v16 = vmax.f32 %v2417_v37, %v2418_v32  ;;  %v2452_v50 = vrot.slane %v2451_v56, 4  ;;  %v2459_v28 = vsel %vm2331_vm14, %v2328_v25, -inf  ;;  %v2458_v43 = vsel %vm2331_vm14, %v5190_v62, -inf }
 0xadf   :  { %v2411_v2 = vrot.slane %v2410_v59, 1  ;;  %v2428_v48 = vmax.f32 %v2426_v9, %v2427_v18  ;;  %v2445_v11 = vrot.slane %v2444_v53, 2  ;;  %v2437_v23 = vmax.f32 %v2435_v4, %v2436_v39 }
 0xae0   :  { %v2420_v12 = vrot.slane %v2419_v16, 1  ;;  %v2453_v19 = vmax.f32 %v2451_v56, %v2452_v50  ;;  %v2460_v60 = vmax.f32 %v2458_v43, %v2459_v28  ;;  %v2402_v22 = vrot.slane %v2401_v40, 1 }
 0xae1   :  { %v2412_v10 = vmax.f32 %v2410_v59, %v2411_v2  ;;  %v2429_v47 = vrot.slane %v2428_v48, 1  ;;  %v2446_v24 = vmax.f32 %v2444_v53, %v2445_v11  ;;  %v2438_v37 = vrot.slane %v2437_v23, 1 }
 0xae2   :  { %v2421_v27 = vmax.f32 %v2419_v16, %v2420_v12  ;;  %v2454_v63 = vrot.slane %v2453_v19, 2  ;;  %v2461_v51 = vrot.slane %v2460_v60, 4  ;;  %v2467_v9 = vsel %vm2331_vm14, %v5201_v30, -inf }
 0xae3   :  { %v2430_v1 = vmax.f32 %v2428_v48, %v2429_v47  ;;  %v2447_v25 = vrot.slane %v2446_v24, 1  ;;  %v2468_v46 = vsel %vm2331_vm14, %v2330_v26, -inf  ;;  %v5776_v62 = vrot.slane %v5252_v33, 1 }
 0xae4   :  { %v2455_v32 = vmax.f32 %v2453_v19, %v2454_v63  ;;  %v2462_v56 = vmax.f32 %v2460_v60, %v2461_v51  ;;  %v2469_v59 = vmax.f32 %v2467_v9, %v2468_v46  ;;  %vm5777_vm0 = vcmask 1045509  }
 0xae5   :  { %v2394_v4 = vmax.f32 %v5252_v33, %v5776_v62  ;;  %v2496_v11 = vsel %vm5777_vm0, %v5284_v41, %v2495_v17  ;;  %v2403_v18 = vmax.f32 %v2401_v40, %v2402_v22  ;;  %v2439_v53 = vmax.f32 %v2437_v23, %v2438_v37 }
 0xae6   :  { %vm5778_vm15 = vcmask 1041409   ;;  %v2456_v39 = vrot.slane %v2455_v32, 1  ;;  %v2463_v50 = vrot.slane %v2462_v56, 2  ;;  %v2470_v28 = vrot.slane %v2469_v59, 4 }
 0xae7   :  { %v2499_v16 = vsel %vm5778_vm15, %v2421_v27, %v2412_v10  ;;  %vm5779_vm10 = vcmask 1042434   ;;  %v2448_v26 = vmax.f32 %v2446_v24, %v2447_v25  ;;  %vm5780_vm2 = vcmask 1043459  }
 0xae8   :  { %v2500_v30 = vsel %vm5779_vm10, %v2430_v1, %v2499_v16  ;;  %v2464_v48 = vmax.f32 %v2462_v56, %v2463_v50  ;;  %v2471_v33 = vmax.f32 %v2469_v59, %v2470_v28  ;;  %vm5781_vm3 = vcmask 1046534  }
 0xae9   :  { %v2501_v2 = vsel %vm5780_vm2, %v2439_v53, %v2500_v30  ;;  %v2497_v43 = vsel %vm5781_vm3, %v2394_v4, %v2496_v11  ;;  %vm5782_vm4 = vcmask 1044484   ;;  %v2457_v19 = vmax.f32 %v2455_v32, %v2456_v39  ;;  %vm5785_vm10 = vmmov %vm5781_vm3 }
 0xaea   :  { %v2502_v12 = vsel %vm5782_vm4, %v2448_v26, %v2501_v2  ;;  %v2465_v41 = vrot.slane %v2464_v48, 1  ;;  %v2472_v17 = vrot.slane %v2471_v33, 2  ;;  %vm5783_vm0 = vcmask 1047559  }
 0xaeb   :  { %v2498_v40 = vsel %vm5783_vm0, %v2403_v18, %v2497_v43  ;;  %vm5784_vm15 = vcmask 1045509   ;;  %vm5786_vm2 = vmmov %vm5783_vm0  ;;  %vm2516_vm3 = vcmask 130048  }
 0xaec   :  { %v2473_v23 = vmax.f32 %v2471_v33, %v2472_v17  ;;  %v2503_v60 = vsel %vm5784_vm15, %v2457_v19, %v2502_v12  ;;  %v2466_v22 = vmax.f32 %v2464_v48, %v2465_v41  ;;  %v2508_v10 = vsub.f32 %v5118_v42, %v2498_v40 }
 0xaee   :  { %v2474_v47 = vrot.slane %v2473_v23, 1  ;;  %v2504_v24 = vsel %vm5785_vm10, %v2466_v22, %v2503_v60  ;;  %v2510_v37 = vmul.f32 1.442695, %v2508_v10  ;;  %v1800_v60 = vld [vmem:[#allocation17 + $0xb8] sm:$0xff]  ;;  %v1799_v22 = vld [vmem:[#allocation17 + $0xb0] sm:$0xff]  ;;  %v2005_v10 = vpop.f32.mrf.mxu3 }
 0xaef   :  { %2629 = vmatpush.msrb.mxu3 %v1800_v60 }
 0xaf0   :  { %v2475_v27 = vmax.f32 %v2473_v23, %v2474_v47  ;;  %3870 = vpow2.f32 %v2510_v37  ;;  %v2028_v23 = vpop.f32.mrf.mxu0  ;;  %v1798_v47 = vld [vmem:[#allocation17 + $0xa8] sm:$0xff] }
 0xaf1   :  { %2630 = vmatpush.msrb.mxu3 %v1799_v22  ;;  %v3813_v22 = vld [vmem:[#allocation22 + $0x1] ss:$0 sm:$0xff] }
 0xaf2   :  { %v2505_v63 = vsel %vm5786_vm2, %v2475_v27, %v2504_v24 }
 0xaf3   :  { %v2509_v51 = vsub.f32 %v5178_v0, %v2505_v63  ;;  %2631 = vmatpush.msrb.mxu3 %v1798_v47  ;;  %v2029_v63 = vadd.f32 %v2028_v23, %v2005_v10  ;;  %v3815_v23 = vld [vmem:[#allocation23] ss:$0 sm:$0xff] }
 0xaf5   :  { %v2512_v1 = vmul.f32 1.442695, %v2509_v51  ;;  %v3812_v51 = vld [vmem:[%s5635_s19 + $0x2] ss:$0 sm:$0xff] }
 0xaf6   :  { %v3871_v25 = vpop.eup %3870  ;;  %v2008_v27 = vpop.f32.mrf.mxu3 }
 0xaf7   :  { %3872 = vpow2.f32 %v2512_v1  ;;  %v2514_v62 = vmul.f32 %v3871_v25, %v5096_v13 }
 0xaf8   :  { %v2031_v24 = vpop.f32.mrf.mxu0 }
 0xaf9   :  { %v2032_v37 = vadd.f32 %v2031_v24, %v2008_v27 }
 0xafb   :  { %v2038_v1 = vadd.f32 %v3812_v51, %v2032_v37 }
 0xafd   :  { %v3873_v9 = vpop.eup %3872 }
 0xafe   :  { %v2515_v46 = vmul.f32 %v3873_v9, %v5125_v29 }
 0xb00   :  { %2537 = vmatpush.msrb.mxu1 %v2515_v46 }
 0xb02   :  { %2538 = vmatpush.msrb.mxu1 %v2514_v62 }
 0xb03   :  { %3704 = vmatmul.msk.f32.vlgmr.msrb.gmra.mxu1 %vm2516_vm3, %v4985_v20 }
 0xb0b   :  { %3705 = vmatmul.msk.f32.gmra.mxu1 %vm2516_vm3, %v4945_v35 }
 0xb80   :  { %v2540_v42 = vpop.f32.mrf.mxu1 }
 0xb81   :  { %v2541_v0 = vadd.f32 1e-16, %v2540_v42 }
 0xb83   :  { %3874 = vrcp.f32 %v2541_v0  ;;  %v2557_v18 = vand.u32 2147483648, %v2541_v0  ;;  %v2555_v16 = vand.u32 2147483647, %v2541_v0  ;;  %vm2551_vm0 = vweird.f32 %v2541_v0 }
 0xb85   :  { %v2558_v20 = vor.u32 1.1754944e-38, %v2557_v18  ;;  %vm2556_vm10 = vcmp.eq.f32.partialorder %v2555_v16, 8.507059e+37  ;;  %v1820_v18 = vld [vmem:[#allocation20 + $0x18] sm:$0xff]  ;;  %v1819_v16 = vld [vmem:[#allocation20 + $0x10] sm:$0xff] }
 0xb86   :  { %2678 = vmatpush.msra.mxu1 %v1820_v18 }
 0xb88   :  { %v2543_v4 = vpop.f32.mrf.mxu1  ;;  %2679 = vmatpush.msra.mxu1 %v1819_v16  ;;  %v3817_v16 = vld [vmem:[#allocation23 + $0x2] ss:$0 sm:$0xff] }
 0xb89   :  { %v3875_v32 = vpop.eup %3874  ;;  %v2544_v56 = vadd.f32 1e-16, %v2543_v4  ;;  %v1812_v4 = vld [vmem:[#allocation19 + $0x38] sm:$0xff] }
 0xb8a   :  { %v2547_v59 = vmul.f32 %v3875_v32, %v2541_v0  ;;  %vm2552_vm4 = vweird.f32 %v3875_v32  ;;  %v5333_v0 = vld [vmem:[#allocation14] sm:$0xff] }
 0xb8b   :  { %3876 = vrcp.f32 %v2544_v56  ;;  %vm2553_vm15 = vmor %vm2551_vm0, %vm2552_vm4  ;;  %v2572_v48 = vand.u32 2147483648, %v2544_v56  ;;  %v2570_v43 = vand.u32 2147483647, %v2544_v56  ;;  %vm2566_vm9 = vweird.f32 %v2544_v56 }
 0xb8c   :  { %v2548_v11 = vsub.f32 1.0, %v2547_v59  ;;  %v1809_v59 = vld [vmem:[#allocation19 + $0x20] sm:$0xff] }
 0xb8d   :  { %v2573_v19 = vor.u32 1.1754944e-38, %v2572_v48  ;;  %vm2571_vm8 = vcmp.eq.f32.partialorder %v2570_v43, 8.507059e+37  ;;  %v1826_v48 = vld [vmem:[#allocation20 + $0x48] sm:$0xff]  ;;  %v3814_v43 = vld [vmem:[%s5635_s19 + $0x3] ss:$0 sm:$0xff] }
 0xb8e   :  { %v2549_v53 = vmul.f32 %v3875_v32, %v2548_v11  ;;  %v1797_v11 = vld [vmem:[#allocation17 + $0xa0] sm:$0xff] }
 0xb8f   :  { %2632 = vmatpush.msrb.mxu3 %v1797_v11 }
 0xb90   :  { %v2550_v39 = vadd.f32 %v3875_v32, %v2549_v53  ;;  %v1824_v53 = vld [vmem:[#allocation20 + $0x38] sm:$0xff] }
 0xb91   :  { %v3877_v50 = vpop.eup %3876  ;;  %2745 = vmatpush.msra.mxu3 %v1824_v53 }
 0xb92   :  { %v2562_v28 = vmul.f32 %v3877_v50, %v2544_v56  ;;  %v2554_v35 = vsel %vm2553_vm15, %v3875_v32, %v2550_v39  ;;  %vm2567_vm2 = vweird.f32 %v3877_v50  ;;  %v1811_v32 = vld [vmem:[#allocation19 + $0x30] sm:$0xff]  ;;  %v1810_v56 = vld [vmem:[#allocation19 + $0x28] sm:$0xff] }
 0xb93   :  { %v2559_v30 = vsel %vm2556_vm10, %v2558_v20, %v2554_v35  ;;  %vm2568_vm13 = vmor %vm2566_vm9, %vm2567_vm2  ;;  %v1823_v39 = vld [vmem:[#allocation20 + $0x30] sm:$0xff]  ;;  %v1818_v20 = vld [vmem:[#allocation20 + $0x8] sm:$0xff] }
 0xb94   :  { %v2563_v26 = vsub.f32 1.0, %v2562_v28  ;;  %v2560_v2 = vmul.f32 %v2559_v30, %v2514_v62  ;;  %2746 = vmatpush.msra.mxu3 %v1823_v39  ;;  %v1822_v28 = vld [vmem:[#allocation20 + $0x28] sm:$0xff]  ;;  %v1817_v35 = vld [vmem:[#allocation20] sm:$0xff]  ;;  %2680 = vmatpush.msra.mxu1 %v1818_v20 }
 0xb95   :  { %v1821_v30 = vld [vmem:[#allocation20 + $0x20] sm:$0xff] }
 0xb96   :  { %2578 = vperm.xlu0 %3800, %v2560_v2   ;;  %v2564_v33 = vmul.f32 %v3877_v50, %v2563_v26  ;;  %2747 = vmatpush.msra.mxu3 %v1822_v28  ;;  %v1828_v26 = vld [vmem:[#allocation20 + $0x58] sm:$0xff]  ;;  %v1827_v2 = vld [vmem:[#allocation20 + $0x50] sm:$0xff] }
 0xb97   :  { %2681 = vmatpush.msra.mxu1 %v1817_v35  ;;  %v2837_v28 = vld [vmem:[#allocation17 + $0xd8] sm:$0xff] }
 0xb98   :  { %v2565_v12 = vadd.f32 %v3877_v50, %v2564_v33  ;;  %2748 = vmatpush.msra.mxu3 %v1821_v30  ;;  %v1825_v33 = vld [vmem:[#allocation20 + $0x40] sm:$0xff]  ;;  %v2845_v35 = vld [vmem:[#allocation17 + $0x118] sm:$0xff]  ;;  %2964 = vmatpush.msra.mxu0 %v2837_v28  ;;  %v3927_v28 = vld [vmem:[#allocation16] sm:$0xff] }
 0xb99   :  { %2815 = vmatpush.msrb.mxu1 %v1828_v26 }
 0xb9a   :  { %v2569_v41 = vsel %vm2568_vm13, %v3877_v50, %v2565_v12 }
 0xb9b   :  { %v2574_v17 = vsel %vm2571_vm8, %v2573_v19, %v2569_v41  ;;  %vm5787_vm8 = vcmask 261120   ;;  %2816 = vmatpush.msrb.mxu1 %v1827_v2  ;;  %v3810_v41 = vld [vmem:[#allocation22] ss:$0 sm:$0xff] }
 0xb9c   :  { %v2575_v40 = vmul.f32 %v2574_v17, %v2515_v46  ;;  %v2037_v46 = vadd.f32 %v3812_v51, %v2029_v63  ;;  %vm5788_vm9 = vmmov %vm5787_vm8  ;;  %v2660_v17 = vpop.f32.mrf.mxu0  ;;  %v3816_v63 = vld [vmem:[#allocation23 + $0x1] ss:$0 sm:$0xff] }
 0xb9d   :  { %2817 = vmatpush.msrb.mxu1 %v1826_v48  ;;  %vm5789_vm13 = vmmov %vm5787_vm8 }
 0xb9e   :  { %2583 = vperm.xlu1 %3799, %v2575_v40   ;;  %vm5790_vm4 = vmmov %vm5787_vm8  ;;  %v2661_v40 = vadd.f32 %v3810_v41, %v2660_v17 }
 0xb9f   :  { %2818 = vmatpush.msrb.mxu1 %v1825_v33  ;;  %vm5791_vm0 = vmmov %vm5790_vm4 }
 0xba4   :  { %v2797_v30 = vpop.f32.mrf.mxu0 }
 0xc08   :  { %v2579_v25 = vpop.permute.xlu0 %2578 }
 0xc09   :  { %v2586_v42 = vmul.f32 %v2579_v25, %v2037_v46 }
 0xc10   :  { %v2584_v9 = vpop.permute.xlu1 %2583 }
 0xc11   :  { %v2587_v62 = vmul.f32 %v2584_v9, %v2038_v1 }
 0xc13   :  { %2605 = vmatpush.msrb.mxu2 %v2587_v62 }
 0xc15   :  { %2606 = vmatpush.msrb.mxu2 %v2586_v42 }
 0xc16   :  { %3706 = vmatmul.msk.f32.vlgmr.msrb.gmra.mxu2 %vm2516_vm3, %v5333_v0 }
 0xc17   :  { %2725 = vmatpush.msra.mxu2 %v1812_v4 }
 0xc19   :  { %2726 = vmatpush.msra.mxu2 %v1811_v32 }
 0xc1b   :  { %2727 = vmatpush.msra.mxu2 %v1810_v56 }
 0xc1d   :  { %2728 = vmatpush.msra.mxu2 %v1809_v59 }
 0xc1e   :  { %3711 = vmatmul.msk.f32.vlgmr.msra.gmra.mxu2 %vm5787_vm8, %v4955_v45 }
 0xc99   :  { %v2608_v50 = vpop.f32.mrf.mxu2 }
 0xc9a   :  { %3707 = vmatmul.msk.f32.vlgmr.msrb.gmra.mxu3 %vm5788_vm9, %v2608_v50  ;;  %v3811_v50 = vld [vmem:[#allocation22 + $0x2] ss:$0 sm:$0xff] }
 0xc9b   :  { %v2798_v41 = vadd.f32 %v3811_v50, %v2797_v30  ;;  %v3925_v50 = vld [vmem:[%s5629_s13 + $0x8] sm:$0xff] }
 0xc9c   :  { %v2834_v30 = vld [vmem:[#allocation17 + $0xc0] sm:$0xff] }
 0xca1   :  { %v2730_v47 = vpop.f32.mrf.mxu2 }
 0xca2   :  { %v2731_v27 = vadd.f32 %v3813_v22, %v2730_v47 }
 0xd1d   :  { %v2634_v12 = vpop.f32.mrf.mxu3 }
 0xd1e   :  { %v5343_v19 = vadd.f32 %v3814_v43, %v2634_v12 }
 0xd20   :  { %3709 = vmatmul.msk.f32.vlgmr.msra.gmra.mxu1 %vm5789_vm13, %v5343_v19  ;;  %3712 = vmatmul.msk.f32.vlgmr.msra.gmra.mxu3 %vm5790_vm4, %v5343_v19 }
 0xd21   :  { %2993 = vmatpush.msra.mxu1 %v2845_v35  ;;  %v3928_v35 = vld [vmem:[#allocation16 + $0x8] sm:$0xff] }
 0xd28   :  { %3715 = vmatmul.msk.f32.vlgmr.msrb.gmra.mxu1 %vm5791_vm0, %v5343_v19 }
 0xd9d   :  { %v2683_v60 = vpop.f32.mrf.mxu1 }
 0xd9e   :  { %v2686_v10 = vadd.f32 %v2683_v60, %v2661_v40 }
 0xda0   :  { %v2690_v24 = vadd.f32 %v3815_v23, %v2686_v10 }
 0xda2   :  { %v3710_v37 = vmul.f32 -1.442695, %v2690_v24  ;;  %v2836_v24 = vld [vmem:[#allocation17 + $0xd0] sm:$0xff] }
 0xda3   :  { %v2750_v51 = vpop.f32.mrf.mxu3  ;;  %2965 = vmatpush.msra.mxu0 %v2836_v24  ;;  %v2875_v24 = vld [vmem:[#allocation19 + $0xb8] sm:$0xff] }
 0xda4   :  { %3878 = vpow2.f32 %v3710_v37  ;;  %v2753_v1 = vadd.f32 %v2750_v51, %v2731_v27  ;;  %v2844_v27 = vld [vmem:[#allocation17 + $0x110] sm:$0xff]  ;;  %v2835_v37 = vld [vmem:[#allocation17 + $0xc8] sm:$0xff] }
 0xda5   :  { %v2820_v20 = vpop.f32.mrf.mxu1  ;;  %2994 = vmatpush.msra.mxu1 %v2844_v27  ;;  %2966 = vmatpush.msra.mxu0 %v2835_v37  ;;  %v2874_v27 = vld [vmem:[#allocation19 + $0xb0] sm:$0xff]  ;;  %v2873_v37 = vld [vmem:[#allocation19 + $0xa8] sm:$0xff] }
 0xda6   :  { %v2757_v25 = vadd.f32 %v3816_v63, %v2753_v1  ;;  %v2821_v12 = vadd.f32 %v3817_v16, %v2820_v20  ;;  %v2843_v63 = vld [vmem:[#allocation17 + $0x108] sm:$0xff]  ;;  %v3926_v20 = vld [vmem:[%s5628_s12 + $0x8] sm:$0xff] }
 0xda7   :  { %2995 = vmatpush.msra.mxu1 %v2843_v63  ;;  %v2851_v16 = vld [vmem:[#allocation17 + $0x148] sm:$0xff]  ;;  %2967 = vmatpush.msra.mxu0 %v2834_v30  ;;  %v2872_v63 = vld [vmem:[#allocation19 + $0xa0] sm:$0xff] }
 0xda8   :  { %v3713_v9 = vmul.f32 -1.442695, %v2757_v25 }
 0xdaa   :  { %v3879_v46 = vpop.eup %3878  ;;  %3880 = vpow2.f32 %v3713_v9 }
 0xdab   :  { %v2694_v62 = vadd.f32 1.0, %v3879_v46 }
 0xdad   :  { %3882 = vrcp.f32 %v2694_v62  ;;  %v2706_v11 = vand.u32 2147483648, %v2694_v62  ;;  %v2704_v53 = vand.u32 2147483647, %v2694_v62  ;;  %vm2700_vm10 = vweird.f32 %v2694_v62 }
 0xdaf   :  { %v2707_v48 = vor.u32 1.1754944e-38, %v2706_v11  ;;  %vm2705_vm8 = vcmp.eq.f32.partialorder %v2704_v53, 8.507059e+37  ;;  %v3923_v11 = vld [vmem:[%s5629_s13] sm:$0xff]  ;;  %v2839_v53 = vld [vmem:[#allocation17 + $0xe8] sm:$0xff] }
 0xdb0   :  { %v3881_v42 = vpop.eup %3880 }
 0xdb1   :  { %v2761_v4 = vadd.f32 1.0, %v3881_v42 }
 0xdb3   :  { %v3883_v32 = vpop.eup %3882  ;;  %3884 = vrcp.f32 %v2761_v4  ;;  %v2773_v23 = vand.u32 2147483648, %v2761_v4  ;;  %v2771_v22 = vand.u32 2147483647, %v2761_v4  ;;  %vm2767_vm13 = vweird.f32 %v2761_v4 }
 0xdb4   :  { %v2696_v56 = vmul.f32 %v3883_v32, %v2694_v62  ;;  %vm2701_vm15 = vweird.f32 %v3883_v32 }
 0xdb5   :  { %vm2702_vm2 = vmor %vm2700_vm10, %vm2701_vm15  ;;  %v2774_v51 = vor.u32 1.1754944e-38, %v2773_v23  ;;  %vm2772_vm0 = vcmp.eq.f32.partialorder %v2771_v22, 8.507059e+37  ;;  %vm5792_vm15 = vcmask 261120   ;;  %vm5793_vm10 = vcmask 64512   ;;  %v2866_v23 = vld [vmem:[#allocation19 + $0x70] sm:$0xff]  ;;  %v2864_v22 = vld [vmem:[#allocation19 + $0x60] sm:$0xff] }
 0xdb6   :  { %v2697_v59 = vsub.f32 1.0, %v2696_v56  ;;  %v2841_v56 = vld [vmem:[#allocation17 + $0xf8] sm:$0xff] }
 0xdb8   :  { %v2698_v18 = vmul.f32 %v3883_v32, %v2697_v59  ;;  %v2853_v59 = vld [vmem:[#allocation17 + $0x158] sm:$0xff] }
 0xdb9   :  { %v3885_v39 = vpop.eup %3884 }
 0xdba   :  { %v2763_v26 = vmul.f32 %v3885_v39, %v2761_v4  ;;  %v2699_v2 = vadd.f32 %v3883_v32, %v2698_v18  ;;  %vm2768_vm9 = vweird.f32 %v3885_v39  ;;  %v2852_v18 = vld [vmem:[#allocation17 + $0x150] sm:$0xff] }
 0xdbb   :  { %vm2769_vm4 = vmor %vm2767_vm13, %vm2768_vm9 }
 0xdbc   :  { %v2764_v33 = vsub.f32 1.0, %v2763_v26  ;;  %v2703_v43 = vsel %vm2702_vm2, %v3883_v32, %v2699_v2  ;;  %vm5794_vm2 = vmmov %vm5793_vm10  ;;  %v2842_v26 = vld [vmem:[#allocation17 + $0x100] sm:$0xff] }
 0xdbd   :  { %v2708_v17 = vsel %vm2705_vm8, %v2707_v48, %v2703_v43  ;;  %vm5795_vm8 = vmmov %vm5794_vm2  ;;  %v2850_v2 = vld [vmem:[#allocation17 + $0x140] sm:$0xff]  ;;  %2996 = vmatpush.msra.mxu1 %v2842_v26  ;;  %v2849_v48 = vld [vmem:[#allocation17 + $0x138] sm:$0xff] }
 0xdbe   :  { %v2765_v40 = vmul.f32 %v3885_v39, %v2764_v33  ;;  %v2823_v60 = vmul.f32 %v2821_v12, %v2708_v17  ;;  %vm5796_vm9 = vmmov %vm5794_vm2  ;;  %v2848_v33 = vld [vmem:[#allocation17 + $0x130] sm:$0xff]  ;;  %3067 = vmatpush.msrb.mxu0 %v2849_v48  ;;  %v2847_v43 = vld [vmem:[#allocation17 + $0x128] sm:$0xff] }
 0xdbf   :  { %vm5797_vm13 = vmmov %vm5792_vm15  ;;  %v2846_v12 = vld [vmem:[#allocation17 + $0x120] sm:$0xff] }
 0xdc0   :  { %v2766_v10 = vadd.f32 %v3885_v39, %v2765_v40  ;;  %v2824_v47 = vadd.f32 %v2823_v60, %v2798_v41  ;;  %3068 = vmatpush.msrb.mxu0 %v2848_v33  ;;  %v2867_v41 = vld [vmem:[#allocation19 + $0x78] sm:$0xff]  ;;  %v2865_v60 = vld [vmem:[#allocation19 + $0x68] sm:$0xff] }
 0xdc2   :  { %v2770_v1 = vsel %vm2769_vm4, %v3885_v39, %v2766_v10  ;;  %3886 = vtanh.f32 %v2824_v47  ;;  %v2838_v39 = vld [vmem:[#allocation17 + $0xe0] sm:$0xff]  ;;  %vm5798_vm4 = vmmov %vm5797_vm13  ;;  %3069 = vmatpush.msrb.mxu0 %v2847_v43 }
 0xdc3   :  { %v2775_v25 = vsel %vm2772_vm0, %v2774_v51, %v2770_v1  ;;  %vm5799_vm0 = vmmov %vm5798_vm4  ;;  %v3818_v1 = vld [vmem:[%s5635_s19 + $0x4] ss:$0 sm:$0xff] }
 0xdc4   :  { %v2826_v9 = vsub.f32 1.0, %v2775_v25  ;;  %v2828_v42 = vmul.f32 %v2775_v25, %v5343_v19  ;;  %v2840_v19 = vld [vmem:[#allocation17 + $0xf0] sm:$0xff]  ;;  %3070 = vmatpush.msrb.mxu0 %v2846_v12  ;;  %v3819_v25 = vld [vmem:[%s5635_s19 + $0x5] ss:$0 sm:$0xff] }
 0xdc8   :  { %v3887_v46 = vpop.eup %3886 }
 0xdc9   :  { %v2827_v62 = vmul.f32 %v3887_v46, %v2826_v9 }
 0xdcb   :  { %v2829_v4 = vadd.f32 %v2828_v42, %v2827_v62 }
 0xdcd   :  { %v5353_v32 = vadd.f32 %v2829_v4, %v4955_v45  ;;  %v3924_v45 = vld [vmem:[%s5628_s12] sm:$0xff] }
 0xdcf   :  { %2832 = vst.msk [vmem:[#allocation25 + $0x8] sm:$0xff] %vm5792_vm15, %v5353_v32  ;;  %2912 = vmatpush.msrb.mxu2 %v5353_v32  ;;  %2935 = vmatpush.msrb.mxu3 %v5353_v32  ;;  %vm5800_vm15 = vmmov %vm5799_vm0 }
 0xdd0   :  { %3720 = vmatmul.msk.f32.vlgmr.msrb.gmra.mxu2 %vm5793_vm10, %v3923_v11  ;;  %3722 = vmatmul.msk.f32.vlgmr.msrb.gmra.mxu3 %vm5794_vm2, %v3924_v45  ;;  %vm5801_vm10 = vmmov %vm5799_vm0 }
 0xdd1   :  { %3016 = vmatpush.msra.mxu2 %v2841_v56  ;;  %3044 = vmatpush.msra.mxu3 %v2853_v59  ;;  %vm5802_vm2 = vmmov %vm5799_vm0 }
 0xdd3   :  { %3017 = vmatpush.msra.mxu2 %v2840_v19  ;;  %3045 = vmatpush.msra.mxu3 %v2852_v18 }
 0xdd5   :  { %3018 = vmatpush.msra.mxu2 %v2839_v53  ;;  %3046 = vmatpush.msra.mxu3 %v2851_v16 }
 0xdd7   :  { %3019 = vmatpush.msra.mxu2 %v2838_v39  ;;  %3047 = vmatpush.msra.mxu3 %v2850_v2 }
 0xdd8   :  { %3721 = vmatmul.msk.f32.gmra.mxu2 %vm5795_vm8, %v3925_v50  ;;  %3723 = vmatmul.msk.f32.gmra.mxu3 %vm5796_vm9, %v3926_v20  ;;  %vm5803_vm8 = vmmov %vm5799_vm0 }
 0xdd9   :  { %vm5804_vm9 = vmmov %vm5799_vm0 }
 0xde0   :  { %3728 = vmatmul.msk.f32.vlgmr.msra.gmra.mxu2 %vm5797_vm13, %v3927_v28  ;;  %vm5805_vm13 = vmmov %vm5799_vm0 }
 0xde8   :  { %3729 = vmatmul.msk.f32.gmra.mxu2 %vm5798_vm4, %v3928_v35  ;;  %vm5806_vm4 = vmmov %vm5799_vm0 }
 0xe53   :  { %v2914_v17 = vpop.f32.mrf.mxu2  ;;  %v2937_v40 = vpop.f32.mrf.mxu3 }
 0xe54   :  { %3724 = vmatmul.msk.f32.vlgmr.msra.gmra.mxu0 %vm5799_vm0, %v2914_v17  ;;  %3726 = vmatmul.msk.f32.vlgmr.msra.gmra.mxu1 %vm5800_vm15, %v2937_v40  ;;  %vm5807_vm15 = vmmov %vm5799_vm0 }
 0xe55   :  { %3730 = vmatmul.msk.f32.vlgmr.msra.gmra.mxu3 %vm5801_vm10, %v2937_v40  ;;  %3446 = vmatpush.msra.mxu0 %v2867_v41  ;;  %vm5808_vm10 = vmmov %vm5799_vm0 }
 0xe57   :  { %3447 = vmatpush.msra.mxu0 %v2866_v23 }
 0xe59   :  { %3448 = vmatpush.msra.mxu0 %v2865_v60 }
 0xe5b   :  { %v2917_v10 = vpop.f32.mrf.mxu2  ;;  %v2940_v47 = vpop.f32.mrf.mxu3  ;;  %3449 = vmatpush.msra.mxu0 %v2864_v22 }
 0xe5c   :  { %3725 = vmatmul.msk.f32.gmra.mxu0 %vm5802_vm2, %v2917_v10  ;;  %3727 = vmatmul.msk.f32.gmra.mxu1 %vm5803_vm8, %v2940_v47  ;;  %vm5809_vm2 = vmmov %vm5799_vm0 }
 0xe5d   :  { %3731 = vmatmul.msk.f32.gmra.mxu3 %vm5804_vm9, %v2940_v47  ;;  %vm5810_vm9 = vcmp.gt.f32.partialorder %v5096_v13, 0.5 }
 0xe63   :  { %v3021_v51 = vpop.f32.mrf.mxu2 }
 0xe64   :  { %3732 = vmatmul.msk.f32.vlgmr.msrb.gmra.mxu0 %vm5805_vm13, %v3927_v28  ;;  %vm5811_vm13 = vcmp.gt.f32.partialorder %v5043_v34, 0.5 }
 0xe65   :  { %3583 = vmatpush.msrb.mxu0 %v2875_v24 }
 0xe67   :  { %3584 = vmatpush.msrb.mxu0 %v2874_v27 }
 0xe69   :  { %3585 = vmatpush.msrb.mxu0 %v2873_v37  ;;  %v5819_v37 = vld [vmem:[#allocation44_spill] sm:$0xff] }
 0xe6b   :  { %3586 = vmatpush.msrb.mxu0 %v2872_v63  ;;  %v3024_v59 = vpop.f32.mrf.mxu2  ;;  %v5821_v63 = vld [vmem:[#allocation45_spill] sm:$0xff] }
 0xe6c   :  { %3733 = vmatmul.msk.f32.gmra.mxu0 %vm5806_vm4, %v3928_v35  ;;  %vm5812_vm4 = vcmp.gt.f32.partialorder %v5059_v8, 0.5 }
 0xe74   :  { %3738 = vmatmul.msk.f32.vlgmr.msra.gmra.mxu0 %vm5799_vm0, %v5353_v32  ;;  %vm5818_vm0 = vcmp.gt.f32.partialorder %v5125_v29, 0.5 }
 0xe7c   :  { %3744 = vmatmul.msk.f32.vlgmr.msrb.gmra.mxu0 %vm5807_vm15, %v5353_v32  ;;  %vm5820_vm15 = vcmp.gt.f32.partialorder %v5819_v37, 0.5 }
 0xed1   :  { %v2969_v9 = vpop.f32.mrf.mxu0  ;;  %v2998_v46 = vpop.f32.mrf.mxu1 }
 0xed2   :  { %v2970_v62 = vadd.f32 %v3818_v1, %v2969_v9  ;;  %v3022_v42 = vadd.f32 %v3021_v51, %v2998_v46  ;;  %v5830_v9 = vld [vmem:[#allocation36_spill] sm:$0xff] }
 0xed4   :  { %v3030_v4 = vadd.f32 %v3819_v25, %v3022_v42 }
 0xed6   :  { %v3083_v56 = vmul.f32 %v3030_v4, %v2970_v62 }
 0xed8   :  { %v3085_v11 = vsel %vm5808_vm10, %v3083_v56, 0.0  ;;  %vm5822_vm10 = vcmp.gt.f32.partialorder %v5821_v63, 0.5 }
 0xed9   :  { %v3001_v45 = vpop.f32.mrf.mxu1  ;;  %3086 = vadd.xlane.f32.xlu2 %v3085_v11  ;;  %v2972_v19 = vpop.f32.mrf.mxu0 }
 0xeda   :  { %v3025_v18 = vadd.f32 %v3024_v59, %v3001_v45  ;;  %v2973_v53 = vadd.f32 %v3818_v1, %v2972_v19 }
 0xedc   :  { %v3031_v16 = vadd.f32 %v3819_v25, %v3025_v18 }
 0xede   :  { %v3084_v39 = vmul.f32 %v3031_v16, %v2973_v53 }
 0xee0   :  { %v3088_v50 = vsel %vm5809_vm2, %v3084_v39, 0.0  ;;  %vm5823_vm2 = vcmp.gt.f32.partialorder %v5033_v49, 0.5 }
 0xee1   :  { %3089 = vadd.xlane.f32.xlu1 %v3088_v50 }
 0xf4c   :  { %v3087_v20 = vpop.xlane.xlu2 %3086 }
 0xf4d   :  { %v3091_v28 = vmul.f32 0.17677669, %v3087_v20 }
 0xf4f   :  { %vm3093_vm8 = vcmp.ge.f32.partialorder %v3091_v28, 0.0  ;;  %v3095_v35 = vmul.f32 0.2, %v3091_v28 }
 0xf51   :  { %v3097_v30 = vsel %vm3093_vm8, %v3091_v28, %v3095_v35  ;;  %vm5824_vm8 = vcmp.gt.f32.partialorder %v5041_v38, 0.5 }
 0xf52   :  { %v5399_v26 = vsel %vm5810_vm9, %v3097_v30, -1e+30  ;;  %vm5825_vm9 = vcmp.gt.f32.partialorder %v5045_v44, 0.5 }
 0xf53   :  { %v3117_v2 = vsel %vm2283_vm12, %v5399_v26, -1e+30  ;;  %v3119_v48 = vsel %vm2285_vm5, %v5399_v26, -1e+30  ;;  %v3121_v33 = vsel %vm5811_vm13, %v5399_v26, -1e+30 }
 0xf54   :  { %v3090_v43 = vpop.xlane.xlu1 %3089  ;;  %v3123_v12 = vsel %vm2289_vm7, %v5399_v26, -1e+30  ;;  %v3125_v13 = vsel %vm5812_vm4, %v5399_v26, -1e+30  ;;  %v3127_v52 = vsel %vm2293_vm6, %v5399_v26, -1e+30 }
 0xf55   :  { %v3092_v41 = vmul.f32 0.17677669, %v3090_v43  ;;  %vm5813_vm12 = vcmp.gt.f32.partialorder %v5079_v14, 0.5  ;;  %v3131_v34 = vsel %vm2297_vm11, %v5399_v26, -1e+30  ;;  %v3205_v15 = vsel %vm2331_vm14, %v3117_v2, -inf }
 0xf56   :  { %v3129_v55 = vsel %vm5813_vm12, %v5399_v26, -1e+30  ;;  %v3214_v17 = vsel %vm2331_vm14, %v3119_v48, -inf  ;;  %v3223_v8 = vsel %vm2331_vm14, %v3121_v33, -inf  ;;  %v3232_v40 = vsel %vm2331_vm14, %v3123_v12, -inf }
 0xf57   :  { %vm3094_vm7 = vcmp.ge.f32.partialorder %v3092_v41, 0.0  ;;  %v3096_v21 = vmul.f32 0.2, %v3092_v41  ;;  %v3241_v23 = vsel %vm2331_vm14, %v3125_v13, -inf  ;;  %v3250_v60 = vsel %vm2331_vm14, %v3127_v52, -inf }
 0xf58   :  { %v3259_v14 = vsel %vm2331_vm14, %v3129_v55, -inf  ;;  %v3268_v22 = vsel %vm2331_vm14, %v3131_v34, -inf  ;;  %v5436_v7 = vsel %vm2267_vm1, %v5399_v26, -1e+30  ;;  %vm5814_vm6 = vcmp.gt.f32.partialorder %v5048_v36, 0.5 }
 0xf59   :  { %v5441_v10 = vsel %vm5814_vm6, %v5399_v26, -1e+30  ;;  %v3098_v47 = vsel %vm3094_vm7, %v3092_v41, %v3096_v21  ;;  %vm5815_vm11 = vcmp.gt.f32.partialorder %v5057_v5, 0.5  ;;  %vm5816_vm5 = vcmp.gt.f32.partialorder %v5065_v57, 0.5 }
 0xf5a   :  { %v5446_v24 = vsel %vm5815_vm11, %v5399_v26, -1e+30  ;;  %v5451_v27 = vsel %vm5816_vm5, %v5399_v26, -1e+30  ;;  %vm5817_vm1 = vcmp.gt.f32.partialorder %v5073_v31, 0.5  ;;  %vm5826_vm13 = vcmp.gt.f32.partialorder %v5055_v3, 0.5 }
 0xf5b   :  { %v5456_v6 = vsel %vm5817_vm1, %v5399_v26, -1e+30  ;;  %v5460_v36 = vsel %vm5818_vm0, %v3098_v47, -1e+30  ;;  %v5465_v5 = vsel %vm5820_vm15, %v5399_v26, -1e+30 }
 0xf5c   :  { %v5470_v57 = vsel %vm5822_vm10, %v5399_v26, -1e+30  ;;  %v3118_v31 = vsel %vm5823_vm2, %v5460_v36, -1e+30  ;;  %v3120_v29 = vsel %vm5824_vm8, %v5460_v36, -1e+30 }
 0xf5d   :  { %v3122_v51 = vsel %vm5825_vm9, %v5460_v36, -1e+30  ;;  %v3124_v1 = vsel %vm5826_vm13, %v5460_v36, -1e+30  ;;  %vm5827_vm4 = vcmp.gt.f32.partialorder %v5063_v54, 0.5  ;;  %vm5828_vm12 = vcmp.gt.f32.partialorder %v5071_v61, 0.5 }
 0xf5e   :  { %v3126_v25 = vsel %vm5827_vm4, %v5460_v36, -1e+30  ;;  %v3128_v49 = vsel %vm5828_vm12, %v5460_v36, -1e+30  ;;  %vm5829_vm7 = vcmp.gt.f32.partialorder %v5067_v58, 0.5  ;;  %vm5831_vm6 = vcmp.gt.f32.partialorder %v5830_v9, 0.5 }
 0xf5f   :  { %v3130_v38 = vsel %vm5829_vm7, %v5460_v36, -1e+30  ;;  %v3132_v44 = vsel %vm5831_vm6, %v5460_v36, -1e+30  ;;  %v3206_v46 = vsel %vm2331_vm14, %v3118_v31, -inf  ;;  %v3215_v3 = vsel %vm2331_vm14, %v3120_v29, -inf }
 0xf60   :  { %v3207_v62 = vmax.f32 %v3205_v15, %v3206_v46  ;;  %v3216_v42 = vmax.f32 %v3214_v17, %v3215_v3  ;;  %v3224_v54 = vsel %vm2331_vm14, %v3122_v51, -inf  ;;  %v3233_v4 = vsel %vm2331_vm14, %v3124_v1, -inf }
 0xf61   :  { %v3225_v61 = vmax.f32 %v3223_v8, %v3224_v54  ;;  %v3234_v56 = vmax.f32 %v3232_v40, %v3233_v4  ;;  %v3242_v59 = vsel %vm2331_vm14, %v3126_v25, -inf  ;;  %v3251_v58 = vsel %vm2331_vm14, %v3128_v49, -inf }
 0xf62   :  { %v3208_v11 = vrot.slane %v3207_v62, 4  ;;  %v3217_v45 = vrot.slane %v3216_v42, 4  ;;  %v3243_v19 = vmax.f32 %v3241_v23, %v3242_v59  ;;  %v3252_v18 = vmax.f32 %v3250_v60, %v3251_v58  ;;  %v5833_v59 = vld [vmem:[#allocation40_spill] sm:$0xff] }
 0xf63   :  { %v3226_v53 = vrot.slane %v3225_v61, 4  ;;  %v3235_v16 = vrot.slane %v3234_v56, 4  ;;  %v3260_v39 = vsel %vm2331_vm14, %v3130_v38, -inf  ;;  %v3269_v50 = vsel %vm2331_vm14, %v3132_v44, -inf }
 0xf64   :  { %v3209_v20 = vmax.f32 %v3207_v62, %v3208_v11  ;;  %v3218_v28 = vmax.f32 %v3216_v42, %v3217_v45  ;;  %v3244_v35 = vrot.slane %v3243_v19, 4  ;;  %v3253_v30 = vrot.slane %v3252_v18, 4 }
 0xf65   :  { %v3227_v2 = vmax.f32 %v3225_v61, %v3226_v53  ;;  %v3236_v48 = vmax.f32 %v3234_v56, %v3235_v16  ;;  %v3261_v33 = vmax.f32 %v3259_v14, %v3260_v39  ;;  %v3270_v43 = vmax.f32 %v3268_v22, %v3269_v50  ;;  %v5839_v39 = vld [vmem:[#allocation41_spill] sm:$0xff] }
 0xf66   :  { %v3210_v12 = vrot.slane %v3209_v20, 2  ;;  %v3219_v13 = vrot.slane %v3218_v28, 2  ;;  %v3245_v52 = vmax.f32 %v3243_v19, %v3244_v35  ;;  %v3254_v41 = vmax.f32 %v3252_v18, %v3253_v30  ;;  %v5836_v18 = vld [vmem:[#allocation42_spill] sm:$0xff]  ;;  %v5843_v35 = vld [vmem:[#allocation43_spill] sm:$0xff] }
 0xf67   :  { %v3228_v55 = vrot.slane %v3227_v2, 2  ;;  %v3237_v34 = vrot.slane %v3236_v48, 2  ;;  %v3262_v15 = vrot.slane %v3261_v33, 4  ;;  %v3271_v17 = vrot.slane %v3270_v43, 4 }
 0xf68   :  { %v3211_v8 = vmax.f32 %v3209_v20, %v3210_v12  ;;  %v3220_v40 = vmax.f32 %v3218_v28, %v3219_v13  ;;  %v3246_v21 = vrot.slane %v3245_v52, 2  ;;  %v3255_v23 = vrot.slane %v3254_v41, 2  ;;  %v5841_v20 = vld [vmem:[#allocation39_spill] sm:$0xff] }
 0xf69   :  { %v3229_v60 = vmax.f32 %v3227_v2, %v3228_v55  ;;  %v3238_v47 = vmax.f32 %v3236_v48, %v3237_v34  ;;  %v3263_v37 = vmax.f32 %v3261_v33, %v3262_v15  ;;  %v3272_v63 = vmax.f32 %v3270_v43, %v3271_v17  ;;  %v5846_v43 = vld [vmem:[#allocation35_spill] sm:$0xff]  ;;  %v5851_v55 = vld [vmem:[#allocation46_spill] sm:$0xff] }
 0xf6a   :  { %v3212_v31 = vrot.slane %v3211_v8, 1  ;;  %v3221_v29 = vrot.slane %v3220_v40, 1  ;;  %v3247_v14 = vmax.f32 %v3245_v52, %v3246_v21  ;;  %v3256_v22 = vmax.f32 %v3254_v41, %v3255_v23  ;;  %v5849_v52 = vld [vmem:[#allocation37_spill] sm:$0xff]  ;;  %v5853_v15 = vld [vmem:[#allocation38_spill] sm:$0xff] }
 0xf6b   :  { %v3230_v51 = vrot.slane %v3229_v60, 1  ;;  %v3239_v1 = vrot.slane %v3238_v47, 1  ;;  %v3264_v25 = vrot.slane %v3263_v37, 2  ;;  %v3273_v49 = vrot.slane %v3272_v63, 2 }
 0xf6c   :  { %v3213_v38 = vmax.f32 %v3211_v8, %v3212_v31  ;;  %v3222_v9 = vmax.f32 %v3220_v40, %v3221_v29  ;;  %v3248_v44 = vrot.slane %v3247_v14, 1  ;;  %v3257_v46 = vrot.slane %v3256_v22, 1 }
 0xf6d   :  { %v3231_v3 = vmax.f32 %v3229_v60, %v3230_v51  ;;  %v3240_v62 = vmax.f32 %v3238_v47, %v3239_v1  ;;  %v3265_v42 = vmax.f32 %v3263_v37, %v3264_v25  ;;  %v3274_v54 = vmax.f32 %v3272_v63, %v3273_v49 }
 0xf6e   :  { %v3249_v4 = vmax.f32 %v3247_v14, %v3248_v44  ;;  %v3258_v61 = vmax.f32 %v3256_v22, %v3257_v46  ;;  %vm5832_vm11 = vcmask 1041409   ;;  %vm5834_vm5 = vcmp.gt.f32.partialorder %v5833_v59, 0.5 }
 0xf6f   :  { %v3300_v56 = vsel %vm5832_vm11, %v3222_v9, %v3213_v38  ;;  %v3102_v58 = vsel %vm5834_vm5, %v5460_v36, -1e+30  ;;  %v3266_v11 = vrot.slane %v3265_v42, 1  ;;  %v3275_v45 = vrot.slane %v3274_v54, 1 }
 0xf70   :  { %vm5835_vm1 = vcmask 1042434   ;;  %vm5837_vm0 = vcmp.gt.f32.partialorder %v5836_v18, 0.5  ;;  %vm5838_vm15 = vcmask 1043459   ;;  %vm5840_vm10 = vcmp.gt.f32.partialorder %v5839_v39, 0.5 }
 0xf71   :  { %v3301_v19 = vsel %vm5835_vm1, %v3231_v3, %v3300_v56  ;;  %v3104_v53 = vsel %vm5837_vm0, %v5460_v36, -1e+30  ;;  %v3106_v50 = vsel %vm5840_vm10, %v5460_v36, -1e+30  ;;  %vm5842_vm2 = vcmp.gt.f32.partialorder %v5841_v20, 0.5  ;;  %vm5858_vm0 = vmmov %vm5838_vm15 }
 0xf72   :  { %v3302_v16 = vsel %vm5838_vm15, %v3240_v62, %v3301_v19  ;;  %v3108_v28 = vsel %vm5842_vm2, %v5460_v36, -1e+30  ;;  %vm5844_vm8 = vcmp.gt.f32.partialorder %v5843_v35, 0.5  ;;  %v3267_v2 = vmax.f32 %v3265_v42, %v3266_v11 }
 0xf73   :  { %v3110_v30 = vsel %vm5844_vm8, %v5460_v36, -1e+30  ;;  %v3276_v48 = vmax.f32 %v3274_v54, %v3275_v45  ;;  %vm5845_vm9 = vcmask 1044484   ;;  %vm5847_vm13 = vcmp.gt.f32.partialorder %v5846_v43, 0.5  ;;  %v3929_v43 = vld [vmem:[%s5632_s16 + $0x8] sm:$0xff] }
 0xf74   :  { %v3303_v33 = vsel %vm5845_vm9, %v3249_v4, %v3302_v16  ;;  %v3112_v12 = vsel %vm5847_vm13, %v5460_v36, -1e+30  ;;  %vm5848_vm4 = vcmask 1045509   ;;  %vm5850_vm12 = vcmp.gt.f32.partialorder %v5849_v52, 0.5  ;;  %vm5859_vm15 = vmmov %vm5845_vm9 }
 0xf75   :  { %v3304_v13 = vsel %vm5848_vm4, %v3258_v61, %v3303_v33  ;;  %v3114_v41 = vsel %vm5850_vm12, %v5460_v36, -1e+30  ;;  %vm5852_vm7 = vcmp.gt.f32.partialorder %v5851_v55, 0.5  ;;  %vm5854_vm6 = vcmp.gt.f32.partialorder %v5853_v15, 0.5  ;;  %vm5860_vm10 = vmmov %vm5848_vm4 }
 0xf76   :  { %v3115_v34 = vsel %vm5852_vm7, %v5399_v26, -1e+30  ;;  %v3116_v17 = vsel %vm5854_vm6, %v5460_v36, -1e+30  ;;  %vm5855_vm11 = vcmask 1046534   ;;  %v3133_v40 = vsel %vm2331_vm14, %v5436_v7, -inf }
 0xf77   :  { %v3305_v8 = vsel %vm5855_vm11, %v3267_v2, %v3304_v13  ;;  %v3134_v21 = vsel %vm2331_vm14, %v3102_v58, -inf  ;;  %v3142_v23 = vsel %vm2331_vm14, %v5441_v10, -inf  ;;  %vm5856_vm5 = vcmask 1047559   ;;  %vm5861_vm2 = vmmov %vm5855_vm11 }
 0xf78   :  { %v3306_v60 = vsel %vm5856_vm5, %v3276_v48, %v3305_v8  ;;  %v3135_v47 = vmax.f32 %v3133_v40, %v3134_v21  ;;  %v3143_v37 = vsel %vm2331_vm14, %v3104_v53, -inf  ;;  %v3151_v63 = vsel %vm2331_vm14, %v5446_v24, -inf  ;;  %vm5862_vm8 = vmmov %vm5856_vm5 }
 0xf79   :  { %v3310_v31 = vsub.f32 %v5460_v36, %v3306_v60  ;;  %v3144_v29 = vmax.f32 %v3142_v23, %v3143_v37  ;;  %v3152_v14 = vsel %vm2331_vm14, %v3106_v50, -inf  ;;  %v3160_v7 = vsel %vm2331_vm14, %v5451_v27, -inf }
 0xf7a   :  { %v3136_v22 = vrot.slane %v3135_v47, 4  ;;  %v3153_v51 = vmax.f32 %v3151_v63, %v3152_v14  ;;  %v3161_v10 = vsel %vm2331_vm14, %v3108_v28, -inf  ;;  %v3169_v1 = vsel %vm2331_vm14, %v5456_v6, -inf }
 0xf7b   :  { %v3313_v25 = vmul.f32 1.442695, %v3310_v31  ;;  %v3145_v49 = vrot.slane %v3144_v29, 4  ;;  %v3162_v38 = vmax.f32 %v3160_v7, %v3161_v10  ;;  %v3170_v24 = vsel %vm2331_vm14, %v3110_v30, -inf }
 0xf7c   :  { %v3137_v9 = vmax.f32 %v3135_v47, %v3136_v22  ;;  %v3154_v36 = vrot.slane %v3153_v51, 4  ;;  %v3171_v44 = vmax.f32 %v3169_v1, %v3170_v24  ;;  %v3178_v46 = vsel %vm2331_vm14, %v5465_v5, -inf }
 0xf7d   :  { %3888 = vpow2.f32 %v3313_v25  ;;  %v3146_v27 = vmax.f32 %v3144_v29, %v3145_v49  ;;  %v3163_v3 = vrot.slane %v3162_v38, 4  ;;  %v3179_v62 = vsel %vm2331_vm14, %v3112_v12, -inf }
 0xf7e   :  { %v3138_v42 = vrot.slane %v3137_v9, 2  ;;  %v3155_v54 = vmax.f32 %v3153_v51, %v3154_v36  ;;  %v3172_v4 = vrot.slane %v3171_v44, 4  ;;  %v3180_v6 = vmax.f32 %v3178_v46, %v3179_v62 }
 0xf7f   :  { %v3147_v61 = vrot.slane %v3146_v27, 2  ;;  %v3164_v56 = vmax.f32 %v3162_v38, %v3163_v3  ;;  %v3187_v59 = vsel %vm2331_vm14, %v5470_v57, -inf  ;;  %v3188_v58 = vsel %vm2331_vm14, %v3114_v41, -inf }
 0xf80   :  { %v3139_v11 = vmax.f32 %v3137_v9, %v3138_v42  ;;  %v3156_v45 = vrot.slane %v3155_v54, 2  ;;  %v3173_v19 = vmax.f32 %v3171_v44, %v3172_v4  ;;  %v3181_v5 = vrot.slane %v3180_v6, 4 }
 0xf81   :  { %v3148_v18 = vmax.f32 %v3146_v27, %v3147_v61  ;;  %v3165_v53 = vrot.slane %v3164_v56, 2  ;;  %v3189_v16 = vmax.f32 %v3187_v59, %v3188_v58  ;;  %v3196_v39 = vsel %vm2331_vm14, %v3115_v34, -inf  ;;  %v3932_v61 = vld [vmem:[%s5631_s15 + $0x8] sm:$0xff] }
 0xf82   :  { %v3140_v50 = vrot.slane %v3139_v11, 1  ;;  %v3157_v20 = vmax.f32 %v3155_v54, %v3156_v45  ;;  %v3174_v28 = vrot.slane %v3173_v19, 2  ;;  %v3182_v35 = vmax.f32 %v3180_v6, %v3181_v5  ;;  %v3930_v54 = vld [vmem:[%s5632_s16] sm:$0xff] }
 0xf83   :  { %v3889_v30 = vpop.eup %3888  ;;  %v3149_v2 = vrot.slane %v3148_v18, 1  ;;  %v3166_v48 = vmax.f32 %v3164_v56, %v3165_v53  ;;  %v3190_v33 = vrot.slane %v3189_v16, 4  ;;  %v3197_v57 = vsel %vm2331_vm14, %v3116_v17, -inf  ;;  %v3931_v6 = vld [vmem:[%s5631_s15] sm:$0xff] }
 0xf84   :  { %v5565_v12 = vmul.f32 %v3929_v43, %v3889_v30  ;;  %v3141_v13 = vmax.f32 %v3139_v11, %v3140_v50  ;;  %v3158_v52 = vrot.slane %v3157_v20, 1  ;;  %v3175_v41 = vmax.f32 %v3173_v19, %v3174_v28 }
 0xf85   :  { %v3150_v55 = vmax.f32 %v3148_v18, %v3149_v2  ;;  %v3167_v34 = vrot.slane %v3166_v48, 1  ;;  %v3183_v15 = vrot.slane %v3182_v35, 2  ;;  %v3191_v8 = vmax.f32 %v3189_v16, %v3190_v33 }
 0xf86   :  { %3331 = vmatpush.msrb.mxu1 %v5565_v12  ;;  %v3159_v40 = vmax.f32 %v3157_v20, %v3158_v52  ;;  %v3176_v21 = vrot.slane %v3175_v41, 1  ;;  %v3198_v23 = vmax.f32 %v3196_v39, %v3197_v57  ;;  %vm5857_vm14 = vcmask 1041409  }
 0xf87   :  { %v3168_v60 = vmax.f32 %v3166_v48, %v3167_v34  ;;  %v3184_v17 = vmax.f32 %v3182_v35, %v3183_v15  ;;  %v3192_v47 = vrot.slane %v3191_v8, 2  ;;  %v3293_v37 = vsel %vm5857_vm14, %v3150_v55, %v3141_v13  ;;  %v3072_v34 = vpop.f32.mrf.mxu0  ;;  %v3049_v15 = vpop.f32.mrf.mxu3 }
 0xf88   :  { %v3199_v63 = vrot.slane %v3198_v23, 4  ;;  %v3294_v31 = vsel %vm5835_vm1, %v3159_v40, %v3293_v37  ;;  %v3177_v29 = vmax.f32 %v3175_v41, %v3176_v21  ;;  %v2856_v40 = vld [vmem:[#allocation17 + $0x170] sm:$0xff]  ;;  %v2855_v21 = vld [vmem:[#allocation17 + $0x168] sm:$0xff]  ;;  %vm5863_vm14 = vcmask 261120  }
 0xf89   :  { %v3185_v14 = vrot.slane %v3184_v17, 1  ;;  %v3193_v7 = vmax.f32 %v3191_v8, %v3192_v47  ;;  %v3295_v22 = vsel %vm5858_vm0, %v3168_v60, %v3294_v31  ;;  %v2857_v8 = vld [vmem:[#allocation17 + $0x178] sm:$0xff]  ;;  %v3073_v31 = vadd.f32 %v3072_v34, %v3049_v15  ;;  %v3827_v34 = vld [vmem:[#allocation23 + $0x5] ss:$0 sm:$0xff] }
 0xf8a   :  { %v3200_v51 = vmax.f32 %v3198_v23, %v3199_v63  ;;  %v3296_v1 = vsel %vm5859_vm15, %v3177_v29, %v3295_v22  ;;  %3420 = vmatpush.msrb.mxu3 %v2857_v8  ;;  %v2871_v22 = vld [vmem:[#allocation19 + $0x98] sm:$0xff]  ;;  %v3821_v8 = vld [vmem:[#allocation22 + $0x5] ss:$0 sm:$0xff] }
 0xf8b   :  { %v3194_v10 = vrot.slane %v3193_v7, 1  ;;  %v3186_v25 = vmax.f32 %v3184_v17, %v3185_v14  ;;  %v3822_v17 = vld [vmem:[%s5635_s19 + $0x6] ss:$0 sm:$0xff] }
 0xf8c   :  { %v3201_v49 = vrot.slane %v3200_v51, 2  ;;  %3421 = vmatpush.msrb.mxu3 %v2856_v40  ;;  %v3081_v29 = vadd.f32 %v3822_v17, %v3073_v31 }
 0xf8d   :  { %v3297_v24 = vsel %vm5860_vm10, %v3186_v25, %v3296_v1  ;;  %v3195_v9 = vmax.f32 %v3193_v7, %v3194_v10  ;;  %v2869_v10 = vld [vmem:[#allocation19 + $0x88] sm:$0xff]  ;;  %v2868_v1 = vld [vmem:[#allocation19 + $0x80] sm:$0xff] }
 0xf8e   :  { %v3202_v38 = vmax.f32 %v3200_v51, %v3201_v49  ;;  %3422 = vmatpush.msrb.mxu3 %v2855_v21  ;;  %v2870_v51 = vld [vmem:[#allocation19 + $0x90] sm:$0xff]  ;;  %v2854_v25 = vld [vmem:[#allocation17 + $0x160] sm:$0xff]  ;;  %v2880_v49 = vld [vmem:[#allocation20 + $0x78] sm:$0xff] }
 0xf8f   :  { %v3298_v44 = vsel %vm5861_vm2, %v3195_v9, %v3297_v24  ;;  %v3075_v23 = vpop.f32.mrf.mxu0  ;;  %v2879_v24 = vld [vmem:[#allocation20 + $0x70] sm:$0xff] }
 0xf90   :  { %v3203_v36 = vrot.slane %v3202_v38, 1  ;;  %3423 = vmatpush.msrb.mxu3 %v2854_v25  ;;  %v2883_v9 = vld [vmem:[#allocation20 + $0x90] sm:$0xff] }
 0xf92   :  { %v3204_v46 = vmax.f32 %v3202_v38, %v3203_v36  ;;  %v2884_v38 = vld [vmem:[#allocation20 + $0x98] sm:$0xff]  ;;  %v2878_v36 = vld [vmem:[#allocation20 + $0x68] sm:$0xff] }
 0xf93   :  { %3536 = vmatpush.msra.mxu3 %v2884_v38 }
 0xf94   :  { %v3299_v27 = vsel %vm5862_vm8, %v3204_v46, %v3298_v44  ;;  %v2882_v44 = vld [vmem:[#allocation20 + $0x88] sm:$0xff]  ;;  %v2877_v46 = vld [vmem:[#allocation20 + $0x60] sm:$0xff] }
 0xf95   :  { %v3309_v3 = vsub.f32 %v5399_v26, %v3299_v27  ;;  %3537 = vmatpush.msra.mxu3 %v2883_v9  ;;  %v2881_v27 = vld [vmem:[#allocation20 + $0x80] sm:$0xff] }
 0xf97   :  { %v3311_v62 = vmul.f32 1.442695, %v3309_v3  ;;  %3538 = vmatpush.msra.mxu3 %v2882_v44  ;;  %v2888_v3 = vld [vmem:[#allocation20 + $0xb8] sm:$0xff] }
 0xf99   :  { %3890 = vpow2.f32 %v3311_v62  ;;  %3539 = vmatpush.msra.mxu3 %v2881_v27  ;;  %v2887_v62 = vld [vmem:[#allocation20 + $0xb0] sm:$0xff] }
 0xf9f   :  { %v3891_v42 = vpop.eup %3890 }
 0xfa0   :  { %v3315_v4 = vmul.f32 %v3930_v54, %v3891_v42  ;;  %v2886_v42 = vld [vmem:[#allocation20 + $0xa8] sm:$0xff]  ;;  %v2885_v54 = vld [vmem:[#allocation20 + $0xa0] sm:$0xff] }
 0xfa2   :  { %3332 = vmatpush.msrb.mxu1 %v3315_v4 }
 0xfa3   :  { %3734 = vmatmul.msk.f32.vlgmr.msrb.gmra.mxu1 %vm2516_vm3, %v3931_v6 }
 0xfa4   :  { %3469 = vmatpush.msra.mxu1 %v2880_v49 }
 0xfa6   :  { %3470 = vmatpush.msra.mxu1 %v2879_v24 }
 0xfa8   :  { %3471 = vmatpush.msra.mxu1 %v2878_v36 }
 0xfaa   :  { %3472 = vmatpush.msra.mxu1 %v2877_v46 }
 0xfab   :  { %3735 = vmatmul.msk.f32.gmra.mxu1 %vm2516_vm3, %v3932_v61 }
 0xfac   :  { %3606 = vmatpush.msrb.mxu1 %v2888_v3 }
 0xfae   :  { %3607 = vmatpush.msrb.mxu1 %v2887_v62 }
 0xfb0   :  { %3608 = vmatpush.msrb.mxu1 %v2886_v42 }
 0xfb2   :  { %3609 = vmatpush.msrb.mxu1 %v2885_v54 }
0x1020   :  { %v3334_v26 = vpop.f32.mrf.mxu1 }
0x1021   :  { %v3335_v56 = vadd.f32 1e-16, %v3334_v26  ;;  %v3820_v26 = vld [vmem:[#allocation22 + $0x3] ss:$0 sm:$0xff] }
0x1023   :  { %3892 = vrcp.f32 %v3335_v56  ;;  %v3351_v33 = vand.u32 2147483648, %v3335_v56  ;;  %vm3345_vm6 = vweird.f32 %v3335_v56  ;;  %v3349_v43 = vand.u32 2147483647, %v3335_v56 }
0x1025   :  { %v3352_v52 = vor.u32 1.1754944e-38, %v3351_v33  ;;  %vm3350_vm5 = vcmp.eq.f32.partialorder %v3349_v43, 8.507059e+37 }
0x1028   :  { %v3337_v59 = vpop.f32.mrf.mxu1 }
0x1029   :  { %v3338_v58 = vadd.f32 1e-16, %v3337_v59  ;;  %v3893_v11 = vpop.eup %3892 }
0x102a   :  { %v3341_v45 = vmul.f32 %v3893_v11, %v3335_v56  ;;  %vm3346_vm7 = vweird.f32 %v3893_v11  ;;  %v3451_v56 = vpop.f32.mrf.mxu0 }
0x102b   :  { %3894 = vrcp.f32 %v3338_v58  ;;  %v3366_v16 = vand.u32 2147483648, %v3338_v58  ;;  %v3364_v50 = vand.u32 2147483647, %v3338_v58  ;;  %vm3360_vm13 = vweird.f32 %v3338_v58  ;;  %vm3347_vm11 = vmor %vm3345_vm6, %vm3346_vm7 }
0x102c   :  { %v3342_v5 = vsub.f32 1.0, %v3341_v45  ;;  %v3452_v59 = vadd.f32 %v3820_v26, %v3451_v56  ;;  %v3823_v45 = vld [vmem:[#allocation22 + $0x4] ss:$0 sm:$0xff] }
0x102d   :  { %v3367_v35 = vor.u32 1.1754944e-38, %v3366_v16  ;;  %vm3365_vm12 = vcmp.eq.f32.partialorder %v3364_v50, 8.507059e+37 }
0x102e   :  { %v3343_v20 = vmul.f32 %v3893_v11, %v3342_v5 }
0x1030   :  { %v3344_v2 = vadd.f32 %v3893_v11, %v3343_v20 }
0x1031   :  { %v3895_v19 = vpop.eup %3894 }
0x1032   :  { %v3356_v18 = vmul.f32 %v3895_v19, %v3338_v58  ;;  %vm3361_vm9 = vweird.f32 %v3895_v19  ;;  %v3348_v13 = vsel %vm3347_vm11, %v3893_v11, %v3344_v2  ;;  %v3825_v58 = vld [vmem:[#allocation23 + $0x3] ss:$0 sm:$0xff]  ;;  %v3588_v21 = vpop.f32.mrf.mxu0 }
0x1033   :  { %vm3362_vm4 = vmor %vm3360_vm13, %vm3361_vm9  ;;  %v3353_v41 = vsel %vm3350_vm5, %v3352_v52, %v3348_v13 }
0x1034   :  { %v3357_v53 = vsub.f32 1.0, %v3356_v18  ;;  %v3354_v55 = vmul.f32 %v3353_v41, %v3315_v4  ;;  %v3824_v4 = vld [vmem:[%s5635_s19 + $0x7] ss:$0 sm:$0xff]  ;;  %s4330_s19 = smov [#allocation25]  }
0x1035   :  { %s3628_s22 = sshll.u32 %s4330_s19, 4  ;;  %s3629_s22 = int_to_ptr.vmem [resolvable:$true] %s3628_s22 }
0x1036   :  { %v3358_v39 = vmul.f32 %v3895_v19, %v3357_v53 }
0x1038   :  { %v3359_v28 = vadd.f32 %v3895_v19, %v3358_v39  ;;  %v3826_v39 = vld [vmem:[#allocation23 + $0x4] ss:$0 sm:$0xff] }
0x103a   :  { %v3363_v30 = vsel %vm3362_vm4, %v3895_v19, %v3359_v28 }
0x103b   :  { %v3368_v48 = vsel %vm3365_vm12, %v3367_v35, %v3363_v30 }
0x103c   :  { %v3369_v57 = vmul.f32 %v3368_v48, %v5565_v12  ;;  %v3052_v12 = vpop.f32.mrf.mxu3 }
0x103d   :  { %v3076_v60 = vadd.f32 %v3075_v23, %v3052_v12 }
0x103e   :  { %3377 = vperm.xlu0 %3800, %v3369_v57  }
0x103f   :  { %v3082_v47 = vadd.f32 %v3822_v17, %v3076_v60 }
0x1046   :  { %3372 = vperm.xlu0 %3800, %v3354_v55  }
0x10b0   :  { %v3378_v37 = vpop.permute.xlu0 %3377 }
0x10b1   :  { %v3381_v63 = vmul.f32 %v3378_v37, %v3082_v47 }
0x10b3   :  { %3396 = vmatpush.msrb.mxu2 %v3381_v63  ;;  %v3589_v63 = vadd.f32 %v3821_v8, %v3588_v21 }
0x10b8   :  { %v3373_v14 = vpop.permute.xlu0 %3372 }
0x10b9   :  { %v3380_v7 = vmul.f32 %v3373_v14, %v3081_v29 }
0x10bb   :  { %3397 = vmatpush.msrb.mxu2 %v3380_v7 }
0x10bc   :  { %3736 = vmatmul.msk.f32.vlgmr.msrb.gmra.mxu2 %vm2516_vm3, %v5333_v0  ;;  %vm5864_vm3 = vmmov %vm5863_vm14 }
0x10bd   :  { %3516 = vmatpush.msra.mxu2 %v2871_v22  ;;  %vm5865_vm1 = vmmov %vm5864_vm3 }
0x10be   :  { %vm5866_vm0 = vmmov %vm5865_vm1 }
0x10bf   :  { %3517 = vmatpush.msra.mxu2 %v2870_v51  ;;  %vm5867_vm15 = vmmov %vm5866_vm0 }
0x10c0   :  { %vm5869_vm6 = vmmov %vm5866_vm0 }
0x10c1   :  { %3518 = vmatpush.msra.mxu2 %v2869_v10 }
0x10c3   :  { %3519 = vmatpush.msra.mxu2 %v2868_v1 }
0x10c4   :  { %3741 = vmatmul.msk.f32.vlgmr.msra.gmra.mxu2 %vm5863_vm14, %v5353_v32 }
0x113f   :  { %v3399_v0 = vpop.f32.mrf.mxu2 }
0x1140   :  { %3737 = vmatmul.msk.f32.vlgmr.msrb.gmra.mxu3 %vm5864_vm3, %v3399_v0 }
0x1147   :  { %v3521_v5 = vpop.f32.mrf.mxu2 }
0x1148   :  { %v3522_v53 = vadd.f32 %v3823_v45, %v3521_v5 }
0x11c3   :  { %v3425_v6 = vpop.f32.mrf.mxu3 }
0x11c4   :  { %v5599_v61 = vadd.f32 %v3824_v4, %v3425_v6 }
0x11c6   :  { %3739 = vmatmul.msk.f32.vlgmr.msra.gmra.mxu1 %vm5865_vm1, %v5599_v61  ;;  %3742 = vmatmul.msk.f32.vlgmr.msra.gmra.mxu3 %vm5866_vm0, %v5599_v61 }
0x11ce   :  { %3745 = vmatmul.msk.f32.vlgmr.msrb.gmra.mxu1 %vm5867_vm15, %v5599_v61 }
0x1243   :  { %v3474_v11 = vpop.f32.mrf.mxu1 }
0x1244   :  { %v3477_v19 = vadd.f32 %v3474_v11, %v3452_v59 }
0x1246   :  { %v3481_v18 = vadd.f32 %v3825_v58, %v3477_v19 }
0x1248   :  { %v3740_v16 = vmul.f32 -1.442695, %v3481_v18 }
0x1249   :  { %v3541_v50 = vpop.f32.mrf.mxu3 }
0x124a   :  { %3896 = vpow2.f32 %v3740_v16  ;;  %v3544_v20 = vadd.f32 %v3541_v50, %v3522_v53 }
0x124b   :  { %v3611_v40 = vpop.f32.mrf.mxu1 }
0x124c   :  { %v3548_v28 = vadd.f32 %v3826_v39, %v3544_v20  ;;  %v3612_v37 = vadd.f32 %v3827_v34, %v3611_v40 }
0x124e   :  { %v3743_v35 = vmul.f32 -1.442695, %v3548_v28 }
0x1250   :  { %v3897_v30 = vpop.eup %3896  ;;  %3898 = vpow2.f32 %v3743_v35 }
0x1251   :  { %v3485_v2 = vadd.f32 1.0, %v3897_v30 }
0x1253   :  { %3900 = vrcp.f32 %v3485_v2  ;;  %v3497_v52 = vand.u32 2147483648, %v3485_v2  ;;  %v3495_v55 = vand.u32 2147483647, %v3485_v2  ;;  %vm3491_vm2 = vweird.f32 %v3485_v2 }
0x1255   :  { %v3498_v60 = vor.u32 1.1754944e-38, %v3497_v52  ;;  %vm3496_vm9 = vcmp.eq.f32.partialorder %v3495_v55, 8.507059e+37 }
0x1256   :  { %v3899_v48 = vpop.eup %3898 }
0x1257   :  { %v3552_v33 = vadd.f32 1.0, %v3899_v48 }
0x1259   :  { %v3901_v57 = vpop.eup %3900  ;;  %3902 = vrcp.f32 %v3552_v33  ;;  %v3564_v14 = vand.u32 2147483648, %v3552_v33  ;;  %v3562_v22 = vand.u32 2147483647, %v3552_v33  ;;  %vm3558_vm4 = vweird.f32 %v3552_v33 }
0x125a   :  { %v3487_v43 = vmul.f32 %v3901_v57, %v3485_v2  ;;  %vm3492_vm10 = vweird.f32 %v3901_v57 }
0x125b   :  { %vm3493_vm8 = vmor %vm3491_vm2, %vm3492_vm10  ;;  %v3565_v1 = vor.u32 1.1754944e-38, %v3564_v14  ;;  %vm3563_vm7 = vcmp.eq.f32.partialorder %v3562_v22, 8.507059e+37 }
0x125c   :  { %v3488_v13 = vsub.f32 1.0, %v3487_v43 }
0x125e   :  { %v3489_v41 = vmul.f32 %v3901_v57, %v3488_v13 }
0x125f   :  { %v3903_v15 = vpop.eup %3902 }
0x1260   :  { %v3554_v23 = vmul.f32 %v3903_v15, %v3552_v33  ;;  %v3490_v12 = vadd.f32 %v3901_v57, %v3489_v41  ;;  %vm3559_vm13 = vweird.f32 %v3903_v15 }
0x1261   :  { %vm3560_vm12 = vmor %vm3558_vm4, %vm3559_vm13 }
0x1262   :  { %v3555_v17 = vsub.f32 1.0, %v3554_v23  ;;  %v3494_v47 = vsel %vm3493_vm8, %v3901_v57, %v3490_v12 }
0x1263   :  { %v3499_v31 = vsel %vm3496_vm9, %v3498_v60, %v3494_v47 }
0x1264   :  { %v3556_v29 = vmul.f32 %v3903_v15, %v3555_v17  ;;  %v3614_v7 = vmul.f32 %v3612_v37, %v3499_v31 }
0x1266   :  { %v3557_v51 = vadd.f32 %v3903_v15, %v3556_v29  ;;  %v3615_v10 = vadd.f32 %v3614_v7, %v3589_v63 }
0x1268   :  { %v3561_v25 = vsel %vm3560_vm12, %v3903_v15, %v3557_v51  ;;  %3904 = vtanh.f32 %v3615_v10 }
0x1269   :  { %v3566_v49 = vsel %vm3563_vm7, %v3565_v1, %v3561_v25 }
0x126a   :  { %v3617_v38 = vsub.f32 1.0, %v3566_v49  ;;  %v3619_v0 = vmul.f32 %v3566_v49, %v5599_v61 }
0x126e   :  { %v3905_v24 = vpop.eup %3904 }
0x126f   :  { %v3618_v9 = vmul.f32 %v3905_v24, %v3617_v38 }
0x1271   :  { %v3620_v36 = vadd.f32 %v3619_v0, %v3618_v9 }
0x1273   :  { %v3621_v44 = vadd.f32 %v3620_v36, %v5353_v32 }
0x1275   :  { %3623 = vst.msk [vmem:[#allocation25 + $0x10] sm:$0xff] %vm5869_vm6, %v3621_v44 }
0x1276   :  { %3636 = dma.vmem_to_hbm [thread:$0]  %s3629_s22, 384, %s3631_s2, [#allocation4], %s4312_s3, %s4312_s3, %s4313_s25  }
0x1277   :  { %4309 = dma.done.wait [#allocation4], 384  }
0x1278   :  { %4310 = vsyncadd [#allocation4], 4294966912 }
0x1279   :  { %3641 = vsyncpa [#allocation3], 1 }
0x127a   :  { %3642 = vsyncpa [#allocation6], 1 }
0x127b   :  { %3643 = vsyncpa [#allocation9], 1 }
0x127c   :  { %3644 = vsyncpa [#allocation12], 1 }
0x127d   :  { %3645 = vsyncpa [#allocation15], 1 }
0x127e   :  { %3646 = vsyncpa [#allocation18], 1 }
0x127f   :  { %3647 = vsyncpa [#allocation21], 1 }
0x1280   :  { %3648 = vsyncpa [#allocation24], 1 }
0x1281   :  { %3649 = vsyncpa [#allocation4], 1 }

</bundles_post_ra>
